<compile_context>
chip_gen: v6e
topology: v6e:2x2x1
jax: 0.10.0
libtpu: 0.0.40
codegen_flags: <defaults>
</compile_context>

<pallas_src>
import functools
import math

import jax
import jax.numpy as jnp
from jax.experimental import pallas as pl
from jax.experimental.pallas import tpu as pltpu


def _mha_kernel(x_ref, gamma_ref, beta_ref, wqkv_ref, bqkv_ref, wo_ref, bo_ref,
                out_ref, q_sc, k_sc, v_sc, *, num_heads, head_dim, block_q, eps):
    """Grid = (batch, num_q_tiles).

    x_ref:   (S, D)  full slab of the current batch element (resident across q tiles)
    out_ref: (block_q, D) output tile
    q_sc:    (num_q_tiles, H, block_q, head_dim) bf16 scratch (Q, pre-scaled)
    k_sc/v_sc: (H, S, head_dim) bf16 scratch
    """
    dim = num_heads * head_dim
    i = pl.program_id(1)

    # ---- once per batch element: LayerNorm + fused QKV projection ----------
    @pl.when(i == 0)
    def _project_qkv():
        x = x_ref[...].astype(jnp.float32)                       # (S, D)
        mean = jnp.mean(x, axis=-1, keepdims=True)
        var = jnp.mean(jnp.square(x - mean), axis=-1, keepdims=True)
        xn = (x - mean) * jax.lax.rsqrt(var + eps)
        xn = xn * gamma_ref[...] + beta_ref[...]                  # (S, D) f32
        qkv = jnp.dot(xn.astype(wqkv_ref.dtype), wqkv_ref[...],
                      preferred_element_type=jnp.float32)
        qkv = qkv + bqkv_ref[...]                                 # (S, 3D) f32
        inv_scale = 1.0 / math.sqrt(head_dim)
        num_q_tiles = q_sc.shape[0]
        # One-off layout shuffle (S, 3D) -> per-head (leading batch) slabs so the
        # attention matmuls below are canonical batched dot_generals.
        for h in range(num_heads):                                # static unroll
            lo = h * head_dim
            k_sc[h, :, :] = qkv[:, dim + lo:dim + lo + head_dim].astype(k_sc.dtype)
            v_sc[h, :, :] = qkv[:, 2 * dim + lo:2 * dim + lo + head_dim].astype(v_sc.dtype)
            for t in range(num_q_tiles):
                r0 = t * block_q
                q_sc[t, h, :, :] = (qkv[r0:r0 + block_q, lo:lo + head_dim]
                                    * inv_scale).astype(q_sc.dtype)

    # ---- attention for this q-row tile (all heads batched) -----------------
    q = q_sc[i]                                                   # (H, tq, hd) bf16, pre-scaled
    k = k_sc[...]                                                 # (H, S,  hd) bf16
    v = v_sc[...]                                                 # (H, S,  hd) bf16

    s = jnp.einsum('hqd,hkd->hqk', q, k,
                   preferred_element_type=jnp.float32)            # (H, tq, S) f32
    s = s - jnp.max(s, axis=-1, keepdims=True)
    p = jnp.exp(s)
    denom = jnp.sum(p, axis=-1, keepdims=True)
    p = p * pl.reciprocal(denom, approx=True)                     # softmax (EUP recip)
    attn = jnp.einsum('hqk,hkd->hqd', p.astype(v.dtype), v,
                      preferred_element_type=jnp.float32)         # (H, tq, hd) f32

    # ---- output projection: per-head slab of Wo, summed over heads ---------
    # (equivalent to concat-heads @ Wo, without a (H,tq,hd)->(tq,D) transpose)
    y = jnp.einsum('hqd,hde->hqe', attn.astype(wo_ref.dtype), wo_ref[...],
                   preferred_element_type=jnp.float32)            # (H, tq, D) f32
    y = jnp.sum(y, axis=0) + bo_ref[...]                          # (tq, D) f32

    # ---- residual add -------------------------------------------------------
    q0 = pl.multiple_of(i * block_q, block_q)
    x_rows = x_ref[pl.ds(q0, block_q), :].astype(jnp.float32)
    out_ref[...] = (x_rows + y).astype(out_ref.dtype)


def _make_call(B, S, D, num_heads, head_dim, block_q, out_dtype, eps,
               single_buffer_weights):
    num_q_tiles = S // block_q

    wmode = {}
    if single_buffer_weights:
        # Weight index maps are constant over the grid -> one resident copy.
        wmode = dict(pipeline_mode=pl.Buffered(1))

    x_spec = pl.BlockSpec((None, S, D), lambda b, i: (b, 0, 0))
    row_d = pl.BlockSpec((1, D), lambda b, i: (0, 0))
    row_3d = pl.BlockSpec((1, 3 * D), lambda b, i: (0, 0))
    wqkv_spec = pl.BlockSpec((D, 3 * D), lambda b, i: (0, 0), **wmode)
    wo_spec = pl.BlockSpec((num_heads, head_dim, D), lambda b, i: (0, 0, 0), **wmode)
    out_spec = pl.BlockSpec((None, block_q, D), lambda b, i: (b, i, 0))

    kernel = functools.partial(_mha_kernel, num_heads=num_heads,
                               head_dim=head_dim, block_q=block_q, eps=eps)

    # Rough VMEM budget (bytes): weights + x/out blocks + scratch + score temps.
    w_buf = 1 if single_buffer_weights else 2
    weight_bytes = 4 * D * D * 2 * w_buf
    act_bytes = 2 * S * D * 4 + 2 * block_q * D * 4
    scratch_bytes = 3 * S * D * 2
    tmp_bytes = 2 * num_heads * block_q * S * 4 + S * 3 * D * 4
    need = int(1.25 * (weight_bytes + act_bytes + scratch_bytes + tmp_bytes))
    vmem_limit = min(96 * 1024 * 1024, max(32 * 1024 * 1024, need))

    cost = pl.CostEstimate(
        flops=B * (8 * S * D * D + 4 * S * S * D),
        transcendentals=B * num_heads * S * S,
        bytes_accessed=4 * D * D * 2 + 2 * B * S * D * 4,
    )

    return pl.pallas_call(
        kernel,
        out_shape=jax.ShapeDtypeStruct((B, S, D), out_dtype),
        grid=(B, num_q_tiles),
        in_specs=[x_spec, row_d, row_d, wqkv_spec, row_3d, wo_spec, row_d],
        out_specs=out_spec,
        scratch_shapes=[
            pltpu.VMEM((num_q_tiles, num_heads, block_q, head_dim), jnp.bfloat16),
            pltpu.VMEM((num_heads, S, head_dim), jnp.bfloat16),
            pltpu.VMEM((num_heads, S, head_dim), jnp.bfloat16),
        ],
        compiler_params=pltpu.CompilerParams(
            # batch axis is independent ("parallel" -> megacore); the q-tile
            # axis carries K/V scratch written at tile 0, so it is "arbitrary".
            dimension_semantics=("parallel", "arbitrary"),
            vmem_limit_bytes=vmem_limit),
        cost_estimate=cost,
    )


def _pick_block_q(S):
    if S <= 512:
        return S
    for cand in (512, 256, 128):
        if S % cand == 0:
            return cand
    return S


def multi_head_attention(x, params, *, num_heads, eps=1e-5, block_q=None):
    B, S, D = x.shape
    assert D % num_heads == 0, "dim must be divisible by num_heads"
    head_dim = D // num_heads

    if block_q is None:
        block_q = _pick_block_q(S)
    assert S % block_q == 0

    # Pack / cast parameters: fused QKV weight (D, 3D) bf16, fused bias (1, 3D)
    # f32, output weight reshaped per-head to (H, hd, D) bf16.
    f32 = jnp.float32
    wqkv = jnp.concatenate([params["wq"], params["wk"], params["wv"]],
                           axis=1).astype(jnp.bfloat16)
    bqkv = jnp.concatenate([params["bq"], params["bk"], params["bv"]],
                           axis=1).astype(f32)
    wo_h = params["wo"].astype(jnp.bfloat16).reshape(num_heads, head_dim, D)
    gamma = params["gamma"].astype(f32)
    beta = params["beta"].astype(f32)
    bo = params["bo"].astype(f32)

    args = (x, gamma, beta, wqkv, bqkv, wo_h, bo)
    try:
        return _make_call(B, S, D, num_heads, head_dim, block_q, x.dtype, eps,
                          single_buffer_weights=True)(*args)
    except Exception:
        # pl.Buffered(1) not supported on this jax version -> default buffering.
        return _make_call(B, S, D, num_heads, head_dim, block_q, x.dtype, eps,
                          single_buffer_weights=False)(*args)


def init_params(key, dim):
    """Deterministic synthetic init mimicking nn.Linear defaults (uniform +-1/sqrt(in))."""
    bound = 1.0 / math.sqrt(dim)
    ks = jax.random.split(key, 8)

    def w(k):   # stored as (in, out) == torch W.T
        return jax.random.uniform(k, (dim, dim), jnp.float32, -bound, bound)

    def b(k):
        return jax.random.uniform(k, (1, dim), jnp.float32, -bound, bound)

    return {
        "gamma": jnp.ones((1, dim), jnp.float32),
        "beta": jnp.zeros((1, dim), jnp.float32),
        "wq": w(ks[0]), "bq": b(ks[1]),
        "wk": w(ks[2]), "bk": b(ks[3]),
        "wv": w(ks[4]), "bv": b(ks[5]),
        "wo": w(ks[6]), "bo": b(ks[7]),
    }


def _reference(x, p, num_heads, eps=1e-5):
    """Pure-JAX f32 mirror of the PyTorch module (eval mode)."""
    B, S, D = x.shape
    hd = D // num_heads
    mean = jnp.mean(x, axis=-1, keepdims=True)
    var = jnp.mean((x - mean) ** 2, axis=-1, keepdims=True)
    xn = (x - mean) / jnp.sqrt(var + eps) * p["gamma"][0] + p["beta"][0]
    q = xn @ p["wq"] + p["bq"]
    k = xn @ p["wk"] + p["bk"]
    v = xn @ p["wv"] + p["bv"]

    def heads(t):
        return t.reshape(B, S, num_heads, hd).transpose(0, 2, 1, 3)

    q, k, v = heads(q), heads(k), heads(v)
    s = (q @ jnp.swapaxes(k, -1, -2)) / math.sqrt(hd)
    a = jax.nn.softmax(s, axis=-1)
    o = (a @ v).transpose(0, 2, 1, 3).reshape(B, S, D)
    return x + (o @ p["wo"] + p["bo"])


if __name__ == "__main__":
    B, S, D, H = 2, 8, 32, 8

    key = jax.random.PRNGKey(0)
    kx, kp = jax.random.split(key)
    x = jax.random.normal(kx, (B, S, D), jnp.float32)
    params = init_params(kp, D)

    out = multi_head_attention(x, params, num_heads=H)
    jax.block_until_ready(out)
    assert out.shape == (B, S, D)

    ref = _reference(x, params, num_heads=H)
    max_err = float(jnp.max(jnp.abs(out - ref)))
    assert jnp.allclose(out, ref, atol=5e-2, rtol=5e-2), max_err

    print("KERNEL_OK")
</pallas_src>

<mosaic_0001>
module attributes {stable_mosaic.version = 11 : i64} {
  func.func @_mha_kernel(%arg0: i32, %arg1: i32, %arg2: memref<1x8x32xf32, #tpu.memory_space<vmem>>, %arg3: memref<1x32xf32, #tpu.memory_space<vmem>>, %arg4: memref<1x32xf32, #tpu.memory_space<vmem>>, %arg5: memref<32x96xbf16, #tpu.memory_space<vmem>>, %arg6: memref<1x96xf32, #tpu.memory_space<vmem>>, %arg7: memref<8x4x32xbf16, #tpu.memory_space<vmem>>, %arg8: memref<1x32xf32, #tpu.memory_space<vmem>>, %arg9: memref<1x8x32xf32, #tpu.memory_space<vmem>>, %arg10: memref<1x8x8x4xbf16, #tpu.memory_space<vmem>>, %arg11: memref<8x8x4xbf16, #tpu.memory_space<vmem>>, %arg12: memref<8x8x4xbf16, #tpu.memory_space<vmem>>) attributes {dimension_semantics = [#tpu.dimension_semantics<parallel>, #tpu.dimension_semantics<arbitrary>], iteration_bounds = array<i64: 2, 1>, scalar_prefetch = 0 : i64, scratch_operands = 3 : i64, tpu.core_type = #tpu.core_type<tc>, window_params = [{transform_indices = @transform_0, window_bounds = array<i64: 1, 8, 32>}, {pipeline_mode = #tpu.pipeline_mode<synchronous>, transform_indices = @transform_1, window_bounds = array<i64: 1, 32>}, {pipeline_mode = #tpu.pipeline_mode<synchronous>, transform_indices = @transform_2, window_bounds = array<i64: 1, 32>}, {pipeline_mode = #tpu.pipeline_mode<synchronous>, transform_indices = @transform_3, window_bounds = array<i64: 32, 96>}, {pipeline_mode = #tpu.pipeline_mode<synchronous>, transform_indices = @transform_4, window_bounds = array<i64: 1, 96>}, {pipeline_mode = #tpu.pipeline_mode<synchronous>, transform_indices = @transform_5, window_bounds = array<i64: 8, 4, 32>}, {pipeline_mode = #tpu.pipeline_mode<synchronous>, transform_indices = @transform_6, window_bounds = array<i64: 1, 32>}, {transform_indices = @transform_7, window_bounds = array<i64: 1, 8, 32>}]} {
    %c0_i32 = arith.constant 0 : i32
    %0 = arith.cmpi eq, %arg1, %c0_i32 : i32
    %1 = arith.extui %0 : i1 to i32
    %c0_i32_0 = arith.constant 0 : i32
    %2 = arith.cmpi ne, %1, %c0_i32_0 : i32
    scf.if %2 {
      %c0_24 = arith.constant 0 : index
      %c0_25 = arith.constant 0 : index
      %c0_26 = arith.constant 0 : index
      %37 = vector.load %arg2[%c0_24, %c0_25, %c0_26] : memref<1x8x32xf32, #tpu.memory_space<vmem>>, vector<1x8x32xf32>
      %38 = vector.shape_cast %37 : vector<1x8x32xf32> to vector<8x32xf32>
      %cst_27 = arith.constant dense<0.000000e+00> : vector<8xf32>
      %39 = vector.multi_reduction <add>, %38, %cst_27 [1] : vector<8x32xf32> to vector<8xf32>
      %40 = vector.shape_cast %39 : vector<8xf32> to vector<8x1xf32>
      %cst_28 = arith.constant 3.200000e+01 : f32
      %41 = vector.broadcast %cst_28 : f32 to vector<8x1xf32>
      %42 = arith.divf %40, %41 : vector<8x1xf32>
      %43 = vector.broadcast %42 : vector<8x1xf32> to vector<8x32xf32>
      %44 = arith.subf %38, %43 : vector<8x32xf32>
      %45 = arith.mulf %44, %44 : vector<8x32xf32>
      %cst_29 = arith.constant dense<0.000000e+00> : vector<8xf32>
      %46 = vector.multi_reduction <add>, %45, %cst_29 [1] : vector<8x32xf32> to vector<8xf32>
      %47 = vector.shape_cast %46 : vector<8xf32> to vector<8x1xf32>
      %cst_30 = arith.constant 3.200000e+01 : f32
      %48 = vector.broadcast %cst_30 : f32 to vector<8x1xf32>
      %49 = arith.divf %47, %48 : vector<8x1xf32>
      %50 = vector.broadcast %42 : vector<8x1xf32> to vector<8x32xf32>
      %51 = arith.subf %38, %50 : vector<8x32xf32>
      %cst_31 = arith.constant 9.99999974E-6 : f32
      %52 = vector.broadcast %cst_31 : f32 to vector<8x1xf32>
      %53 = arith.addf %49, %52 : vector<8x1xf32>
      %54 = math.rsqrt %53 : vector<8x1xf32>
      %55 = vector.broadcast %54 : vector<8x1xf32> to vector<8x32xf32>
      %56 = arith.mulf %51, %55 : vector<8x32xf32>
      %c0_32 = arith.constant 0 : index
      %c0_33 = arith.constant 0 : index
      %57 = vector.load %arg3[%c0_32, %c0_33] : memref<1x32xf32, #tpu.memory_space<vmem>>, vector<1x32xf32>
      %58 = vector.broadcast %57 : vector<1x32xf32> to vector<8x32xf32>
      %59 = arith.mulf %56, %58 : vector<8x32xf32>
      %c0_34 = arith.constant 0 : index
      %c0_35 = arith.constant 0 : index
      %60 = vector.load %arg4[%c0_34, %c0_35] : memref<1x32xf32, #tpu.memory_space<vmem>>, vector<1x32xf32>
      %61 = vector.broadcast %60 : vector<1x32xf32> to vector<8x32xf32>
      %62 = arith.addf %59, %61 : vector<8x32xf32>
      %63 = arith.truncf %62 : vector<8x32xf32> to vector<8x32xbf16>
      %c0_36 = arith.constant 0 : index
      %c0_37 = arith.constant 0 : index
      %64 = vector.load %arg5[%c0_36, %c0_37] : memref<32x96xbf16, #tpu.memory_space<vmem>>, vector<32x96xbf16>
      %cst_38 = arith.constant dense<0.000000e+00> : vector<8x96xf32>
      %65 = tpu.matmul %63, %64, %cst_38 {dimension_numbers = #tpu.dot_dimension_numbers<[1], [0], [0], [1], [0, 0, 1, 1], [], []>} : vector<8x32xbf16>, vector<32x96xbf16>, vector<8x96xf32> -> vector<8x96xf32>
      %c0_39 = arith.constant 0 : index
      %c0_40 = arith.constant 0 : index
      %66 = vector.load %arg6[%c0_39, %c0_40] : memref<1x96xf32, #tpu.memory_space<vmem>>, vector<1x96xf32>
      %67 = vector.broadcast %66 : vector<1x96xf32> to vector<8x96xf32>
      %68 = arith.addf %65, %67 : vector<8x96xf32>
      %69 = vector.extract_strided_slice %68 {offsets = [0, 32], sizes = [8, 4], strides = [1, 1]} : vector<8x96xf32> to vector<8x4xf32>
      %70 = arith.truncf %69 : vector<8x4xf32> to vector<8x4xbf16>
      %c0_41 = arith.constant 0 : index
      %c0_42 = arith.constant 0 : index
      %c0_43 = arith.constant 0 : index
      %71 = vector.load %arg11[%c0_41, %c0_42, %c0_43] : memref<8x8x4xbf16, #tpu.memory_space<vmem>>, vector<1x8x4xbf16>
      %72 = vector.shape_cast %71 : vector<1x8x4xbf16> to vector<8x4xbf16>
      %73 = vector.shape_cast %70 : vector<8x4xbf16> to vector<1x8x4xbf16>
      tpu.vector_store %arg11[%c0_41, %c0_42, %c0_43], %73 {strides = array<i32>} : memref<8x8x4xbf16, #tpu.memory_space<vmem>>, vector<1x8x4xbf16>,
      %74 = vector.extract_strided_slice %68 {offsets = [0, 64], sizes = [8, 4], strides = [1, 1]} : vector<8x96xf32> to vector<8x4xf32>
      %75 = arith.truncf %74 : vector<8x4xf32> to vector<8x4xbf16>
      %c0_44 = arith.constant 0 : index
      %c0_45 = arith.constant 0 : index
      %c0_46 = arith.constant 0 : index
      %76 = vector.load %arg12[%c0_44, %c0_45, %c0_46] : memref<8x8x4xbf16, #tpu.memory_space<vmem>>, vector<1x8x4xbf16>
      %77 = vector.shape_cast %76 : vector<1x8x4xbf16> to vector<8x4xbf16>
      %78 = vector.shape_cast %75 : vector<8x4xbf16> to vector<1x8x4xbf16>
      tpu.vector_store %arg12[%c0_44, %c0_45, %c0_46], %78 {strides = array<i32>} : memref<8x8x4xbf16, #tpu.memory_space<vmem>>, vector<1x8x4xbf16>,
      %79 = vector.extract_strided_slice %68 {offsets = [0, 0], sizes = [8, 4], strides = [1, 1]} : vector<8x96xf32> to vector<8x4xf32>
      %cst_47 = arith.constant 5.000000e-01 : f32
      %80 = vector.broadcast %cst_47 : f32 to vector<8x4xf32>
      %81 = arith.mulf %79, %80 : vector<8x4xf32>
      %82 = arith.truncf %81 : vector<8x4xf32> to vector<8x4xbf16>
      %c0_48 = arith.constant 0 : index
      %c0_49 = arith.constant 0 : index
      %c0_50 = arith.constant 0 : index
      %c0_51 = arith.constant 0 : index
      %83 = vector.load %arg10[%c0_48, %c0_49, %c0_50, %c0_51] : memref<1x8x8x4xbf16, #tpu.memory_space<vmem>>, vector<1x1x8x4xbf16>
      %84 = vector.shape_cast %83 : vector<1x1x8x4xbf16> to vector<8x4xbf16>
      %85 = vector.shape_cast %82 : vector<8x4xbf16> to vector<1x1x8x4xbf16>
      tpu.vector_store %arg10[%c0_48, %c0_49, %c0_50, %c0_51], %85 {strides = array<i32>} : memref<1x8x8x4xbf16, #tpu.memory_space<vmem>>, vector<1x1x8x4xbf16>,
      %86 = vector.extract_strided_slice %68 {offsets = [0, 36], sizes = [8, 4], strides = [1, 1]} : vector<8x96xf32> to vector<8x4xf32>
      %87 = arith.truncf %86 : vector<8x4xf32> to vector<8x4xbf16>
      %c1 = arith.constant 1 : index
      %c0_52 = arith.constant 0 : index
      %c0_53 = arith.constant 0 : index
      %88 = vector.load %arg11[%c1, %c0_52, %c0_53] : memref<8x8x4xbf16, #tpu.memory_space<vmem>>, vector<1x8x4xbf16>
      %89 = vector.shape_cast %88 : vector<1x8x4xbf16> to vector<8x4xbf16>
      %90 = vector.shape_cast %87 : vector<8x4xbf16> to vector<1x8x4xbf16>
      tpu.vector_store %arg11[%c1, %c0_52, %c0_53], %90 {strides = array<i32>} : memref<8x8x4xbf16, #tpu.memory_space<vmem>>, vector<1x8x4xbf16>,
      %91 = vector.extract_strided_slice %68 {offsets = [0, 68], sizes = [8, 4], strides = [1, 1]} : vector<8x96xf32> to vector<8x4xf32>
      %92 = arith.truncf %91 : vector<8x4xf32> to vector<8x4xbf16>
      %c1_54 = arith.constant 1 : index
      %c0_55 = arith.constant 0 : index
      %c0_56 = arith.constant 0 : index
      %93 = vector.load %arg12[%c1_54, %c0_55, %c0_56] : memref<8x8x4xbf16, #tpu.memory_space<vmem>>, vector<1x8x4xbf16>
      %94 = vector.shape_cast %93 : vector<1x8x4xbf16> to vector<8x4xbf16>
      %95 = vector.shape_cast %92 : vector<8x4xbf16> to vector<1x8x4xbf16>
      tpu.vector_store %arg12[%c1_54, %c0_55, %c0_56], %95 {strides = array<i32>} : memref<8x8x4xbf16, #tpu.memory_space<vmem>>, vector<1x8x4xbf16>,
      %96 = vector.extract_strided_slice %68 {offsets = [0, 4], sizes = [8, 4], strides = [1, 1]} : vector<8x96xf32> to vector<8x4xf32>
      %cst_57 = arith.constant 5.000000e-01 : f32
      %97 = vector.broadcast %cst_57 : f32 to vector<8x4xf32>
      %98 = arith.mulf %96, %97 : vector<8x4xf32>
      %99 = arith.truncf %98 : vector<8x4xf32> to vector<8x4xbf16>
      %c0_58 = arith.constant 0 : index
      %c1_59 = arith.constant 1 : index
      %c0_60 = arith.constant 0 : index
      %c0_61 = arith.constant 0 : index
      %100 = vector.load %arg10[%c0_58, %c1_59, %c0_60, %c0_61] : memref<1x8x8x4xbf16, #tpu.memory_space<vmem>>, vector<1x1x8x4xbf16>
      %101 = vector.shape_cast %100 : vector<1x1x8x4xbf16> to vector<8x4xbf16>
      %102 = vector.shape_cast %99 : vector<8x4xbf16> to vector<1x1x8x4xbf16>
      tpu.vector_store %arg10[%c0_58, %c1_59, %c0_60, %c0_61], %102 {strides = array<i32>} : memref<1x8x8x4xbf16, #tpu.memory_space<vmem>>, vector<1x1x8x4xbf16>,
      %103 = vector.extract_strided_slice %68 {offsets = [0, 40], sizes = [8, 4], strides = [1, 1]} : vector<8x96xf32> to vector<8x4xf32>
      %104 = arith.truncf %103 : vector<8x4xf32> to vector<8x4xbf16>
      %c2 = arith.constant 2 : index
      %c0_62 = arith.constant 0 : index
      %c0_63 = arith.constant 0 : index
      %105 = vector.load %arg11[%c2, %c0_62, %c0_63] : memref<8x8x4xbf16, #tpu.memory_space<vmem>>, vector<1x8x4xbf16>
      %106 = vector.shape_cast %105 : vector<1x8x4xbf16> to vector<8x4xbf16>
      %107 = vector.shape_cast %104 : vector<8x4xbf16> to vector<1x8x4xbf16>
      tpu.vector_store %arg11[%c2, %c0_62, %c0_63], %107 {strides = array<i32>} : memref<8x8x4xbf16, #tpu.memory_space<vmem>>, vector<1x8x4xbf16>,
      %108 = vector.extract_strided_slice %68 {offsets = [0, 72], sizes = [8, 4], strides = [1, 1]} : vector<8x96xf32> to vector<8x4xf32>
      %109 = arith.truncf %108 : vector<8x4xf32> to vector<8x4xbf16>
      %c2_64 = arith.constant 2 : index
      %c0_65 = arith.constant 0 : index
      %c0_66 = arith.constant 0 : index
      %110 = vector.load %arg12[%c2_64, %c0_65, %c0_66] : memref<8x8x4xbf16, #tpu.memory_space<vmem>>, vector<1x8x4xbf16>
      %111 = vector.shape_cast %110 : vector<1x8x4xbf16> to vector<8x4xbf16>
      %112 = vector.shape_cast %109 : vector<8x4xbf16> to vector<1x8x4xbf16>
      tpu.vector_store %arg12[%c2_64, %c0_65, %c0_66], %112 {strides = array<i32>} : memref<8x8x4xbf16, #tpu.memory_space<vmem>>, vector<1x8x4xbf16>,
      %113 = vector.extract_strided_slice %68 {offsets = [0, 8], sizes = [8, 4], strides = [1, 1]} : vector<8x96xf32> to vector<8x4xf32>
      %cst_67 = arith.constant 5.000000e-01 : f32
      %114 = vector.broadcast %cst_67 : f32 to vector<8x4xf32>
      %115 = arith.mulf %113, %114 : vector<8x4xf32>
      %116 = arith.truncf %115 : vector<8x4xf32> to vector<8x4xbf16>
      %c0_68 = arith.constant 0 : index
      %c2_69 = arith.constant 2 : index
      %c0_70 = arith.constant 0 : index
      %c0_71 = arith.constant 0 : index
      %117 = vector.load %arg10[%c0_68, %c2_69, %c0_70, %c0_71] : memref<1x8x8x4xbf16, #tpu.memory_space<vmem>>, vector<1x1x8x4xbf16>
      %118 = vector.shape_cast %117 : vector<1x1x8x4xbf16> to vector<8x4xbf16>
      %119 = vector.shape_cast %116 : vector<8x4xbf16> to vector<1x1x8x4xbf16>
      tpu.vector_store %arg10[%c0_68, %c2_69, %c0_70, %c0_71], %119 {strides = array<i32>} : memref<1x8x8x4xbf16, #tpu.memory_space<vmem>>, vector<1x1x8x4xbf16>,
      %120 = vector.extract_strided_slice %68 {offsets = [0, 44], sizes = [8, 4], strides = [1, 1]} : vector<8x96xf32> to vector<8x4xf32>
      %121 = arith.truncf %120 : vector<8x4xf32> to vector<8x4xbf16>
      %c3 = arith.constant 3 : index
      %c0_72 = arith.constant 0 : index
      %c0_73 = arith.constant 0 : index
      %122 = vector.load %arg11[%c3, %c0_72, %c0_73] : memref<8x8x4xbf16, #tpu.memory_space<vmem>>, vector<1x8x4xbf16>
      %123 = vector.shape_cast %122 : vector<1x8x4xbf16> to vector<8x4xbf16>
      %124 = vector.shape_cast %121 : vector<8x4xbf16> to vector<1x8x4xbf16>
      tpu.vector_store %arg11[%c3, %c0_72, %c0_73], %124 {strides = array<i32>} : memref<8x8x4xbf16, #tpu.memory_space<vmem>>, vector<1x8x4xbf16>,
      %125 = vector.extract_strided_slice %68 {offsets = [0, 76], sizes = [8, 4], strides = [1, 1]} : vector<8x96xf32> to vector<8x4xf32>
      %126 = arith.truncf %125 : vector<8x4xf32> to vector<8x4xbf16>
      %c3_74 = arith.constant 3 : index
      %c0_75 = arith.constant 0 : index
      %c0_76 = arith.constant 0 : index
      %127 = vector.load %arg12[%c3_74, %c0_75, %c0_76] : memref<8x8x4xbf16, #tpu.memory_space<vmem>>, vector<1x8x4xbf16>
      %128 = vector.shape_cast %127 : vector<1x8x4xbf16> to vector<8x4xbf16>
      %129 = vector.shape_cast %126 : vector<8x4xbf16> to vector<1x8x4xbf16>
      tpu.vector_store %arg12[%c3_74, %c0_75, %c0_76], %129 {strides = array<i32>} : memref<8x8x4xbf16, #tpu.memory_space<vmem>>, vector<1x8x4xbf16>,
      %130 = vector.extract_strided_slice %68 {offsets = [0, 12], sizes = [8, 4], strides = [1, 1]} : vector<8x96xf32> to vector<8x4xf32>
      %cst_77 = arith.constant 5.000000e-01 : f32
      %131 = vector.broadcast %cst_77 : f32 to vector<8x4xf32>
      %132 = arith.mulf %130, %131 : vector<8x4xf32>
      %133 = arith.truncf %132 : vector<8x4xf32> to vector<8x4xbf16>
      %c0_78 = arith.constant 0 : index
      %c3_79 = arith.constant 3 : index
      %c0_80 = arith.constant 0 : index
      %c0_81 = arith.constant 0 : index
      %134 = vector.load %arg10[%c0_78, %c3_79, %c0_80, %c0_81] : memref<1x8x8x4xbf16, #tpu.memory_space<vmem>>, vector<1x1x8x4xbf16>
      %135 = vector.shape_cast %134 : vector<1x1x8x4xbf16> to vector<8x4xbf16>
      %136 = vector.shape_cast %133 : vector<8x4xbf16> to vector<1x1x8x4xbf16>
      tpu.vector_store %arg10[%c0_78, %c3_79, %c0_80, %c0_81], %136 {strides = array<i32>} : memref<1x8x8x4xbf16, #tpu.memory_space<vmem>>, vector<1x1x8x4xbf16>,
      %137 = vector.extract_strided_slice %68 {offsets = [0, 48], sizes = [8, 4], strides = [1, 1]} : vector<8x96xf32> to vector<8x4xf32>
      %138 = arith.truncf %137 : vector<8x4xf32> to vector<8x4xbf16>
      %c4 = arith.constant 4 : index
      %c0_82 = arith.constant 0 : index
      %c0_83 = arith.constant 0 : index
      %139 = vector.load %arg11[%c4, %c0_82, %c0_83] : memref<8x8x4xbf16, #tpu.memory_space<vmem>>, vector<1x8x4xbf16>
      %140 = vector.shape_cast %139 : vector<1x8x4xbf16> to vector<8x4xbf16>
      %141 = vector.shape_cast %138 : vector<8x4xbf16> to vector<1x8x4xbf16>
      tpu.vector_store %arg11[%c4, %c0_82, %c0_83], %141 {strides = array<i32>} : memref<8x8x4xbf16, #tpu.memory_space<vmem>>, vector<1x8x4xbf16>,
      %142 = vector.extract_strided_slice %68 {offsets = [0, 80], sizes = [8, 4], strides = [1, 1]} : vector<8x96xf32> to vector<8x4xf32>
      %143 = arith.truncf %142 : vector<8x4xf32> to vector<8x4xbf16>
      %c4_84 = arith.constant 4 : index
      %c0_85 = arith.constant 0 : index
      %c0_86 = arith.constant 0 : index
      %144 = vector.load %arg12[%c4_84, %c0_85, %c0_86] : memref<8x8x4xbf16, #tpu.memory_space<vmem>>, vector<1x8x4xbf16>
      %145 = vector.shape_cast %144 : vector<1x8x4xbf16> to vector<8x4xbf16>
      %146 = vector.shape_cast %143 : vector<8x4xbf16> to vector<1x8x4xbf16>
      tpu.vector_store %arg12[%c4_84, %c0_85, %c0_86], %146 {strides = array<i32>} : memref<8x8x4xbf16, #tpu.memory_space<vmem>>, vector<1x8x4xbf16>,
      %147 = vector.extract_strided_slice %68 {offsets = [0, 16], sizes = [8, 4], strides = [1, 1]} : vector<8x96xf32> to vector<8x4xf32>
      %cst_87 = arith.constant 5.000000e-01 : f32
      %148 = vector.broadcast %cst_87 : f32 to vector<8x4xf32>
      %149 = arith.mulf %147, %148 : vector<8x4xf32>
      %150 = arith.truncf %149 : vector<8x4xf32> to vector<8x4xbf16>
      %c0_88 = arith.constant 0 : index
      %c4_89 = arith.constant 4 : index
      %c0_90 = arith.constant 0 : index
      %c0_91 = arith.constant 0 : index
      %151 = vector.load %arg10[%c0_88, %c4_89, %c0_90, %c0_91] : memref<1x8x8x4xbf16, #tpu.memory_space<vmem>>, vector<1x1x8x4xbf16>
      %152 = vector.shape_cast %151 : vector<1x1x8x4xbf16> to vector<8x4xbf16>
      %153 = vector.shape_cast %150 : vector<8x4xbf16> to vector<1x1x8x4xbf16>
      tpu.vector_store %arg10[%c0_88, %c4_89, %c0_90, %c0_91], %153 {strides = array<i32>} : memref<1x8x8x4xbf16, #tpu.memory_space<vmem>>, vector<1x1x8x4xbf16>,
      %154 = vector.extract_strided_slice %68 {offsets = [0, 52], sizes = [8, 4], strides = [1, 1]} : vector<8x96xf32> to vector<8x4xf32>
      %155 = arith.truncf %154 : vector<8x4xf32> to vector<8x4xbf16>
      %c5 = arith.constant 5 : index
      %c0_92 = arith.constant 0 : index
      %c0_93 = arith.constant 0 : index
      %156 = vector.load %arg11[%c5, %c0_92, %c0_93] : memref<8x8x4xbf16, #tpu.memory_space<vmem>>, vector<1x8x4xbf16>
      %157 = vector.shape_cast %156 : vector<1x8x4xbf16> to vector<8x4xbf16>
      %158 = vector.shape_cast %155 : vector<8x4xbf16> to vector<1x8x4xbf16>
      tpu.vector_store %arg11[%c5, %c0_92, %c0_93], %158 {strides = array<i32>} : memref<8x8x4xbf16, #tpu.memory_space<vmem>>, vector<1x8x4xbf16>,
      %159 = vector.extract_strided_slice %68 {offsets = [0, 84], sizes = [8, 4], strides = [1, 1]} : vector<8x96xf32> to vector<8x4xf32>
      %160 = arith.truncf %159 : vector<8x4xf32> to vector<8x4xbf16>
      %c5_94 = arith.constant 5 : index
      %c0_95 = arith.constant 0 : index
      %c0_96 = arith.constant 0 : index
      %161 = vector.load %arg12[%c5_94, %c0_95, %c0_96] : memref<8x8x4xbf16, #tpu.memory_space<vmem>>, vector<1x8x4xbf16>
      %162 = vector.shape_cast %161 : vector<1x8x4xbf16> to vector<8x4xbf16>
      %163 = vector.shape_cast %160 : vector<8x4xbf16> to vector<1x8x4xbf16>
      tpu.vector_store %arg12[%c5_94, %c0_95, %c0_96], %163 {strides = array<i32>} : memref<8x8x4xbf16, #tpu.memory_space<vmem>>, vector<1x8x4xbf16>,
      %164 = vector.extract_strided_slice %68 {offsets = [0, 20], sizes = [8, 4], strides = [1, 1]} : vector<8x96xf32> to vector<8x4xf32>
      %cst_97 = arith.constant 5.000000e-01 : f32
      %165 = vector.broadcast %cst_97 : f32 to vector<8x4xf32>
      %166 = arith.mulf %164, %165 : vector<8x4xf32>
      %167 = arith.truncf %166 : vector<8x4xf32> to vector<8x4xbf16>
      %c0_98 = arith.constant 0 : index
      %c5_99 = arith.constant 5 : index
      %c0_100 = arith.constant 0 : index
      %c0_101 = arith.constant 0 : index
      %168 = vector.load %arg10[%c0_98, %c5_99, %c0_100, %c0_101] : memref<1x8x8x4xbf16, #tpu.memory_space<vmem>>, vector<1x1x8x4xbf16>
      %169 = vector.shape_cast %168 : vector<1x1x8x4xbf16> to vector<8x4xbf16>
      %170 = vector.shape_cast %167 : vector<8x4xbf16> to vector<1x1x8x4xbf16>
      tpu.vector_store %arg10[%c0_98, %c5_99, %c0_100, %c0_101], %170 {strides = array<i32>} : memref<1x8x8x4xbf16, #tpu.memory_space<vmem>>, vector<1x1x8x4xbf16>,
      %171 = vector.extract_strided_slice %68 {offsets = [0, 56], sizes = [8, 4], strides = [1, 1]} : vector<8x96xf32> to vector<8x4xf32>
      %172 = arith.truncf %171 : vector<8x4xf32> to vector<8x4xbf16>
      %c6 = arith.constant 6 : index
      %c0_102 = arith.constant 0 : index
      %c0_103 = arith.constant 0 : index
      %173 = vector.load %arg11[%c6, %c0_102, %c0_103] : memref<8x8x4xbf16, #tpu.memory_space<vmem>>, vector<1x8x4xbf16>
      %174 = vector.shape_cast %173 : vector<1x8x4xbf16> to vector<8x4xbf16>
      %175 = vector.shape_cast %172 : vector<8x4xbf16> to vector<1x8x4xbf16>
      tpu.vector_store %arg11[%c6, %c0_102, %c0_103], %175 {strides = array<i32>} : memref<8x8x4xbf16, #tpu.memory_space<vmem>>, vector<1x8x4xbf16>,
      %176 = vector.extract_strided_slice %68 {offsets = [0, 88], sizes = [8, 4], strides = [1, 1]} : vector<8x96xf32> to vector<8x4xf32>
      %177 = arith.truncf %176 : vector<8x4xf32> to vector<8x4xbf16>
      %c6_104 = arith.constant 6 : index
      %c0_105 = arith.constant 0 : index
      %c0_106 = arith.constant 0 : index
      %178 = vector.load %arg12[%c6_104, %c0_105, %c0_106] : memref<8x8x4xbf16, #tpu.memory_space<vmem>>, vector<1x8x4xbf16>
      %179 = vector.shape_cast %178 : vector<1x8x4xbf16> to vector<8x4xbf16>
      %180 = vector.shape_cast %177 : vector<8x4xbf16> to vector<1x8x4xbf16>
      tpu.vector_store %arg12[%c6_104, %c0_105, %c0_106], %180 {strides = array<i32>} : memref<8x8x4xbf16, #tpu.memory_space<vmem>>, vector<1x8x4xbf16>,
      %181 = vector.extract_strided_slice %68 {offsets = [0, 24], sizes = [8, 4], strides = [1, 1]} : vector<8x96xf32> to vector<8x4xf32>
      %cst_107 = arith.constant 5.000000e-01 : f32
      %182 = vector.broadcast %cst_107 : f32 to vector<8x4xf32>
      %183 = arith.mulf %181, %182 : vector<8x4xf32>
      %184 = arith.truncf %183 : vector<8x4xf32> to vector<8x4xbf16>
      %c0_108 = arith.constant 0 : index
      %c6_109 = arith.constant 6 : index
      %c0_110 = arith.constant 0 : index
      %c0_111 = arith.constant 0 : index
      %185 = vector.load %arg10[%c0_108, %c6_109, %c0_110, %c0_111] : memref<1x8x8x4xbf16, #tpu.memory_space<vmem>>, vector<1x1x8x4xbf16>
      %186 = vector.shape_cast %185 : vector<1x1x8x4xbf16> to vector<8x4xbf16>
      %187 = vector.shape_cast %184 : vector<8x4xbf16> to vector<1x1x8x4xbf16>
      tpu.vector_store %arg10[%c0_108, %c6_109, %c0_110, %c0_111], %187 {strides = array<i32>} : memref<1x8x8x4xbf16, #tpu.memory_space<vmem>>, vector<1x1x8x4xbf16>,
      %188 = vector.extract_strided_slice %68 {offsets = [0, 60], sizes = [8, 4], strides = [1, 1]} : vector<8x96xf32> to vector<8x4xf32>
      %189 = arith.truncf %188 : vector<8x4xf32> to vector<8x4xbf16>
      %c7 = arith.constant 7 : index
      %c0_112 = arith.constant 0 : index
      %c0_113 = arith.constant 0 : index
      %190 = vector.load %arg11[%c7, %c0_112, %c0_113] : memref<8x8x4xbf16, #tpu.memory_space<vmem>>, vector<1x8x4xbf16>
      %191 = vector.shape_cast %190 : vector<1x8x4xbf16> to vector<8x4xbf16>
      %192 = vector.shape_cast %189 : vector<8x4xbf16> to vector<1x8x4xbf16>
      tpu.vector_store %arg11[%c7, %c0_112, %c0_113], %192 {strides = array<i32>} : memref<8x8x4xbf16, #tpu.memory_space<vmem>>, vector<1x8x4xbf16>,
      %193 = vector.extract_strided_slice %68 {offsets = [0, 92], sizes = [8, 4], strides = [1, 1]} : vector<8x96xf32> to vector<8x4xf32>
      %194 = arith.truncf %193 : vector<8x4xf32> to vector<8x4xbf16>
      %c7_114 = arith.constant 7 : index
      %c0_115 = arith.constant 0 : index
      %c0_116 = arith.constant 0 : index
      %195 = vector.load %arg12[%c7_114, %c0_115, %c0_116] : memref<8x8x4xbf16, #tpu.memory_space<vmem>>, vector<1x8x4xbf16>
      %196 = vector.shape_cast %195 : vector<1x8x4xbf16> to vector<8x4xbf16>
      %197 = vector.shape_cast %194 : vector<8x4xbf16> to vector<1x8x4xbf16>
      tpu.vector_store %arg12[%c7_114, %c0_115, %c0_116], %197 {strides = array<i32>} : memref<8x8x4xbf16, #tpu.memory_space<vmem>>, vector<1x8x4xbf16>,
      %198 = vector.extract_strided_slice %68 {offsets = [0, 28], sizes = [8, 4], strides = [1, 1]} : vector<8x96xf32> to vector<8x4xf32>
      %cst_117 = arith.constant 5.000000e-01 : f32
      %199 = vector.broadcast %cst_117 : f32 to vector<8x4xf32>
      %200 = arith.mulf %198, %199 : vector<8x4xf32>
      %201 = arith.truncf %200 : vector<8x4xf32> to vector<8x4xbf16>
      %c0_118 = arith.constant 0 : index
      %c7_119 = arith.constant 7 : index
      %c0_120 = arith.constant 0 : index
      %c0_121 = arith.constant 0 : index
      %202 = vector.load %arg10[%c0_118, %c7_119, %c0_120, %c0_121] : memref<1x8x8x4xbf16, #tpu.memory_space<vmem>>, vector<1x1x8x4xbf16>
      %203 = vector.shape_cast %202 : vector<1x1x8x4xbf16> to vector<8x4xbf16>
      %204 = vector.shape_cast %201 : vector<8x4xbf16> to vector<1x1x8x4xbf16>
      tpu.vector_store %arg10[%c0_118, %c7_119, %c0_120, %c0_121], %204 {strides = array<i32>} : memref<1x8x8x4xbf16, #tpu.memory_space<vmem>>, vector<1x1x8x4xbf16>,
    } else {
    }
    %3 = arith.index_cast %arg1 : i32 to index
    %c0 = arith.constant 0 : index
    %c0_1 = arith.constant 0 : index
    %c0_2 = arith.constant 0 : index
    %4 = vector.load %arg10[%3, %c0, %c0_1, %c0_2] : memref<1x8x8x4xbf16, #tpu.memory_space<vmem>>, vector<1x8x8x4xbf16>
    %5 = vector.shape_cast %4 : vector<1x8x8x4xbf16> to vector<8x8x4xbf16>
    %c0_3 = arith.constant 0 : index
    %c0_4 = arith.constant 0 : index
    %c0_5 = arith.constant 0 : index
    %6 = vector.load %arg11[%c0_3, %c0_4, %c0_5] : memref<8x8x4xbf16, #tpu.memory_space<vmem>>, vector<8x8x4xbf16>
    %c0_6 = arith.constant 0 : index
    %c0_7 = arith.constant 0 : index
    %c0_8 = arith.constant 0 : index
    %7 = vector.load %arg12[%c0_6, %c0_7, %c0_8] : memref<8x8x4xbf16, #tpu.memory_space<vmem>>, vector<8x8x4xbf16>
    "tpu.trace_start"() <{level = 10 : i32, message = "hqd,hkd->hqk"}> : () -> ()
    %cst = arith.constant dense<0.000000e+00> : vector<8x8x8xf32>
    %8 = tpu.matmul %5, %6, %cst {dimension_numbers = #tpu.dot_dimension_numbers<[2], [2], [1], [1], [0, 0, 0, 1, 1, 1], [0], [0]>} : vector<8x8x4xbf16>, vector<8x8x4xbf16>, vector<8x8x8xf32> -> vector<8x8x8xf32>
    "tpu.trace_stop"() : () -> ()
    %cst_9 = arith.constant dense<0xFF800000> : vector<8x8xf32>
    %9 = vector.multi_reduction <maximumf>, %8, %cst_9 [2] : vector<8x8x8xf32> to vector<8x8xf32>
    %10 = vector.shape_cast %9 : vector<8x8xf32> to vector<8x8x1xf32>
    %11 = vector.broadcast %10 : vector<8x8x1xf32> to vector<8x8x8xf32>
    %12 = arith.subf %8, %11 : vector<8x8x8xf32>
    %13 = math.exp %12 : vector<8x8x8xf32>
    %cst_10 = arith.constant dense<0.000000e+00> : vector<8x8xf32>
    %14 = vector.multi_reduction <add>, %13, %cst_10 [2] : vector<8x8x8xf32> to vector<8x8xf32>
    %15 = vector.shape_cast %14 : vector<8x8xf32> to vector<8x8x1xf32>
    %16 = tpu.reciprocal %15 {approx = true} : vector<8x8x1xf32> -> vector<8x8x1xf32>
    %17 = vector.broadcast %16 : vector<8x8x1xf32> to vector<8x8x8xf32>
    %18 = arith.mulf %13, %17 : vector<8x8x8xf32>
    %19 = arith.truncf %18 : vector<8x8x8xf32> to vector<8x8x8xbf16>
    "tpu.trace_start"() <{level = 10 : i32, message = "hqk,hkd->hqd"}> : () -> ()
    %cst_11 = arith.constant dense<0.000000e+00> : vector<8x8x4xf32>
    %20 = tpu.matmul %19, %7, %cst_11 {dimension_numbers = #tpu.dot_dimension_numbers<[2], [1], [1], [2], [0, 0, 0, 1, 1, 2], [0], [0]>} : vector<8x8x8xbf16>, vector<8x8x4xbf16>, vector<8x8x4xf32> -> vector<8x8x4xf32>
    "tpu.trace_stop"() : () -> ()
    %21 = arith.truncf %20 : vector<8x8x4xf32> to vector<8x8x4xbf16>
    %c0_12 = arith.constant 0 : index
    %c0_13 = arith.constant 0 : index
    %c0_14 = arith.constant 0 : index
    %22 = vector.load %arg7[%c0_12, %c0_13, %c0_14] : memref<8x4x32xbf16, #tpu.memory_space<vmem>>, vector<8x4x32xbf16>
    "tpu.trace_start"() <{level = 10 : i32, message = "hqd,hde->hqe"}> : () -> ()
    %cst_15 = arith.constant dense<0.000000e+00> : vector<8x8x32xf32>
    %23 = tpu.matmul %21, %22, %cst_15 {dimension_numbers = #tpu.dot_dimension_numbers<[2], [1], [1], [2], [0, 0, 0, 1, 1, 2], [0], [0]>} : vector<8x8x4xbf16>, vector<8x4x32xbf16>, vector<8x8x32xf32> -> vector<8x8x32xf32>
    "tpu.trace_stop"() : () -> ()
    %cst_16 = arith.constant dense<0.000000e+00> : vector<8x32xf32>
    %24 = vector.multi_reduction <add>, %23, %cst_16 [0] : vector<8x8x32xf32> to vector<8x32xf32>
    %c0_17 = arith.constant 0 : index
    %c0_18 = arith.constant 0 : index
    %25 = vector.load %arg8[%c0_17, %c0_18] : memref<1x32xf32, #tpu.memory_space<vmem>>, vector<1x32xf32>
    %26 = vector.broadcast %25 : vector<1x32xf32> to vector<8x32xf32>
    %27 = arith.addf %24, %26 : vector<8x32xf32>
    %c8_i32 = arith.constant 8 : i32
    %28 = arith.muli %arg1, %c8_i32 : i32
    %29 = tpu.assume_multiple %28, 8 : i32
    %c0_19 = arith.constant 0 : index
    %30 = arith.index_cast %29 : i32 to index
    %c0_20 = arith.constant 0 : index
    %31 = vector.load %arg2[%c0_19, %30, %c0_20] : memref<1x8x32xf32, #tpu.memory_space<vmem>>, vector<1x8x32xf32>
    %32 = vector.shape_cast %31 : vector<1x8x32xf32> to vector<8x32xf32>
    %33 = arith.addf %32, %27 : vector<8x32xf32>
    %c0_21 = arith.constant 0 : index
    %c0_22 = arith.constant 0 : index
    %c0_23 = arith.constant 0 : index
    %34 = vector.load %arg9[%c0_21, %c0_22, %c0_23] : memref<1x8x32xf32, #tpu.memory_space<vmem>>, vector<1x8x32xf32>
    %35 = vector.shape_cast %34 : vector<1x8x32xf32> to vector<8x32xf32>
    %36 = vector.shape_cast %33 : vector<8x32xf32> to vector<1x8x32xf32>
    tpu.vector_store %arg9[%c0_21, %c0_22, %c0_23], %36 {strides = array<i32>} : memref<1x8x32xf32, #tpu.memory_space<vmem>>, vector<1x8x32xf32>,
    return
  }
  func.func @transform_0(%arg0: i32, %arg1: i32) -> (i32, i32, i32) {
    %c0_i32 = arith.constant 0 : i32
    %c0_i32_0 = arith.constant 0 : i32
    %c0_i32_1 = arith.constant 0 : i32
    return %arg0, %c0_i32, %c0_i32_0 : i32, i32, i32
  }
  func.func @transform_1(%arg0: i32, %arg1: i32) -> (i32, i32) {
    %c0_i32 = arith.constant 0 : i32
    %c0_i32_0 = arith.constant 0 : i32
    %c0_i32_1 = arith.constant 0 : i32
    return %c0_i32, %c0_i32_0 : i32, i32
  }
  func.func @transform_2(%arg0: i32, %arg1: i32) -> (i32, i32) {
    %c0_i32 = arith.constant 0 : i32
    %c0_i32_0 = arith.constant 0 : i32
    %c0_i32_1 = arith.constant 0 : i32
    return %c0_i32, %c0_i32_0 : i32, i32
  }
  func.func @transform_3(%arg0: i32, %arg1: i32) -> (i32, i32) {
    %c0_i32 = arith.constant 0 : i32
    %c0_i32_0 = arith.constant 0 : i32
    %c0_i32_1 = arith.constant 0 : i32
    return %c0_i32, %c0_i32_0 : i32, i32
  }
  func.func @transform_4(%arg0: i32, %arg1: i32) -> (i32, i32) {
    %c0_i32 = arith.constant 0 : i32
    %c0_i32_0 = arith.constant 0 : i32
    %c0_i32_1 = arith.constant 0 : i32
    return %c0_i32, %c0_i32_0 : i32, i32
  }
  func.func @transform_5(%arg0: i32, %arg1: i32) -> (i32, i32, i32) {
    %c0_i32 = arith.constant 0 : i32
    %c0_i32_0 = arith.constant 0 : i32
    %c0_i32_1 = arith.constant 0 : i32
    %c0_i32_2 = arith.constant 0 : i32
    return %c0_i32, %c0_i32_0, %c0_i32_1 : i32, i32, i32
  }
  func.func @transform_6(%arg0: i32, %arg1: i32) -> (i32, i32) {
    %c0_i32 = arith.constant 0 : i32
    %c0_i32_0 = arith.constant 0 : i32
    %c0_i32_1 = arith.constant 0 : i32
    return %c0_i32, %c0_i32_0 : i32, i32
  }
  func.func @transform_7(%arg0: i32, %arg1: i32) -> (i32, i32, i32) {
    %c0_i32 = arith.constant 0 : i32
    %c0_i32_0 = arith.constant 0 : i32
    return %arg0, %arg1, %c0_i32 : i32, i32, i32
  }
}

module attributes {stable_mosaic.version = 11 : i64} {
  func.func @_mha_kernel(%arg0: i32, %arg1: i32, %arg2: memref<1x8x32xf32, #tpu.memory_space<vmem>>, %arg3: memref<1x32xf32, #tpu.memory_space<vmem>>, %arg4: memref<1x32xf32, #tpu.memory_space<vmem>>, %arg5: memref<32x96xbf16, #tpu.memory_space<vmem>>, %arg6: memref<1x96xf32, #tpu.memory_space<vmem>>, %arg7: memref<8x4x32xbf16, #tpu.memory_space<vmem>>, %arg8: memref<1x32xf32, #tpu.memory_space<vmem>>, %arg9: memref<1x8x32xf32, #tpu.memory_space<vmem>>, %arg10: memref<1x8x8x4xbf16, #tpu.memory_space<vmem>>, %arg11: memref<8x8x4xbf16, #tpu.memory_space<vmem>>, %arg12: memref<8x8x4xbf16, #tpu.memory_space<vmem>>) attributes {dimension_semantics = [#tpu.dimension_semantics<parallel>, #tpu.dimension_semantics<arbitrary>], iteration_bounds = array<i64: 2, 1>, scalar_prefetch = 0 : i64, scratch_operands = 3 : i64, tpu.core_type = #tpu.core_type<tc>, window_params = [{transform_indices = @transform_0, window_bounds = array<i64: 1, 8, 32>}, {pipeline_mode = #tpu.pipeline_mode<synchronous>, transform_indices = @transform_1, window_bounds = array<i64: 1, 32>}, {pipeline_mode = #tpu.pipeline_mode<synchronous>, transform_indices = @transform_2, window_bounds = array<i64: 1, 32>}, {pipeline_mode = #tpu.pipeline_mode<synchronous>, transform_indices = @transform_3, window_bounds = array<i64: 32, 96>}, {pipeline_mode = #tpu.pipeline_mode<synchronous>, transform_indices = @transform_4, window_bounds = array<i64: 1, 96>}, {pipeline_mode = #tpu.pipeline_mode<synchronous>, transform_indices = @transform_5, window_bounds = array<i64: 8, 4, 32>}, {pipeline_mode = #tpu.pipeline_mode<synchronous>, transform_indices = @transform_6, window_bounds = array<i64: 1, 32>}, {transform_indices = @transform_7, window_bounds = array<i64: 1, 8, 32>}]} {
    %c0_i32 = arith.constant 0 : i32
    %0 = arith.cmpi eq, %arg1, %c0_i32 : i32
    %1 = arith.extui %0 : i1 to i32
    %c0_i32_0 = arith.constant 0 : i32
    %2 = arith.cmpi ne, %1, %c0_i32_0 : i32
    scf.if %2 {
      %c0_24 = arith.constant 0 : index
      %c0_25 = arith.constant 0 : index
      %c0_26 = arith.constant 0 : index
      %37 = vector.load %arg2[%c0_24, %c0_25, %c0_26] : memref<1x8x32xf32, #tpu.memory_space<vmem>>, vector<1x8x32xf32>
      %38 = vector.shape_cast %37 : vector<1x8x32xf32> to vector<8x32xf32>
      %cst_27 = arith.constant dense<0.000000e+00> : vector<8xf32>
      %39 = vector.multi_reduction <add>, %38, %cst_27 [1] : vector<8x32xf32> to vector<8xf32>
      %40 = vector.shape_cast %39 : vector<8xf32> to vector<8x1xf32>
      %cst_28 = arith.constant 3.200000e+01 : f32
      %41 = vector.broadcast %cst_28 : f32 to vector<8x1xf32>
      %42 = arith.divf %40, %41 : vector<8x1xf32>
      %43 = vector.broadcast %42 : vector<8x1xf32> to vector<8x32xf32>
      %44 = arith.subf %38, %43 : vector<8x32xf32>
      %45 = arith.mulf %44, %44 : vector<8x32xf32>
      %cst_29 = arith.constant dense<0.000000e+00> : vector<8xf32>
      %46 = vector.multi_reduction <add>, %45, %cst_29 [1] : vector<8x32xf32> to vector<8xf32>
      %47 = vector.shape_cast %46 : vector<8xf32> to vector<8x1xf32>
      %cst_30 = arith.constant 3.200000e+01 : f32
      %48 = vector.broadcast %cst_30 : f32 to vector<8x1xf32>
      %49 = arith.divf %47, %48 : vector<8x1xf32>
      %50 = vector.broadcast %42 : vector<8x1xf32> to vector<8x32xf32>
      %51 = arith.subf %38, %50 : vector<8x32xf32>
      %cst_31 = arith.constant 9.99999974E-6 : f32
      %52 = vector.broadcast %cst_31 : f32 to vector<8x1xf32>
      %53 = arith.addf %49, %52 : vector<8x1xf32>
      %54 = math.rsqrt %53 : vector<8x1xf32>
      %55 = vector.broadcast %54 : vector<8x1xf32> to vector<8x32xf32>
      %56 = arith.mulf %51, %55 : vector<8x32xf32>
      %c0_32 = arith.constant 0 : index
      %c0_33 = arith.constant 0 : index
      %57 = vector.load %arg3[%c0_32, %c0_33] : memref<1x32xf32, #tpu.memory_space<vmem>>, vector<1x32xf32>
      %58 = vector.broadcast %57 : vector<1x32xf32> to vector<8x32xf32>
      %59 = arith.mulf %56, %58 : vector<8x32xf32>
      %c0_34 = arith.constant 0 : index
      %c0_35 = arith.constant 0 : index
      %60 = vector.load %arg4[%c0_34, %c0_35] : memref<1x32xf32, #tpu.memory_space<vmem>>, vector<1x32xf32>
      %61 = vector.broadcast %60 : vector<1x32xf32> to vector<8x32xf32>
      %62 = arith.addf %59, %61 : vector<8x32xf32>
      %63 = arith.truncf %62 : vector<8x32xf32> to vector<8x32xbf16>
      %c0_36 = arith.constant 0 : index
      %c0_37 = arith.constant 0 : index
      %64 = vector.load %arg5[%c0_36, %c0_37] : memref<32x96xbf16, #tpu.memory_space<vmem>>, vector<32x96xbf16>
      %cst_38 = arith.constant dense<0.000000e+00> : vector<8x96xf32>
      %65 = tpu.matmul %63, %64, %cst_38 {dimension_numbers = #tpu.dot_dimension_numbers<[1], [0], [0], [1], [0, 0, 1, 1], [], []>} : vector<8x32xbf16>, vector<32x96xbf16>, vector<8x96xf32> -> vector<8x96xf32>
      %c0_39 = arith.constant 0 : index
      %c0_40 = arith.constant 0 : index
      %66 = vector.load %arg6[%c0_39, %c0_40] : memref<1x96xf32, #tpu.memory_space<vmem>>, vector<1x96xf32>
      %67 = vector.broadcast %66 : vector<1x96xf32> to vector<8x96xf32>
      %68 = arith.addf %65, %67 : vector<8x96xf32>
      %69 = vector.extract_strided_slice %68 {offsets = [0, 32], sizes = [8, 4], strides = [1, 1]} : vector<8x96xf32> to vector<8x4xf32>
      %70 = arith.truncf %69 : vector<8x4xf32> to vector<8x4xbf16>
      %c0_41 = arith.constant 0 : index
      %c0_42 = arith.constant 0 : index
      %c0_43 = arith.constant 0 : index
      %71 = vector.load %arg11[%c0_41, %c0_42, %c0_43] : memref<8x8x4xbf16, #tpu.memory_space<vmem>>, vector<1x8x4xbf16>
      %72 = vector.shape_cast %71 : vector<1x8x4xbf16> to vector<8x4xbf16>
      %73 = vector.shape_cast %70 : vector<8x4xbf16> to vector<1x8x4xbf16>
      tpu.vector_store %arg11[%c0_41, %c0_42, %c0_43], %73 {strides = array<i32>} : memref<8x8x4xbf16, #tpu.memory_space<vmem>>, vector<1x8x4xbf16>,
      %74 = vector.extract_strided_slice %68 {offsets = [0, 64], sizes = [8, 4], strides = [1, 1]} : vector<8x96xf32> to vector<8x4xf32>
      %75 = arith.truncf %74 : vector<8x4xf32> to vector<8x4xbf16>
      %c0_44 = arith.constant 0 : index
      %c0_45 = arith.constant 0 : index
      %c0_46 = arith.constant 0 : index
      %76 = vector.load %arg12[%c0_44, %c0_45, %c0_46] : memref<8x8x4xbf16, #tpu.memory_space<vmem>>, vector<1x8x4xbf16>
      %77 = vector.shape_cast %76 : vector<1x8x4xbf16> to vector<8x4xbf16>
      %78 = vector.shape_cast %75 : vector<8x4xbf16> to vector<1x8x4xbf16>
      tpu.vector_store %arg12[%c0_44, %c0_45, %c0_46], %78 {strides = array<i32>} : memref<8x8x4xbf16, #tpu.memory_space<vmem>>, vector<1x8x4xbf16>,
      %79 = vector.extract_strided_slice %68 {offsets = [0, 0], sizes = [8, 4], strides = [1, 1]} : vector<8x96xf32> to vector<8x4xf32>
      %cst_47 = arith.constant 5.000000e-01 : f32
      %80 = vector.broadcast %cst_47 : f32 to vector<8x4xf32>
      %81 = arith.mulf %79, %80 : vector<8x4xf32>
      %82 = arith.truncf %81 : vector<8x4xf32> to vector<8x4xbf16>
      %c0_48 = arith.constant 0 : index
      %c0_49 = arith.constant 0 : index
      %c0_50 = arith.constant 0 : index
      %c0_51 = arith.constant 0 : index
      %83 = vector.load %arg10[%c0_48, %c0_49, %c0_50, %c0_51] : memref<1x8x8x4xbf16, #tpu.memory_space<vmem>>, vector<1x1x8x4xbf16>
      %84 = vector.shape_cast %83 : vector<1x1x8x4xbf16> to vector<8x4xbf16>
      %85 = vector.shape_cast %82 : vector<8x4xbf16> to vector<1x1x8x4xbf16>
      tpu.vector_store %arg10[%c0_48, %c0_49, %c0_50, %c0_51], %85 {strides = array<i32>} : memref<1x8x8x4xbf16, #tpu.memory_space<vmem>>, vector<1x1x8x4xbf16>,
      %86 = vector.extract_strided_slice %68 {offsets = [0, 36], sizes = [8, 4], strides = [1, 1]} : vector<8x96xf32> to vector<8x4xf32>
      %87 = arith.truncf %86 : vector<8x4xf32> to vector<8x4xbf16>
      %c1 = arith.constant 1 : index
      %c0_52 = arith.constant 0 : index
      %c0_53 = arith.constant 0 : index
      %88 = vector.load %arg11[%c1, %c0_52, %c0_53] : memref<8x8x4xbf16, #tpu.memory_space<vmem>>, vector<1x8x4xbf16>
      %89 = vector.shape_cast %88 : vector<1x8x4xbf16> to vector<8x4xbf16>
      %90 = vector.shape_cast %87 : vector<8x4xbf16> to vector<1x8x4xbf16>
      tpu.vector_store %arg11[%c1, %c0_52, %c0_53], %90 {strides = array<i32>} : memref<8x8x4xbf16, #tpu.memory_space<vmem>>, vector<1x8x4xbf16>,
      %91 = vector.extract_strided_slice %68 {offsets = [0, 68], sizes = [8, 4], strides = [1, 1]} : vector<8x96xf32> to vector<8x4xf32>
      %92 = arith.truncf %91 : vector<8x4xf32> to vector<8x4xbf16>
      %c1_54 = arith.constant 1 : index
      %c0_55 = arith.constant 0 : index
      %c0_56 = arith.constant 0 : index
      %93 = vector.load %arg12[%c1_54, %c0_55, %c0_56] : memref<8x8x4xbf16, #tpu.memory_space<vmem>>, vector<1x8x4xbf16>
      %94 = vector.shape_cast %93 : vector<1x8x4xbf16> to vector<8x4xbf16>
      %95 = vector.shape_cast %92 : vector<8x4xbf16> to vector<1x8x4xbf16>
      tpu.vector_store %arg12[%c1_54, %c0_55, %c0_56], %95 {strides = array<i32>} : memref<8x8x4xbf16, #tpu.memory_space<vmem>>, vector<1x8x4xbf16>,
      %96 = vector.extract_strided_slice %68 {offsets = [0, 4], sizes = [8, 4], strides = [1, 1]} : vector<8x96xf32> to vector<8x4xf32>
      %cst_57 = arith.constant 5.000000e-01 : f32
      %97 = vector.broadcast %cst_57 : f32 to vector<8x4xf32>
      %98 = arith.mulf %96, %97 : vector<8x4xf32>
      %99 = arith.truncf %98 : vector<8x4xf32> to vector<8x4xbf16>
      %c0_58 = arith.constant 0 : index
      %c1_59 = arith.constant 1 : index
      %c0_60 = arith.constant 0 : index
      %c0_61 = arith.constant 0 : index
      %100 = vector.load %arg10[%c0_58, %c1_59, %c0_60, %c0_61] : memref<1x8x8x4xbf16, #tpu.memory_space<vmem>>, vector<1x1x8x4xbf16>
      %101 = vector.shape_cast %100 : vector<1x1x8x4xbf16> to vector<8x4xbf16>
      %102 = vector.shape_cast %99 : vector<8x4xbf16> to vector<1x1x8x4xbf16>
      tpu.vector_store %arg10[%c0_58, %c1_59, %c0_60, %c0_61], %102 {strides = array<i32>} : memref<1x8x8x4xbf16, #tpu.memory_space<vmem>>, vector<1x1x8x4xbf16>,
      %103 = vector.extract_strided_slice %68 {offsets = [0, 40], sizes = [8, 4], strides = [1, 1]} : vector<8x96xf32> to vector<8x4xf32>
      %104 = arith.truncf %103 : vector<8x4xf32> to vector<8x4xbf16>
      %c2 = arith.constant 2 : index
      %c0_62 = arith.constant 0 : index
      %c0_63 = arith.constant 0 : index
      %105 = vector.load %arg11[%c2, %c0_62, %c0_63] : memref<8x8x4xbf16, #tpu.memory_space<vmem>>, vector<1x8x4xbf16>
      %106 = vector.shape_cast %105 : vector<1x8x4xbf16> to vector<8x4xbf16>
      %107 = vector.shape_cast %104 : vector<8x4xbf16> to vector<1x8x4xbf16>
      tpu.vector_store %arg11[%c2, %c0_62, %c0_63], %107 {strides = array<i32>} : memref<8x8x4xbf16, #tpu.memory_space<vmem>>, vector<1x8x4xbf16>,
      %108 = vector.extract_strided_slice %68 {offsets = [0, 72], sizes = [8, 4], strides = [1, 1]} : vector<8x96xf32> to vector<8x4xf32>
      %109 = arith.truncf %108 : vector<8x4xf32> to vector<8x4xbf16>
      %c2_64 = arith.constant 2 : index
      %c0_65 = arith.constant 0 : index
      %c0_66 = arith.constant 0 : index
      %110 = vector.load %arg12[%c2_64, %c0_65, %c0_66] : memref<8x8x4xbf16, #tpu.memory_space<vmem>>, vector<1x8x4xbf16>
      %111 = vector.shape_cast %110 : vector<1x8x4xbf16> to vector<8x4xbf16>
      %112 = vector.shape_cast %109 : vector<8x4xbf16> to vector<1x8x4xbf16>
      tpu.vector_store %arg12[%c2_64, %c0_65, %c0_66], %112 {strides = array<i32>} : memref<8x8x4xbf16, #tpu.memory_space<vmem>>, vector<1x8x4xbf16>,
      %113 = vector.extract_strided_slice %68 {offsets = [0, 8], sizes = [8, 4], strides = [1, 1]} : vector<8x96xf32> to vector<8x4xf32>
      %cst_67 = arith.constant 5.000000e-01 : f32
      %114 = vector.broadcast %cst_67 : f32 to vector<8x4xf32>
      %115 = arith.mulf %113, %114 : vector<8x4xf32>
      %116 = arith.truncf %115 : vector<8x4xf32> to vector<8x4xbf16>
      %c0_68 = arith.constant 0 : index
      %c2_69 = arith.constant 2 : index
      %c0_70 = arith.constant 0 : index
      %c0_71 = arith.constant 0 : index
      %117 = vector.load %arg10[%c0_68, %c2_69, %c0_70, %c0_71] : memref<1x8x8x4xbf16, #tpu.memory_space<vmem>>, vector<1x1x8x4xbf16>
      %118 = vector.shape_cast %117 : vector<1x1x8x4xbf16> to vector<8x4xbf16>
      %119 = vector.shape_cast %116 : vector<8x4xbf16> to vector<1x1x8x4xbf16>
      tpu.vector_store %arg10[%c0_68, %c2_69, %c0_70, %c0_71], %119 {strides = array<i32>} : memref<1x8x8x4xbf16, #tpu.memory_space<vmem>>, vector<1x1x8x4xbf16>,
      %120 = vector.extract_strided_slice %68 {offsets = [0, 44], sizes = [8, 4], strides = [1, 1]} : vector<8x96xf32> to vector<8x4xf32>
      %121 = arith.truncf %120 : vector<8x4xf32> to vector<8x4xbf16>
      %c3 = arith.constant 3 : index
      %c0_72 = arith.constant 0 : index
      %c0_73 = arith.constant 0 : index
      %122 = vector.load %arg11[%c3, %c0_72, %c0_73] : memref<8x8x4xbf16, #tpu.memory_space<vmem>>, vector<1x8x4xbf16>
      %123 = vector.shape_cast %122 : vector<1x8x4xbf16> to vector<8x4xbf16>
      %124 = vector.shape_cast %121 : vector<8x4xbf16> to vector<1x8x4xbf16>
      tpu.vector_store %arg11[%c3, %c0_72, %c0_73], %124 {strides = array<i32>} : memref<8x8x4xbf16, #tpu.memory_space<vmem>>, vector<1x8x4xbf16>,
      %125 = vector.extract_strided_slice %68 {offsets = [0, 76], sizes = [8, 4], strides = [1, 1]} : vector<8x96xf32> to vector<8x4xf32>
      %126 = arith.truncf %125 : vector<8x4xf32> to vector<8x4xbf16>
      %c3_74 = arith.constant 3 : index
      %c0_75 = arith.constant 0 : index
      %c0_76 = arith.constant 0 : index
      %127 = vector.load %arg12[%c3_74, %c0_75, %c0_76] : memref<8x8x4xbf16, #tpu.memory_space<vmem>>, vector<1x8x4xbf16>
      %128 = vector.shape_cast %127 : vector<1x8x4xbf16> to vector<8x4xbf16>
      %129 = vector.shape_cast %126 : vector<8x4xbf16> to vector<1x8x4xbf16>
      tpu.vector_store %arg12[%c3_74, %c0_75, %c0_76], %129 {strides = array<i32>} : memref<8x8x4xbf16, #tpu.memory_space<vmem>>, vector<1x8x4xbf16>,
      %130 = vector.extract_strided_slice %68 {offsets = [0, 12], sizes = [8, 4], strides = [1, 1]} : vector<8x96xf32> to vector<8x4xf32>
      %cst_77 = arith.constant 5.000000e-01 : f32
      %131 = vector.broadcast %cst_77 : f32 to vector<8x4xf32>
      %132 = arith.mulf %130, %131 : vector<8x4xf32>
      %133 = arith.truncf %132 : vector<8x4xf32> to vector<8x4xbf16>
      %c0_78 = arith.constant 0 : index
      %c3_79 = arith.constant 3 : index
      %c0_80 = arith.constant 0 : index
      %c0_81 = arith.constant 0 : index
      %134 = vector.load %arg10[%c0_78, %c3_79, %c0_80, %c0_81] : memref<1x8x8x4xbf16, #tpu.memory_space<vmem>>, vector<1x1x8x4xbf16>
      %135 = vector.shape_cast %134 : vector<1x1x8x4xbf16> to vector<8x4xbf16>
      %136 = vector.shape_cast %133 : vector<8x4xbf16> to vector<1x1x8x4xbf16>
      tpu.vector_store %arg10[%c0_78, %c3_79, %c0_80, %c0_81], %136 {strides = array<i32>} : memref<1x8x8x4xbf16, #tpu.memory_space<vmem>>, vector<1x1x8x4xbf16>,
      %137 = vector.extract_strided_slice %68 {offsets = [0, 48], sizes = [8, 4], strides = [1, 1]} : vector<8x96xf32> to vector<8x4xf32>
      %138 = arith.truncf %137 : vector<8x4xf32> to vector<8x4xbf16>
      %c4 = arith.constant 4 : index
      %c0_82 = arith.constant 0 : index
      %c0_83 = arith.constant 0 : index
      %139 = vector.load %arg11[%c4, %c0_82, %c0_83] : memref<8x8x4xbf16, #tpu.memory_space<vmem>>, vector<1x8x4xbf16>
      %140 = vector.shape_cast %139 : vector<1x8x4xbf16> to vector<8x4xbf16>
      %141 = vector.shape_cast %138 : vector<8x4xbf16> to vector<1x8x4xbf16>
      tpu.vector_store %arg11[%c4, %c0_82, %c0_83], %141 {strides = array<i32>} : memref<8x8x4xbf16, #tpu.memory_space<vmem>>, vector<1x8x4xbf16>,
      %142 = vector.extract_strided_slice %68 {offsets = [0, 80], sizes = [8, 4], strides = [1, 1]} : vector<8x96xf32> to vector<8x4xf32>
      %143 = arith.truncf %142 : vector<8x4xf32> to vector<8x4xbf16>
      %c4_84 = arith.constant 4 : index
      %c0_85 = arith.constant 0 : index
      %c0_86 = arith.constant 0 : index
      %144 = vector.load %arg12[%c4_84, %c0_85, %c0_86] : memref<8x8x4xbf16, #tpu.memory_space<vmem>>, vector<1x8x4xbf16>
      %145 = vector.shape_cast %144 : vector<1x8x4xbf16> to vector<8x4xbf16>
      %146 = vector.shape_cast %143 : vector<8x4xbf16> to vector<1x8x4xbf16>
      tpu.vector_store %arg12[%c4_84, %c0_85, %c0_86], %146 {strides = array<i32>} : memref<8x8x4xbf16, #tpu.memory_space<vmem>>, vector<1x8x4xbf16>,
      %147 = vector.extract_strided_slice %68 {offsets = [0, 16], sizes = [8, 4], strides = [1, 1]} : vector<8x96xf32> to vector<8x4xf32>
      %cst_87 = arith.constant 5.000000e-01 : f32
      %148 = vector.broadcast %cst_87 : f32 to vector<8x4xf32>
      %149 = arith.mulf %147, %148 : vector<8x4xf32>
      %150 = arith.truncf %149 : vector<8x4xf32> to vector<8x4xbf16>
      %c0_88 = arith.constant 0 : index
      %c4_89 = arith.constant 4 : index
      %c0_90 = arith.constant 0 : index
      %c0_91 = arith.constant 0 : index
      %151 = vector.load %arg10[%c0_88, %c4_89, %c0_90, %c0_91] : memref<1x8x8x4xbf16, #tpu.memory_space<vmem>>, vector<1x1x8x4xbf16>
      %152 = vector.shape_cast %151 : vector<1x1x8x4xbf16> to vector<8x4xbf16>
      %153 = vector.shape_cast %150 : vector<8x4xbf16> to vector<1x1x8x4xbf16>
      tpu.vector_store %arg10[%c0_88, %c4_89, %c0_90, %c0_91], %153 {strides = array<i32>} : memref<1x8x8x4xbf16, #tpu.memory_space<vmem>>, vector<1x1x8x4xbf16>,
      %154 = vector.extract_strided_slice %68 {offsets = [0, 52], sizes = [8, 4], strides = [1, 1]} : vector<8x96xf32> to vector<8x4xf32>
      %155 = arith.truncf %154 : vector<8x4xf32> to vector<8x4xbf16>
      %c5 = arith.constant 5 : index
      %c0_92 = arith.constant 0 : index
      %c0_93 = arith.constant 0 : index
      %156 = vector.load %arg11[%c5, %c0_92, %c0_93] : memref<8x8x4xbf16, #tpu.memory_space<vmem>>, vector<1x8x4xbf16>
      %157 = vector.shape_cast %156 : vector<1x8x4xbf16> to vector<8x4xbf16>
      %158 = vector.shape_cast %155 : vector<8x4xbf16> to vector<1x8x4xbf16>
      tpu.vector_store %arg11[%c5, %c0_92, %c0_93], %158 {strides = array<i32>} : memref<8x8x4xbf16, #tpu.memory_space<vmem>>, vector<1x8x4xbf16>,
      %159 = vector.extract_strided_slice %68 {offsets = [0, 84], sizes = [8, 4], strides = [1, 1]} : vector<8x96xf32> to vector<8x4xf32>
      %160 = arith.truncf %159 : vector<8x4xf32> to vector<8x4xbf16>
      %c5_94 = arith.constant 5 : index
      %c0_95 = arith.constant 0 : index
      %c0_96 = arith.constant 0 : index
      %161 = vector.load %arg12[%c5_94, %c0_95, %c0_96] : memref<8x8x4xbf16, #tpu.memory_space<vmem>>, vector<1x8x4xbf16>
      %162 = vector.shape_cast %161 : vector<1x8x4xbf16> to vector<8x4xbf16>
      %163 = vector.shape_cast %160 : vector<8x4xbf16> to vector<1x8x4xbf16>
      tpu.vector_store %arg12[%c5_94, %c0_95, %c0_96], %163 {strides = array<i32>} : memref<8x8x4xbf16, #tpu.memory_space<vmem>>, vector<1x8x4xbf16>,
      %164 = vector.extract_strided_slice %68 {offsets = [0, 20], sizes = [8, 4], strides = [1, 1]} : vector<8x96xf32> to vector<8x4xf32>
      %cst_97 = arith.constant 5.000000e-01 : f32
      %165 = vector.broadcast %cst_97 : f32 to vector<8x4xf32>
      %166 = arith.mulf %164, %165 : vector<8x4xf32>
      %167 = arith.truncf %166 : vector<8x4xf32> to vector<8x4xbf16>
      %c0_98 = arith.constant 0 : index
      %c5_99 = arith.constant 5 : index
      %c0_100 = arith.constant 0 : index
      %c0_101 = arith.constant 0 : index
      %168 = vector.load %arg10[%c0_98, %c5_99, %c0_100, %c0_101] : memref<1x8x8x4xbf16, #tpu.memory_space<vmem>>, vector<1x1x8x4xbf16>
      %169 = vector.shape_cast %168 : vector<1x1x8x4xbf16> to vector<8x4xbf16>
      %170 = vector.shape_cast %167 : vector<8x4xbf16> to vector<1x1x8x4xbf16>
      tpu.vector_store %arg10[%c0_98, %c5_99, %c0_100, %c0_101], %170 {strides = array<i32>} : memref<1x8x8x4xbf16, #tpu.memory_space<vmem>>, vector<1x1x8x4xbf16>,
      %171 = vector.extract_strided_slice %68 {offsets = [0, 56], sizes = [8, 4], strides = [1, 1]} : vector<8x96xf32> to vector<8x4xf32>
      %172 = arith.truncf %171 : vector<8x4xf32> to vector<8x4xbf16>
      %c6 = arith.constant 6 : index
      %c0_102 = arith.constant 0 : index
      %c0_103 = arith.constant 0 : index
      %173 = vector.load %arg11[%c6, %c0_102, %c0_103] : memref<8x8x4xbf16, #tpu.memory_space<vmem>>, vector<1x8x4xbf16>
      %174 = vector.shape_cast %173 : vector<1x8x4xbf16> to vector<8x4xbf16>
      %175 = vector.shape_cast %172 : vector<8x4xbf16> to vector<1x8x4xbf16>
      tpu.vector_store %arg11[%c6, %c0_102, %c0_103], %175 {strides = array<i32>} : memref<8x8x4xbf16, #tpu.memory_space<vmem>>, vector<1x8x4xbf16>,
      %176 = vector.extract_strided_slice %68 {offsets = [0, 88], sizes = [8, 4], strides = [1, 1]} : vector<8x96xf32> to vector<8x4xf32>
      %177 = arith.truncf %176 : vector<8x4xf32> to vector<8x4xbf16>
      %c6_104 = arith.constant 6 : index
      %c0_105 = arith.constant 0 : index
      %c0_106 = arith.constant 0 : index
      %178 = vector.load %arg12[%c6_104, %c0_105, %c0_106] : memref<8x8x4xbf16, #tpu.memory_space<vmem>>, vector<1x8x4xbf16>
      %179 = vector.shape_cast %178 : vector<1x8x4xbf16> to vector<8x4xbf16>
      %180 = vector.shape_cast %177 : vector<8x4xbf16> to vector<1x8x4xbf16>
      tpu.vector_store %arg12[%c6_104, %c0_105, %c0_106], %180 {strides = array<i32>} : memref<8x8x4xbf16, #tpu.memory_space<vmem>>, vector<1x8x4xbf16>,
      %181 = vector.extract_strided_slice %68 {offsets = [0, 24], sizes = [8, 4], strides = [1, 1]} : vector<8x96xf32> to vector<8x4xf32>
      %cst_107 = arith.constant 5.000000e-01 : f32
      %182 = vector.broadcast %cst_107 : f32 to vector<8x4xf32>
      %183 = arith.mulf %181, %182 : vector<8x4xf32>
      %184 = arith.truncf %183 : vector<8x4xf32> to vector<8x4xbf16>
      %c0_108 = arith.constant 0 : index
      %c6_109 = arith.constant 6 : index
      %c0_110 = arith.constant 0 : index
      %c0_111 = arith.constant 0 : index
      %185 = vector.load %arg10[%c0_108, %c6_109, %c0_110, %c0_111] : memref<1x8x8x4xbf16, #tpu.memory_space<vmem>>, vector<1x1x8x4xbf16>
      %186 = vector.shape_cast %185 : vector<1x1x8x4xbf16> to vector<8x4xbf16>
      %187 = vector.shape_cast %184 : vector<8x4xbf16> to vector<1x1x8x4xbf16>
      tpu.vector_store %arg10[%c0_108, %c6_109, %c0_110, %c0_111], %187 {strides = array<i32>} : memref<1x8x8x4xbf16, #tpu.memory_space<vmem>>, vector<1x1x8x4xbf16>,
      %188 = vector.extract_strided_slice %68 {offsets = [0, 60], sizes = [8, 4], strides = [1, 1]} : vector<8x96xf32> to vector<8x4xf32>
      %189 = arith.truncf %188 : vector<8x4xf32> to vector<8x4xbf16>
      %c7 = arith.constant 7 : index
      %c0_112 = arith.constant 0 : index
      %c0_113 = arith.constant 0 : index
      %190 = vector.load %arg11[%c7, %c0_112, %c0_113] : memref<8x8x4xbf16, #tpu.memory_space<vmem>>, vector<1x8x4xbf16>
      %191 = vector.shape_cast %190 : vector<1x8x4xbf16> to vector<8x4xbf16>
      %192 = vector.shape_cast %189 : vector<8x4xbf16> to vector<1x8x4xbf16>
      tpu.vector_store %arg11[%c7, %c0_112, %c0_113], %192 {strides = array<i32>} : memref<8x8x4xbf16, #tpu.memory_space<vmem>>, vector<1x8x4xbf16>,
      %193 = vector.extract_strided_slice %68 {offsets = [0, 92], sizes = [8, 4], strides = [1, 1]} : vector<8x96xf32> to vector<8x4xf32>
      %194 = arith.truncf %193 : vector<8x4xf32> to vector<8x4xbf16>
      %c7_114 = arith.constant 7 : index
      %c0_115 = arith.constant 0 : index
      %c0_116 = arith.constant 0 : index
      %195 = vector.load %arg12[%c7_114, %c0_115, %c0_116] : memref<8x8x4xbf16, #tpu.memory_space<vmem>>, vector<1x8x4xbf16>
      %196 = vector.shape_cast %195 : vector<1x8x4xbf16> to vector<8x4xbf16>
      %197 = vector.shape_cast %194 : vector<8x4xbf16> to vector<1x8x4xbf16>
      tpu.vector_store %arg12[%c7_114, %c0_115, %c0_116], %197 {strides = array<i32>} : memref<8x8x4xbf16, #tpu.memory_space<vmem>>, vector<1x8x4xbf16>,
      %198 = vector.extract_strided_slice %68 {offsets = [0, 28], sizes = [8, 4], strides = [1, 1]} : vector<8x96xf32> to vector<8x4xf32>
      %cst_117 = arith.constant 5.000000e-01 : f32
      %199 = vector.broadcast %cst_117 : f32 to vector<8x4xf32>
      %200 = arith.mulf %198, %199 : vector<8x4xf32>
      %201 = arith.truncf %200 : vector<8x4xf32> to vector<8x4xbf16>
      %c0_118 = arith.constant 0 : index
      %c7_119 = arith.constant 7 : index
      %c0_120 = arith.constant 0 : index
      %c0_121 = arith.constant 0 : index
      %202 = vector.load %arg10[%c0_118, %c7_119, %c0_120, %c0_121] : memref<1x8x8x4xbf16, #tpu.memory_space<vmem>>, vector<1x1x8x4xbf16>
      %203 = vector.shape_cast %202 : vector<1x1x8x4xbf16> to vector<8x4xbf16>
      %204 = vector.shape_cast %201 : vector<8x4xbf16> to vector<1x1x8x4xbf16>
      tpu.vector_store %arg10[%c0_118, %c7_119, %c0_120, %c0_121], %204 {strides = array<i32>} : memref<1x8x8x4xbf16, #tpu.memory_space<vmem>>, vector<1x1x8x4xbf16>,
    } else {
    }
    %3 = arith.index_cast %arg1 : i32 to index
    %c0 = arith.constant 0 : index
    %c0_1 = arith.constant 0 : index
    %c0_2 = arith.constant 0 : index
    %4 = vector.load %arg10[%3, %c0, %c0_1, %c0_2] : memref<1x8x8x4xbf16, #tpu.memory_space<vmem>>, vector<1x8x8x4xbf16>
    %5 = vector.shape_cast %4 : vector<1x8x8x4xbf16> to vector<8x8x4xbf16>
    %c0_3 = arith.constant 0 : index
    %c0_4 = arith.constant 0 : index
    %c0_5 = arith.constant 0 : index
    %6 = vector.load %arg11[%c0_3, %c0_4, %c0_5] : memref<8x8x4xbf16, #tpu.memory_space<vmem>>, vector<8x8x4xbf16>
    %c0_6 = arith.constant 0 : index
    %c0_7 = arith.constant 0 : index
    %c0_8 = arith.constant 0 : index
    %7 = vector.load %arg12[%c0_6, %c0_7, %c0_8] : memref<8x8x4xbf16, #tpu.memory_space<vmem>>, vector<8x8x4xbf16>
    "tpu.trace_start"() <{level = 10 : i32, message = "hqd,hkd->hqk"}> : () -> ()
    %cst = arith.constant dense<0.000000e+00> : vector<8x8x8xf32>
    %8 = tpu.matmul %5, %6, %cst {dimension_numbers = #tpu.dot_dimension_numbers<[2], [2], [1], [1], [0, 0, 0, 1, 1, 1], [0], [0]>} : vector<8x8x4xbf16>, vector<8x8x4xbf16>, vector<8x8x8xf32> -> vector<8x8x8xf32>
    "tpu.trace_stop"() : () -> ()
    %cst_9 = arith.constant dense<0xFF800000> : vector<8x8xf32>
    %9 = vector.multi_reduction <maximumf>, %8, %cst_9 [2] : vector<8x8x8xf32> to vector<8x8xf32>
    %10 = vector.shape_cast %9 : vector<8x8xf32> to vector<8x8x1xf32>
    %11 = vector.broadcast %10 : vector<8x8x1xf32> to vector<8x8x8xf32>
    %12 = arith.subf %8, %11 : vector<8x8x8xf32>
    %13 = math.exp %12 : vector<8x8x8xf32>
    %cst_10 = arith.constant dense<0.000000e+00> : vector<8x8xf32>
    %14 = vector.multi_reduction <add>, %13, %cst_10 [2] : vector<8x8x8xf32> to vector<8x8xf32>
    %15 = vector.shape_cast %14 : vector<8x8xf32> to vector<8x8x1xf32>
    %16 = tpu.reciprocal %15 {approx = true} : vector<8x8x1xf32> -> vector<8x8x1xf32>
    %17 = vector.broadcast %16 : vector<8x8x1xf32> to vector<8x8x8xf32>
    %18 = arith.mulf %13, %17 : vector<8x8x8xf32>
    %19 = arith.truncf %18 : vector<8x8x8xf32> to vector<8x8x8xbf16>
    "tpu.trace_start"() <{level = 10 : i32, message = "hqk,hkd->hqd"}> : () -> ()
    %cst_11 = arith.constant dense<0.000000e+00> : vector<8x8x4xf32>
    %20 = tpu.matmul %19, %7, %cst_11 {dimension_numbers = #tpu.dot_dimension_numbers<[2], [1], [1], [2], [0, 0, 0, 1, 1, 2], [0], [0]>} : vector<8x8x8xbf16>, vector<8x8x4xbf16>, vector<8x8x4xf32> -> vector<8x8x4xf32>
    "tpu.trace_stop"() : () -> ()
    %21 = arith.truncf %20 : vector<8x8x4xf32> to vector<8x8x4xbf16>
    %c0_12 = arith.constant 0 : index
    %c0_13 = arith.constant 0 : index
    %c0_14 = arith.constant 0 : index
    %22 = vector.load %arg7[%c0_12, %c0_13, %c0_14] : memref<8x4x32xbf16, #tpu.memory_space<vmem>>, vector<8x4x32xbf16>
    "tpu.trace_start"() <{level = 10 : i32, message = "hqd,hde->hqe"}> : () -> ()
    %cst_15 = arith.constant dense<0.000000e+00> : vector<8x8x32xf32>
    %23 = tpu.matmul %21, %22, %cst_15 {dimension_numbers = #tpu.dot_dimension_numbers<[2], [1], [1], [2], [0, 0, 0, 1, 1, 2], [0], [0]>} : vector<8x8x4xbf16>, vector<8x4x32xbf16>, vector<8x8x32xf32> -> vector<8x8x32xf32>
    "tpu.trace_stop"() : () -> ()
    %cst_16 = arith.constant dense<0.000000e+00> : vector<8x32xf32>
    %24 = vector.multi_reduction <add>, %23, %cst_16 [0] : vector<8x8x32xf32> to vector<8x32xf32>
    %c0_17 = arith.constant 0 : index
    %c0_18 = arith.constant 0 : index
    %25 = vector.load %arg8[%c0_17, %c0_18] : memref<1x32xf32, #tpu.memory_space<vmem>>, vector<1x32xf32>
    %26 = vector.broadcast %25 : vector<1x32xf32> to vector<8x32xf32>
    %27 = arith.addf %24, %26 : vector<8x32xf32>
    %c8_i32 = arith.constant 8 : i32
    %28 = arith.muli %arg1, %c8_i32 : i32
    %29 = tpu.assume_multiple %28, 8 : i32
    %c0_19 = arith.constant 0 : index
    %30 = arith.index_cast %29 : i32 to index
    %c0_20 = arith.constant 0 : index
    %31 = vector.load %arg2[%c0_19, %30, %c0_20] : memref<1x8x32xf32, #tpu.memory_space<vmem>>, vector<1x8x32xf32>
    %32 = vector.shape_cast %31 : vector<1x8x32xf32> to vector<8x32xf32>
    %33 = arith.addf %32, %27 : vector<8x32xf32>
    %c0_21 = arith.constant 0 : index
    %c0_22 = arith.constant 0 : index
    %c0_23 = arith.constant 0 : index
    %34 = vector.load %arg9[%c0_21, %c0_22, %c0_23] : memref<1x8x32xf32, #tpu.memory_space<vmem>>, vector<1x8x32xf32>
    %35 = vector.shape_cast %34 : vector<1x8x32xf32> to vector<8x32xf32>
    %36 = vector.shape_cast %33 : vector<8x32xf32> to vector<1x8x32xf32>
    tpu.vector_store %arg9[%c0_21, %c0_22, %c0_23], %36 {strides = array<i32>} : memref<1x8x32xf32, #tpu.memory_space<vmem>>, vector<1x8x32xf32>,
    return
  }
  func.func @transform_0(%arg0: i32, %arg1: i32) -> (i32, i32, i32) {
    %c0_i32 = arith.constant 0 : i32
    %c0_i32_0 = arith.constant 0 : i32
    %c0_i32_1 = arith.constant 0 : i32
    return %arg0, %c0_i32, %c0_i32_0 : i32, i32, i32
  }
  func.func @transform_1(%arg0: i32, %arg1: i32) -> (i32, i32) {
    %c0_i32 = arith.constant 0 : i32
    %c0_i32_0 = arith.constant 0 : i32
    %c0_i32_1 = arith.constant 0 : i32
    return %c0_i32, %c0_i32_0 : i32, i32
  }
  func.func @transform_2(%arg0: i32, %arg1: i32) -> (i32, i32) {
    %c0_i32 = arith.constant 0 : i32
    %c0_i32_0 = arith.constant 0 : i32
    %c0_i32_1 = arith.constant 0 : i32
    return %c0_i32, %c0_i32_0 : i32, i32
  }
  func.func @transform_3(%arg0: i32, %arg1: i32) -> (i32, i32) {
    %c0_i32 = arith.constant 0 : i32
    %c0_i32_0 = arith.constant 0 : i32
    %c0_i32_1 = arith.constant 0 : i32
    return %c0_i32, %c0_i32_0 : i32, i32
  }
  func.func @transform_4(%arg0: i32, %arg1: i32) -> (i32, i32) {
    %c0_i32 = arith.constant 0 : i32
    %c0_i32_0 = arith.constant 0 : i32
    %c0_i32_1 = arith.constant 0 : i32
    return %c0_i32, %c0_i32_0 : i32, i32
  }
  func.func @transform_5(%arg0: i32, %arg1: i32) -> (i32, i32, i32) {
    %c0_i32 = arith.constant 0 : i32
    %c0_i32_0 = arith.constant 0 : i32
    %c0_i32_1 = arith.constant 0 : i32
    %c0_i32_2 = arith.constant 0 : i32
    return %c0_i32, %c0_i32_0, %c0_i32_1 : i32, i32, i32
  }
  func.func @transform_6(%arg0: i32, %arg1: i32) -> (i32, i32) {
    %c0_i32 = arith.constant 0 : i32
    %c0_i32_0 = arith.constant 0 : i32
    %c0_i32_1 = arith.constant 0 : i32
    return %c0_i32, %c0_i32_0 : i32, i32
  }
  func.func @transform_7(%arg0: i32, %arg1: i32) -> (i32, i32, i32) {
    %c0_i32 = arith.constant 0 : i32
    %c0_i32_0 = arith.constant 0 : i32
    return %arg0, %arg1, %c0_i32 : i32, i32, i32
  }
}

</mosaic_0001>

<bundles_post_ra>
// kernel: tpu_custom_call.1
= control target key start
LH: loop header
LB: loop body
LE: loop exit
PB: predicated region body
PF: predicated region fallthrough
CT: control target
= control target key end

     0   :  { %s3028_s0 = inlined_call_operand.hbm [shape: f32[2,8,32], index: 0, kind: input, shape index: {}]   ;;  %s3029_s1 = inlined_call_operand.vmem [shape: f32[1,32], index: 1, kind: input, shape index: {}]   ;;  %s3030_s2 = inlined_call_operand.vmem [shape: f32[1,32], index: 2, kind: input, shape index: {}]   ;;  %s3031_s3 = inlined_call_operand.hbm [shape: bf16[32,96], index: 3, kind: input, shape index: {}]   ;;  %s3032_s4 = inlined_call_operand.vmem [shape: f32[1,96], index: 4, kind: input, shape index: {}]   ;;  %s3033_s5 = inlined_call_operand.hbm [shape: bf16[8,4,32], index: 5, kind: input, shape index: {}]   ;;  %s3034_s6 = inlined_call_operand.vmem [shape: f32[1,32], index: 6, kind: input, shape index: {}]   ;;  %s3035_s7 = inlined_call_operand.hbm [shape: f32[2,8,32], index: 7, kind: output, shape index: {}]  }
   0x1   :  { %3040 = sst [smem:[#allocation16_spill]] %s3031_s3 }
   0x2   :  { %3041 = sst [smem:[#allocation17_spill]] %s3033_s5 }
   0x3   :  { %12 = vsyncpa [#allocation6], 0 }
   0x4   :  { %14 = vsyncpa [#allocation6 + $0x1], 0 }
   0x5   :  { %15 = vsyncpa [#allocation9], 0 }
   0x6   :  { %16 = vsyncpa [#allocation7], 0 }
   0x7   :  { %18 = vsyncpa [#allocation7 + $0x1], 0  ;;  %s2600_s24 = smov 0   ;;  %s2602_s25 = smov 0  }
   0x8   :  { %s2604_s26 = smov 0   ;;  %s2606_s27 = smov 0  }
   0x9   :  { %s2608_s28 = smov 0   ;;  %s2610_s29 = smov 0  }
   0xa LB: > { %s1957_s30 = sadd.s32 4294967295, %s2525_s29   ;;  %s1958_s8 = sadd.s32 4294967294, %s2525_s29   ;;  %s2525_s29 = sphi %s2610_s29, %s24_s29   ;;  %s2521_s28 = sphi %s2608_s28, %s3062_s28   ;;  %s2517_s27 = sphi %s2606_s27, %s3061_s27   ;;  %s2513_s26 = sphi %s2604_s26, %s3060_s26   ;;  %s2509_s25 = sphi %s2602_s25, %s3059_s25   ;;  %s2505_s24 = sphi %s2600_s24, %s3058_s24  }
   0xb   : > { %p56_p0 = scmp.ne.s32.totalorder %s2509_s25, %s2505_s24  ;;  %p2634_p1 = scmp.eq.s32.totalorder %s1957_s30, 0 }
   0xc   : > { %p2638_p2 = scmp.eq.s32.totalorder %s1957_s30, 1  ;;  %p214_p3 = scmp.eq.s32.totalorder %s1958_s8, 1 }
   0xd   : > { %s3042_s9 = scalar_select %p2634_p1, 1, 0 }
   0xe   : > { %p2644_p4 = por %p2634_p1, %p56_p0  ;;  %p1959_p5 = scmp.ge.s32.totalorder %s2525_s29, 1 }
   0xf   : > { %p2649_p6 = por %p214_p3, %p56_p0  ;;  %p221_p7 = scmp.lt.s32.totalorder %s2525_s29, 3 }
  0x10   : > { %s3044_s11 = scalar_select %p2644_p4, 1, 0 }
  0x11   : > { %s3045_s12 = scalar_select %p2649_p6, 1, 0 }
  0x12   : > { %p2654_p8 = pnand %p1959_p5, %p221_p7  ;;  %s2527_s14 = smov [#allocation8]  }
  0x13   : > { %s239_s15 = sshll.u32 %s2527_s14, 4  ;;  %s2528_s17 = smov [#allocation10]   ;;  %s240_s15 = int_to_ptr.vmem [resolvable:$true] %s239_s15 }
  0x14   : > { %p2224_p9 = pneg %p2654_p8  ;;  %s255_s18 = sshll.u32 %s2528_s17, 4  ;;  %s256_s18 = int_to_ptr.vmem [resolvable:$true] %s255_s18 }
  0x15   : > { %s2372_s19 = scalar_lea.vmem %s240_s15, 256  ;;  %p2380_p5 = scmp.lt.s32.totalorder %s240_s15, %s240_s15 }
  0x16   : > { %p2663_p11 = pnand %p2224_p9, %p2634_p1  ;;  %p2373_p13 = scmp.ne.s32.totalorder %s240_s15, %s2372_s19 }
  0x17   : > { %p2381_p7 = scmp.lt.s32.totalorder %s2372_s19, %s2372_s19 }
  0x18   : > { %p2363_p12 = pneg %p2663_p11 }
  0x19   : > { %p2382_p10 = por %p2381_p7, %p2380_p5 }
  0x1a   : > { %p2375_p0 = pnand %p2373_p13, %p2363_p12 }
  0x1c   : > { %p2376_p3 = pneg %p2375_p0 }
  0x1e   : > { %p2383_p9 = pnand %p2382_p10, %p2376_p3 }
  0x20   : > { %2386 = shalt.err (!%p2383_p9)
}
  0x21   : > { %s2529_s20 = smov 64   ;;  %s2530_s21 = smov 4  }
  0x22   : > { %s3048_s3 = sld [smem:[#allocation16_spill]]  ;;  %s2398_s30 = scalar_lea.vmem %s256_s18, 256 }
  0x23   : > { %p2399_p6 = scmp.ne.s32.totalorder %s256_s18, %s2398_s30  ;;  %p2406_p1 = scmp.lt.s32.totalorder %s256_s18, %s256_s18 }
  0x24   : > { %p2407_p4 = scmp.lt.s32.totalorder %s2398_s30, %s2398_s30 }
  0x25   : > { %p2401_p13 = pnand %p2399_p6, %p2363_p12 }
  0x26   : > { %p2408_p5 = por %p2407_p4, %p2406_p1 }
  0x27   : > { %p2402_p0 = pneg %p2401_p13 }
  0x28   : > { %2227 = dma.hbm_to_vmem [thread:$0]  (!%p2663_p11), %s3048_s3, 256, %s240_s15, [#allocation9], %s2529_s20, %s2529_s20, %s2530_s21  }
  0x29   : > { %p2409_p10 = pnand %p2408_p5, %p2402_p0 }
  0x2b   : > { %2412 = shalt.err (!%p2409_p10)
}
  0x2c   : > { %s2531_s8 = smov 32   ;;  %s2532_s14 = smov 2  }
  0x2d   : > { %s3049_s5 = sld [smem:[#allocation17_spill]]  ;;  %s36_s19 = sadd.s32 1, %s2521_s28 }
  0x2e   : > { %s43_s20 = sadd.s32 1, %s2513_s26  ;;  %p38_p1 = scmp.ge.s32.totalorder %s36_s19, 2 }
  0x2f   : > { %p50_p4 = scmp.ne.s32.totalorder %s2513_s26, %s2509_s25  ;;  %p51_p6 = scmp.eq.s32.totalorder %s2525_s29, 0 }
  0x30   : > { %p2241_p12 = scmp.lt.s32.totalorder %s2525_s29, 2  ;;  %s3064_s19 = smov (%p38_p1, %s36_s19), 0 }
  0x31   : > { %3050 = sst [smem:[#allocation15_spill]] %s3064_s19  ;;  %p52_p3 = por %p51_p6, %p50_p4 }
  0x32   : > { %p2695_p7 = por %p2638_p2, %p50_p4  ;;  %s40_s16 = ssub.s32 %s2521_s28, %s3064_s19 }
  0x33   : > { %2230 = dma.hbm_to_vmem [thread:$0]  (!%p2663_p11), %s3049_s5, 256, %s256_s18, [#allocation9], %s2531_s8, %s2531_s8, %s2532_s14  }
  0x34   : > { %s272_s22 = sand.u32 1, %s2513_s26   ;;  %p41_p9 = scmp.eq.s32.totalorder %s40_s16, 0 }
  0x35   : > { %s1963_s18 = sshll.u32 %s272_s22, 3  ;;  %s1964_s23 = sshll.u32 %s2521_s28, 7 }
  0x36   : > { %s2704_s30 = scalar_select %p41_p9, %s2513_s26, %s43_s20  }
  0x37   : > { %s281_s15 = scalar_lea.hbm %s3028_s0, %s1964_s23  ;;  %s276_s17 = scalar_lea.vmem [#allocation5], %s1963_s18 }
  0x38   : > { %s283_s3 = sshll.u32 %s276_s17, 4  ;;  %p2711_p11 = pnand %p2241_p12, %p52_p3  ;;  %s284_s3 = int_to_ptr.vmem [resolvable:$true] %s283_s3 }
  0x39   : > { %s273_s5 = scalar_lea.sflag [#allocation6], %s272_s22  ;;  %s2426_s16 = scalar_lea.vmem %s284_s3, 128 }
  0x3a   : > { %p2415_p2 = pneg %p2711_p11  ;;  %p2427_p13 = scmp.ne.s32.totalorder %s284_s3, %s2426_s16 }
  0x3b   : > { %s2533_s20 = smov [#allocation5]  }
  0x3c   : > { %p2429_p0 = pnand %p2427_p13, %p2415_p2  ;;  %s2431_s19 = sshll.u32 %s2533_s20, 4  ;;  %s2432_s19 = int_to_ptr.vmem [resolvable:$false] %s2431_s19 }
  0x3d   : > { %s2433_s23 = scalar_lea.vmem %s2432_s19, 256  ;;  %p2434_p10 = scmp.lt.s32.totalorder %s284_s3, %s2432_s19 }
  0x3e   : > { %p2430_p5 = pneg %p2429_p0  ;;  %p2435_p1 = scmp.lt.s32.totalorder %s2433_s23, %s2426_s16 }
  0x40   : > { %p2436_p4 = por %p2435_p1, %p2434_p10 }
  0x42   : > { %p2437_p6 = pnand %p2436_p4, %p2430_p5 }
  0x44   : > { %2440 = shalt.err (!%p2437_p6)
}
  0x45   : > { %2234 = dma.hbm_to_vmem [thread:$0]  (!%p2711_p11), %s281_s15, 128, %s284_s3, %s273_s5  }
  0x46   : > { %292 = sbr.rel (%p2654_p8) target bundleno = 1714 (0x6b2), region = 48  ;;  %s2722_s22 = sand.u32 (!%p2654_p8), 1, %s2509_s25  }
  0x47   : > { %s1966_s18 = sshll.u32 (!%p2654_p8), %s2722_s22, 3  ;;  %s295_s8 = scalar_lea.sflag (!%p2654_p8), [#allocation6], %s2722_s22 }
  0x48   : > { %s2728_s19 = scalar_lea.vmem (!%p2654_p8), [#allocation5], %s1966_s18  ;;  %p3053_p12 = scmp.ne.s32.totalorder (!%p2654_p8), %s3044_s11, 0 }
  0x4b   : > { %2492 = dma.done.wait (%p3053_p12), %s295_s8, 128  }
  0x4c   : > { %2494 = vsyncadd (%p3053_p12), %s295_s8, 4294967168  ;;  %p3054_p3 = scmp.ne.s32.totalorder %s3042_s9, 0 }
  0x4e   : > { %2496 = dma.done.wait (%p3054_p3), [#allocation9], 512  }
  0x4f   : > { %2498 = vsyncadd (%p3054_p3), [#allocation9], 4294966784  ;;  %vm343_vm0 = vcmask 261120   ;;  %v342_v0 = vld [vmem:[%s2728_s19] sm:$0xff]  ;;  %v2324_v7 = vld [vmem:[#allocation8 + $0x8] sm:$0xff]   ;;  %v2534_v8 = vmov 0.0  }
  0x50   : > { %v344_v1 = vsel %vm343_vm0, %v342_v0, 0.0  ;;  %2060 = vmatprep.subr.bf16.mxu0 %v2534_v8  ;;  %vm2535_vm1 = vmmov 0   ;;  %v2325_v9 = vld [vmem:[#allocation8] sm:$0xff]   ;;  %2068 = vmatprep.subr.bf16.mxu1 %v2534_v8  ;;  %v1970_v14 = vld [vmem:[%s3029_s1] ss:$0 sm:$0xff]  ;;  %vm448_vm2 = vcmask 27648  }
  0x51   : > { %345 = vadd.xlane.f32.xlu0 %v344_v1  ;;  %2064 = vmatprep.mubr.msk.bf16.mxu0 %vm2535_vm1, %v2534_v8  ;;  %v1971_v16 = vld [vmem:[%s3030_s2] ss:$0 sm:$0xff]  ;;  %s2536_s15 = smov 88   ;;  %s2537_s17 = smov 96   ;;  %vm592_vm3 = vcmask 31744   ;;  %vm1061_vm4 = vcmask 1043456  }
  0x52   : > { %2061 = vmatpush3.bf16.msra.mxu0 %v2324_v7  ;;  %2070 = vmatprep.mubr.msk.bf16.mxu1 %vm2535_vm1, %v2534_v8  ;;  %v1972_v20 = vld [vmem:[%s3032_s4] ss:$0 sm:$0xff]  ;;  %s2538_s10 = smov 112   ;;  %s2539_s16 = smov 92   ;;  %vm961_vm5 = vcmask 64512   ;;  %vm1446_vm6 = vcmask 1041408  }
  0x53   : > { %2062 = vmatprep.subr.bf16.mxu0 %v2534_v8  ;;  %s2540_s20 = smov 108   ;;  %s2541_s23 = smov 84  }
  0x54   : > { %s2542_s8 = smov 104   ;;  %s2543_s3 = smov 80  }
  0x55   : > { %s2544_s5 = smov 64   ;;  %s2545_s9 = smov 76  }
  0x56   : > { %2063 = vmatpush3.bf16.msra.mxu0 %v2325_v9  ;;  %s2546_s11 = smov 124   ;;  %s2547_s13 = smov 120  }
  0x57   : > { %2074 = vmatprep.subr.bf16.mxu0 %v2534_v8  ;;  %s2548_s14 = smov 116  }
  0xda   : > { %v346_v2 = vpop.xlane.xlu0 %345 }
  0xdb   : > { %v348_v3 = vmul.f32 0.03125, %v346_v2 }
  0xdd   : > { %v349_v4 = vsub.f32 %v342_v0, %v348_v3 }
  0xdf   : > { %v350_v5 = vmul.f32 %v349_v4, %v349_v4 }
  0xe1   : > { %v351_v6 = vsel %vm343_vm0, %v350_v5, 0.0 }
  0xe2   : > { %352 = vadd.xlane.f32.xlu0 %v351_v6 }
 0x16b   : > { %v353_v10 = vpop.xlane.xlu0 %352 }
 0x16c   : > { %v354_v11 = vmul.f32 0.03125, %v353_v10 }
 0x16e   : > { %v355_v12 = vadd.f32 1e-05, %v354_v11 }
 0x170   : > { %2326 = vrsqrt.f32 %v355_v12 }
 0x17d   : > { %v2327_v13 = vpop.eup %2326 }
 0x17e   : > { %v357_v15 = vmul.f32 %v2327_v13, %v349_v4 }
 0x180   : > { %v365_v17 = vmul.f32 %v1970_v14, %v357_v15 }
 0x182   : > { %v373_v18 = vadd.f32 %v1971_v16, %v365_v17 }
 0x184   : > { %v374_v19 = vpack.c.bf16 %v373_v18, %v373_v18 }
 0x186   : > { %2065 = vmatmul.mubr.msk.bf16.vlgmr.msra.gmra.mxu0 %vm343_vm0, %v374_v19 }
 0x187   : > { %2076 = vmatprep.mubr.msk.bf16.mxu0 %vm2535_vm1, %v2534_v8 }
 0x246   : > { %v435_v21 = vpop.f32.mrf.mxu0 }
 0x247   : > { %v436_v22 = vadd.f32 %v1972_v20, %v435_v21 }
 0x248   : > { %v2066_v23 = vpop.f32.mrf.mxu0 }
 0x249   : > { %v2761_v24 = vpack.c.bf16 %v436_v22, %v436_v22  ;;  %v454_v25 = vmul.f32 0.5, %v436_v22 }
 0x24a   : > { %v438_v26 = vpop.f32.mrf.mxu0 }
 0x24b   : > { %v455_v27 = vpack.c.bf16 %v454_v25, %v454_v25  ;;  %475 = vrot.lane.b32.xlu0 %v2761_v24, %s2536_s15  ;;  %445 = vrot.lane.b32.xlu1 %v2761_v24, %s2537_s17  ;;  %s2549_s15 = smov 72   ;;  %s2550_s17 = smov 68  }
 0x24c   : > { %v2067_v28 = vpop.f32.mrf.mxu0 }
 0x24d   : > { %456 = vst.msk [vmem:[#allocation2] sm:$0xf] %vm448_vm2, %v455_v27 }
 0x24f   : > { %515 = vrot.lane.b32.xlu0 %v455_v27, %s2538_s10  ;;  %457 = vrot.lane.b32.xlu1 %v2761_v24, %s2539_s16  ;;  %s2551_s10 = smov 100   ;;  %s2552_s16 = smov 60  }
 0x253   : > { %530 = vrot.lane.b32.xlu0 %v455_v27, %s2540_s20  ;;  %490 = vrot.lane.b32.xlu1 %v2761_v24, %s2541_s23  ;;  %s2553_s20 = smov 52   ;;  %s2554_s23 = smov 56  }
 0x254   : > { %v568_v44 = vld [vmem:[#allocation2] sm:$0xf] }
 0x257   : > { %545 = vrot.lane.b32.xlu0 %v455_v27, %s2542_s8  ;;  %505 = vrot.lane.b32.xlu1 %v2761_v24, %s2543_s3  ;;  %s2555_s8 = smov 48   ;;  %s2556_s3 = smov 44  }
 0x25b   : > { %450 = vrot.lane.b32.xlu0 %v2761_v24, %s2544_s5  ;;  %520 = vrot.lane.b32.xlu1 %v2761_v24, %s2545_s9  ;;  %s2557_s5 = smov 36   ;;  %s2558_s9 = smov 40  }
 0x25f   : > { %470 = vrot.lane.b32.xlu1 %v455_v27, %s2546_s11 }
 0x263   : > { %485 = vrot.lane.b32.xlu1 %v455_v27, %s2547_s13 }
 0x267   : > { %500 = vrot.lane.b32.xlu1 %v455_v27, %s2548_s14  ;;  %s2004_s14 = sshll.u32 %s2517_s27, 7  ;;  %s2559_s27 = smov [#allocation11]  }
 0x26b   : > { %535 = vrot.lane.b32.xlu1 %v2761_v24, %s2549_s15  ;;  %s336_s15 = scalar_lea.vmem [#allocation11], %s1966_s18  ;;  %s2445_s18 = sshll.u32 %s2559_s27, 4  ;;  %s2446_s18 = int_to_ptr.vmem [resolvable:$false] %s2445_s18 }
 0x26f   : > { %550 = vrot.lane.b32.xlu1 %v2761_v24, %s2550_s17  ;;  %s1855_s17 = sshll.u32 %s336_s15, 4  ;;  %s1856_s17 = int_to_ptr.vmem [resolvable:$true] %s1855_s17 }
 0x270   : > { %p2448_p2 = scmp.lt.s32.totalorder %s1856_s17, %s2446_s18 }
 0x273   : > { %560 = vrot.lane.b32.xlu1 %v455_v27, %s2551_s10 }
 0x2bd   : > { %v476_v29 = vpop.permute.xlu0 %475  ;;  %v446_v30 = vpop.permute.xlu1 %445 }
 0x2be   : > { %479 = vst.msk [vmem:[#allocation3 + $0x8] sm:$0xf] %vm448_vm2, %v476_v29  ;;  %449 = vst.msk [vmem:[#allocation3] sm:$0xf] %vm448_vm2, %v446_v30 }
 0x2c1   : > { %v516_v31 = vpop.permute.xlu0 %515  ;;  %v458_v32 = vpop.permute.xlu1 %457 }
 0x2c2   : > { %519 = vst.msk [vmem:[#allocation2 + $0x10] sm:$0xf] %vm448_vm2, %v516_v31  ;;  %461 = vst.msk [vmem:[#allocation3 + $0x4] sm:$0xf] %vm448_vm2, %v458_v32 }
 0x2c5   : > { %v531_v33 = vpop.permute.xlu0 %530  ;;  %v491_v34 = vpop.permute.xlu1 %490  ;;  %v576_v35 = vld [vmem:[#allocation3] sm:$0xf]  ;;  %v578_v41 = vld [vmem:[#allocation3 + $0x8] sm:$0xf] }
 0x2c6   : > { %534 = vst.msk [vmem:[#allocation2 + $0x14] sm:$0xf] %vm448_vm2, %v531_v33  ;;  %494 = vst.msk [vmem:[#allocation3 + $0xc] sm:$0xf] %vm448_vm2, %v491_v34  ;;  %v597_v36 = vsel %vm592_vm3, %v576_v35, 0  ;;  %v689_v45 = vsel %vm592_vm3, %v578_v41, 0 }
 0x2c7   : > { %2069 = vmatpush3.bf16.xpose.msra.mxu1 %v597_v36 }
 0x2c8   : > { %2080 = vmatprep.subr.bf16.mxu1 %v2534_v8 }
 0x2c9   : > { %v546_v37 = vpop.permute.xlu0 %545  ;;  %v506_v38 = vpop.permute.xlu1 %505  ;;  %v577_v39 = vld [vmem:[#allocation3 + $0x4] sm:$0xf]  ;;  %v572_v61 = vld [vmem:[#allocation2 + $0x10] sm:$0xf] }
 0x2ca   : > { %549 = vst.msk [vmem:[#allocation2 + $0x18] sm:$0xf] %vm448_vm2, %v546_v37  ;;  %509 = vst.msk [vmem:[#allocation3 + $0x10] sm:$0xf] %vm448_vm2, %v506_v38  ;;  %v643_v40 = vsel %vm592_vm3, %v577_v39, 0 }
 0x2cb   : > { %2075 = vmatpush3.bf16.xpose.msra.mxu0 %v643_v40 }
 0x2cc   : > { %2086 = vmatprep.subr.bf16.mxu0 %v2534_v8 }
 0x2cd   : > { %v451_v42 = vpop.permute.xlu0 %450  ;;  %v521_v43 = vpop.permute.xlu1 %520  ;;  %v579_v48 = vld [vmem:[#allocation3 + $0xc] sm:$0xf]  ;;  %v573_v0 = vld [vmem:[#allocation2 + $0x14] sm:$0xf] }
 0x2ce   : > { %453 = vst.msk [vmem:[#allocation4] sm:$0xf] %vm448_vm2, %v451_v42  ;;  %524 = vst.msk [vmem:[#allocation3 + $0x14] sm:$0xf] %vm448_vm2, %v521_v43  ;;  %2071 = vmatmul.mubr.msk.bf16.vlgmr.msra.gmra.mxu1 %vm592_vm3, %v568_v44  ;;  %v735_v51 = vsel %vm592_vm3, %v579_v48, 0 }
 0x2cf   : > { %2081 = vmatpush3.bf16.xpose.msra.mxu1 %v689_v45  ;;  %2082 = vmatprep.mubr.msk.bf16.mxu1 %vm2535_vm1, %v2534_v8 }
 0x2d0   : > { %2092 = vmatprep.subr.bf16.mxu1 %v2534_v8 }
 0x2d1   : > { %v471_v46 = vpop.permute.xlu1 %470  ;;  %v580_v52 = vld [vmem:[#allocation3 + $0x10] sm:$0xf]  ;;  %v574_v4 = vld [vmem:[#allocation2 + $0x18] sm:$0xf] }
 0x2d2   : > { %474 = vst.msk [vmem:[#allocation2 + $0x4] sm:$0xf] %vm448_vm2, %v471_v46  ;;  %v781_v55 = vsel %vm592_vm3, %v580_v52, 0 }
 0x2d5   : > { %v486_v47 = vpop.permute.xlu1 %485  ;;  %v581_v56 = vld [vmem:[#allocation3 + $0x14] sm:$0xf]  ;;  %v584_v3 = vld [vmem:[#allocation4] sm:$0xf] }
 0x2d6   : > { %489 = vst.msk [vmem:[#allocation2 + $0x8] sm:$0xf] %vm448_vm2, %v486_v47  ;;  %v827_v59 = vsel %vm592_vm3, %v581_v56, 0  ;;  %v1063_v5 = vsel %vm1061_vm4, %v584_v3, 0 }
 0x2d9   : > { %v501_v49 = vpop.permute.xlu1 %500  ;;  %v569_v50 = vld [vmem:[#allocation2 + $0x4] sm:$0xf] }
 0x2da   : > { %504 = vst.msk [vmem:[#allocation2 + $0xc] sm:$0xf] %vm448_vm2, %v501_v49  ;;  %2077 = vmatmul.mubr.msk.bf16.vlgmr.msra.gmra.mxu0 %vm592_vm3, %v569_v50 }
 0x2db   : > { %2087 = vmatpush3.bf16.xpose.msra.mxu0 %v735_v51  ;;  %2088 = vmatprep.mubr.msk.bf16.mxu0 %vm2535_vm1, %v2534_v8 }
 0x2dc   : > { %2098 = vmatprep.subr.bf16.mxu0 %v2534_v8 }
 0x2dd   : > { %v536_v53 = vpop.permute.xlu1 %535  ;;  %v570_v54 = vld [vmem:[#allocation2 + $0x8] sm:$0xf] }
 0x2de   : > { %539 = vst.msk [vmem:[#allocation3 + $0x18] sm:$0xf] %vm448_vm2, %v536_v53  ;;  %2083 = vmatmul.mubr.msk.bf16.vlgmr.msra.gmra.mxu1 %vm592_vm3, %v570_v54 }
 0x2df   : > { %2093 = vmatpush3.bf16.xpose.msra.mxu1 %v781_v55  ;;  %2094 = vmatprep.mubr.msk.bf16.mxu1 %vm2535_vm1, %v2534_v8 }
 0x2e0   : > { %2104 = vmatprep.subr.bf16.mxu1 %v2534_v8 }
 0x2e1   : > { %v551_v57 = vpop.permute.xlu1 %550  ;;  %v571_v58 = vld [vmem:[#allocation2 + $0xc] sm:$0xf] }
 0x2e2   : > { %554 = vst.msk [vmem:[#allocation3 + $0x1c] sm:$0xf] %vm448_vm2, %v551_v57  ;;  %2089 = vmatmul.mubr.msk.bf16.vlgmr.msra.gmra.mxu0 %vm592_vm3, %v571_v58 }
 0x2e3   : > { %2099 = vmatpush3.bf16.xpose.msra.mxu0 %v827_v59  ;;  %2100 = vmatprep.mubr.msk.bf16.mxu0 %vm2535_vm1, %v2534_v8 }
 0x2e4   : > { %2110 = vmatprep.subr.bf16.mxu0 %v2534_v8 }
 0x2e5   : > { %v561_v60 = vpop.permute.xlu1 %560  ;;  %v582_v62 = vld [vmem:[#allocation3 + $0x18] sm:$0xf] }
 0x2e6   : > { %564 = vst.msk [vmem:[#allocation2 + $0x1c] sm:$0xf] %vm448_vm2, %v561_v60  ;;  %2095 = vmatmul.mubr.msk.bf16.vlgmr.msra.gmra.mxu1 %vm592_vm3, %v572_v61  ;;  %v873_v63 = vsel %vm592_vm3, %v582_v62, 0 }
 0x2e7   : > { %2105 = vmatpush3.bf16.xpose.msra.mxu1 %v873_v63  ;;  %2106 = vmatprep.mubr.msk.bf16.mxu1 %vm2535_vm1, %v2534_v8 }
 0x2e8   : > { %2116 = vmatprep.subr.bf16.mxu1 %v2534_v8 }
 0x2e9   : > { %v583_v1 = vld [vmem:[#allocation3 + $0x1c] sm:$0xf] }
 0x2ea   : > { %2101 = vmatmul.mubr.msk.bf16.vlgmr.msra.gmra.mxu0 %vm592_vm3, %v573_v0  ;;  %v919_v2 = vsel %vm592_vm3, %v583_v1, 0 }
 0x2eb   : > { %2111 = vmatpush3.bf16.xpose.msra.mxu0 %v919_v2  ;;  %2112 = vmatprep.mubr.msk.bf16.mxu0 %vm2535_vm1, %v2534_v8 }
 0x2ec   : > { %2122 = vmatprep.subr.bf16.mxu0 %v2534_v8 }
 0x2ed   : > { %v575_v6 = vld [vmem:[#allocation2 + $0x1c] sm:$0xf] }
 0x2ee   : > { %2107 = vmatmul.mubr.msk.bf16.vlgmr.msra.gmra.mxu1 %vm592_vm3, %v574_v4 }
 0x2ef   : > { %2117 = vmatpush3.bf16.msra.mxu1 %v1063_v5  ;;  %2118 = vmatprep.mubr.msk.bf16.mxu1 %vm2535_vm1, %v2534_v8 }
 0x2f0   : > { %2128 = vmatprep.subr.bf16.mxu1 %v2534_v8 }
 0x2f2   : > { %2113 = vmatmul.mubr.msk.bf16.vlgmr.msra.gmra.mxu0 %vm592_vm3, %v575_v6 }
 0x2f3   : > { %2124 = vmatprep.mubr.msk.bf16.mxu0 %vm2535_vm1, %v2534_v8 }
 0x38e   : > { %v633_v7 = vpop.f32.mrf.mxu1 }
 0x38f   : > { %v962_v9 = vsel %vm961_vm5, %v633_v7, -inf }
 0x390   : > { %963 = vmax.xlane.f32.xlu0 %v962_v9  ;;  %v2072_v10 = vpop.f32.mrf.mxu1 }
 0x392   : > { %v636_v11 = vpop.f32.mrf.mxu1 }
 0x394   : > { %v2073_v12 = vpop.f32.mrf.mxu1 }
 0x39a   : > { %v679_v13 = vpop.f32.mrf.mxu0 }
 0x39b   : > { %v965_v14 = vsel %vm961_vm5, %v679_v13, -inf }
 0x39c   : > { %966 = vmax.xlane.f32.xlu1 %v965_v14  ;;  %v2078_v15 = vpop.f32.mrf.mxu0 }
 0x39e   : > { %v682_v16 = vpop.f32.mrf.mxu0  ;;  %v725_v17 = vpop.f32.mrf.mxu1 }
 0x39f   : > { %v968_v18 = vsel %vm961_vm5, %v725_v17, -inf }
 0x3a0   : > { %969 = vmax.xlane.f32.xlu0 %v968_v18  ;;  %v2079_v19 = vpop.f32.mrf.mxu0  ;;  %v2084_v20 = vpop.f32.mrf.mxu1 }
 0x3a2   : > { %v728_v21 = vpop.f32.mrf.mxu1  ;;  %v2834_v22 = vpop.f32.mrf.mxu0 }
 0x3a3   : > { %v971_v23 = vsel %vm961_vm5, %v2834_v22, -inf }
 0x3a4   : > { %v2085_v25 = vpop.f32.mrf.mxu1  ;;  %972 = vmax.xlane.f32.xlu0 %v971_v23  ;;  %v2090_v26 = vpop.f32.mrf.mxu0 }
 0x3a6   : > { %v774_v27 = vpop.f32.mrf.mxu0  ;;  %v817_v28 = vpop.f32.mrf.mxu1 }
 0x3a7   : > { %v974_v29 = vsel %vm961_vm5, %v817_v28, -inf }
 0x3a8   : > { %v2096_v30 = vpop.f32.mrf.mxu1  ;;  %975 = vmax.xlane.f32.xlu1 %v974_v29  ;;  %v2091_v31 = vpop.f32.mrf.mxu0 }
 0x3aa   : > { %v820_v32 = vpop.f32.mrf.mxu1  ;;  %v863_v33 = vpop.f32.mrf.mxu0 }
 0x3ab   : > { %v977_v34 = vsel %vm961_vm5, %v863_v33, -inf }
 0x3ac   : > { %v2097_v35 = vpop.f32.mrf.mxu1  ;;  %978 = vmax.xlane.f32.xlu0 %v977_v34  ;;  %v2102_v36 = vpop.f32.mrf.mxu0 }
 0x3ae   : > { %v866_v37 = vpop.f32.mrf.mxu0  ;;  %v2840_v38 = vpop.f32.mrf.mxu1 }
 0x3af   : > { %v980_v48 = vsel %vm961_vm5, %v2840_v38, -inf }
 0x3b0   : > { %v2103_v39 = vpop.f32.mrf.mxu0  ;;  %v2108_v40 = vpop.f32.mrf.mxu1 }
 0x3b2   : > { %v912_v41 = vpop.f32.mrf.mxu1  ;;  %v955_v42 = vpop.f32.mrf.mxu0 }
 0x3b3   : > { %v983_v43 = vsel %vm961_vm5, %v955_v42, -inf }
 0x3b4   : > { %v2109_v44 = vpop.f32.mrf.mxu1  ;;  %984 = vmax.xlane.f32.xlu0 %v983_v43  ;;  %v2114_v45 = vpop.f32.mrf.mxu0 }
 0x3b6   : > { %v958_v46 = vpop.f32.mrf.mxu0 }
 0x3b8   : > { %v2115_v47 = vpop.f32.mrf.mxu0 }
 0x3b9   : > { %462 = vrot.lane.b32.xlu1 %v2761_v24, %s2552_s16 }
 0x3ca   : > { %495 = vrot.lane.b32.xlu0 %v2761_v24, %s2553_s20  ;;  %s1853_s20 = scalar_lea.hbm %s3035_s7, %s2004_s14 }
 0x3dd   : > { %981 = vmax.xlane.f32.xlu1 %v980_v48 }
 0x3ee   : > { %480 = vrot.lane.b32.xlu1 %v2761_v24, %s2554_s23  ;;  %s1841_s23 = scalar_lea.sflag [#allocation7], %s2722_s22 }
 0x3f2   : > { %510 = vrot.lane.b32.xlu1 %v2761_v24, %s2555_s8  ;;  %s2441_s8 = scalar_lea.vmem %s1856_s17, 128 }
 0x3f3   : > { %p2442_p8 = scmp.ne.s32.totalorder %s1856_s17, %s2441_s8 }
 0x3f5   : > { %p2443_p9 = pnand %p2442_p8, %p2695_p7 }
 0x3f7   : > { %p2444_p11 = pneg %p2443_p9 }
 0x419   : > { %v964_v49 = vpop.xlane.xlu0 %963 }
 0x41a   : > { %v986_v50 = vsub.f32 %v633_v7, %v964_v49 }
 0x41c   : > { %v994_v51 = vmul.f32 1.442695, %v986_v50 }
 0x41e   : > { %2328 = vpow2.f32 %v994_v51 }
 0x425   : > { %v967_v52 = vpop.xlane.xlu1 %966 }
 0x426   : > { %v987_v53 = vsub.f32 %v679_v13, %v967_v52 }
 0x428   : > { %v996_v54 = vmul.f32 1.442695, %v987_v53 }
 0x429   : > { %v970_v55 = vpop.xlane.xlu0 %969 }
 0x42a   : > { %2330 = vpow2.f32 %v996_v54  ;;  %v988_v56 = vsub.f32 %v725_v17, %v970_v55 }
 0x42b   : > { %v2849_v57 = vpop.eup %2328 }
 0x42c   : > { %v998_v58 = vmul.f32 1.442695, %v988_v56  ;;  %v1010_v59 = vsel %vm961_vm5, %v2849_v57, 0.0 }
 0x42d   : > { %1011 = vadd.xlane.f32.xlu1 %v1010_v59  ;;  %v973_v60 = vpop.xlane.xlu0 %972 }
 0x42e   : > { %2332 = vpow2.f32 %v998_v58  ;;  %v989_v21 = vsub.f32 %v2834_v22, %v973_v60 }
 0x430   : > { %v1000_v23 = vmul.f32 1.442695, %v989_v21 }
 0x431   : > { %v976_v61 = vpop.xlane.xlu1 %975 }
 0x432   : > { %v990_v62 = vsub.f32 %v817_v28, %v976_v61 }
 0x434   : > { %v1002_v63 = vmul.f32 1.442695, %v990_v62 }
 0x435   : > { %v463_v0 = vpop.permute.xlu1 %462  ;;  %v979_v1 = vpop.xlane.xlu0 %978 }
 0x436   : > { %2334 = vpow2.f32 %v1002_v63  ;;  %466 = vst.msk [vmem:[#allocation4 + $0x4] sm:$0xf] %vm448_vm2, %v463_v0  ;;  %v991_v2 = vsub.f32 %v863_v33, %v979_v1 }
 0x437   : > { %v2854_v3 = vpop.eup %2330 }
 0x438   : > { %v1004_v4 = vmul.f32 1.442695, %v991_v2  ;;  %v1013_v5 = vsel %vm961_vm5, %v2854_v3, 0.0 }
 0x439   : > { %1014 = vadd.xlane.f32.xlu0 %v1013_v5 }
 0x43a   : > { %2336 = vpow2.f32 %v1004_v4 }
 0x43b   : > { %v2858_v6 = vpop.eup %2332 }
 0x43c   : > { %v1016_v7 = vsel %vm961_vm5, %v2858_v6, 0.0 }
 0x43d   : > { %1017 = vadd.xlane.f32.xlu1 %v1016_v7  ;;  %v985_v9 = vpop.xlane.xlu0 %984  ;;  %v585_v10 = vld [vmem:[#allocation4 + $0x4] sm:$0xf] }
 0x43e   : > { %v993_v11 = vsub.f32 %v955_v42, %v985_v9  ;;  %v1109_v12 = vsel %vm1061_vm4, %v585_v10, 0 }
 0x43f   : > { %2123 = vmatpush3.bf16.msra.mxu0 %v1109_v12 }
 0x440   : > { %v1008_v13 = vmul.f32 1.442695, %v993_v11  ;;  %2134 = vmatprep.subr.bf16.mxu0 %v2534_v8  ;;  %v1435_v11 = vld [vmem:[#allocation10] sm:$0x3] }
 0x441   : > { %v496_v14 = vpop.permute.xlu0 %495 }
 0x442   : > { %2338 = vpow2.f32 %v1008_v13  ;;  %499 = vst.msk [vmem:[#allocation4 + $0xc] sm:$0xf] %vm448_vm2, %v496_v14 }
 0x443   : > { %v2865_v15 = vpop.eup %2334  ;;  %2340 = vpow2.f32 %v1000_v23 }
 0x444   : > { %v1022_v16 = vsel %vm961_vm5, %v2865_v15, 0.0 }
 0x445   : > { %1023 = vadd.xlane.f32.xlu1 %v1022_v16  ;;  %v1448_v16 = vsel %vm1446_vm6, %v1435_v11, 0 }
 0x447   : > { %v2869_v17 = vpop.eup %2336 }
 0x448   : > { %v1025_v18 = vsel %vm961_vm5, %v2869_v17, 0.0 }
 0x449   : > { %1026 = vadd.xlane.f32.xlu1 %v1025_v18  ;;  %v587_v44 = vld [vmem:[#allocation4 + $0xc] sm:$0xf] }
 0x44a   : > { %v1201_v47 = vsel %vm1061_vm4, %v587_v44, 0 }
 0x44f   : > { %v2873_v19 = vpop.eup %2338  ;;  %525 = vrot.lane.b32.xlu0 %v2761_v24, %s2556_s3  ;;  %s2447_s3 = scalar_lea.vmem %s2446_s18, 256 }
 0x450   : > { %v1031_v20 = vsel %vm961_vm5, %v2873_v19, 0.0  ;;  %v2881_v28 = vpop.eup %2340  ;;  %p2449_p13 = scmp.lt.s32.totalorder %s2447_s3, %s2441_s8 }
 0x451   : > { %1032 = vadd.xlane.f32.xlu1 %v1031_v20  ;;  %v1019_v30 = vsel %vm961_vm5, %v2881_v28, 0.0 }
 0x452   : > { %p2450_p0 = por %p2449_p13, %p2448_p2 }
 0x454   : > { %p2451_p5 = pnand %p2450_p0, %p2444_p11 }
 0x462   : > { %555 = vrot.lane.b32.xlu1 %v2761_v24, %s2557_s5 }
 0x466   : > { %v982_v25 = vpop.xlane.xlu1 %981 }
 0x467   : > { %v992_v26 = vsub.f32 %v2840_v38, %v982_v25 }
 0x469   : > { %v1006_v27 = vmul.f32 1.442695, %v992_v26 }
 0x46a   : > { %v481_v29 = vpop.permute.xlu1 %480 }
 0x46b   : > { %2342 = vpow2.f32 %v1006_v27  ;;  %484 = vst.msk [vmem:[#allocation4 + $0x8] sm:$0xf] %vm448_vm2, %v481_v29  ;;  %v1438_v29 = vld [vmem:[#allocation10 + $0x6] sm:$0x3] }
 0x46e   : > { %v511_v31 = vpop.permute.xlu1 %510  ;;  %1020 = vadd.xlane.f32.xlu0 %v1019_v30 }
 0x46f   : > { %514 = vst.msk [vmem:[#allocation4 + $0x10] sm:$0xf] %vm448_vm2, %v511_v31 }
 0x472   : > { %v586_v39 = vld [vmem:[#allocation4 + $0x8] sm:$0xf] }
 0x473   : > { %v1155_v41 = vsel %vm1061_vm4, %v586_v39, 0 }
 0x476   : > { %v588_v50 = vld [vmem:[#allocation4 + $0x10] sm:$0xf] }
 0x477   : > { %v1247_v52 = vsel %vm1061_vm4, %v588_v50, 0 }
 0x478   : > { %v2887_v22 = vpop.eup %2342 }
 0x479   : > { %v1028_v32 = vsel %vm961_vm5, %v2887_v22, 0.0 }
 0x47a   : > { %1029 = vadd.xlane.f32.xlu0 %v1028_v32 }
 0x490   : > { %540 = vrot.lane.b32.xlu0 %v2761_v24, %s2558_s9 }
 0x4b6   : > { %v1012_v33 = vpop.xlane.xlu1 %1011 }
 0x4b7   : > { %2344 = vrcp.f32 %v1012_v33  ;;  %v1439_v33 = vld [vmem:[#allocation10 + $0x8] sm:$0x3] }
 0x4c2   : > { %v1015_v34 = vpop.xlane.xlu0 %1014 }
 0x4c3   : > { %2346 = vrcp.f32 %v1015_v34 }
 0x4c4   : > { %v2345_v35 = vpop.eup %2344 }
 0x4c5   : > { %v1042_v36 = vmul.f32 %v2345_v35, %v2849_v57 }
 0x4c6   : > { %v1018_v37 = vpop.xlane.xlu1 %1017  ;;  %v526_v38 = vpop.permute.xlu0 %525 }
 0x4c7   : > { %2348 = vrcp.f32 %v1018_v37  ;;  %529 = vst.msk [vmem:[#allocation4 + $0x14] sm:$0xf] %vm448_vm2, %v526_v38  ;;  %v1050_v40 = vpack.c.bf16 %v1042_v36, %v1042_v36  ;;  %v1632_v37 = vsel %vm1446_vm6, %v1439_v33, 0 }
 0x4c9   : > { %2119 = vmatmul.mubr.msk.bf16.vlgmr.msra.gmra.mxu1 %vm961_vm5, %v1050_v40 }
 0x4ca   : > { %2129 = vmatpush3.bf16.msra.mxu1 %v1155_v41  ;;  %2130 = vmatprep.mubr.msk.bf16.mxu1 %vm2535_vm1, %v2534_v8 }
 0x4cb   : > { %2140 = vmatprep.subr.bf16.mxu1 %v2534_v8 }
 0x4ce   : > { %v1024_v24 = vpop.xlane.xlu1 %1023  ;;  %v589_v63 = vld [vmem:[#allocation4 + $0x14] sm:$0xf] }
 0x4cf   : > { %2350 = vrcp.f32 %v1024_v24  ;;  %v1293_v2 = vsel %vm1061_vm4, %v589_v63, 0  ;;  %v1441_v24 = vld [vmem:[#allocation10 + $0xc] sm:$0x3] }
 0x4d0   : > { %v2347_v42 = vpop.eup %2346  ;;  %v1724_v44 = vsel %vm1446_vm6, %v1441_v24, 0 }
 0x4d1   : > { %v1043_v43 = vmul.f32 %v2347_v42, %v2854_v3 }
 0x4d2   : > { %v1027_v49 = vpop.xlane.xlu1 %1026 }
 0x4d3   : > { %v1051_v45 = vpack.c.bf16 %v1043_v43, %v1043_v43 }
 0x4d4   : > { %v2349_v46 = vpop.eup %2348 }
 0x4d5   : > { %2125 = vmatmul.mubr.msk.bf16.vlgmr.msra.gmra.mxu0 %vm961_vm5, %v1051_v45  ;;  %v1044_v48 = vmul.f32 %v2349_v46, %v2858_v6 }
 0x4d6   : > { %2135 = vmatpush3.bf16.msra.mxu0 %v1201_v47  ;;  %2136 = vmatprep.mubr.msk.bf16.mxu0 %vm2535_vm1, %v2534_v8 }
 0x4d7   : > { %v1052_v51 = vpack.c.bf16 %v1044_v48, %v1044_v48  ;;  %2146 = vmatprep.subr.bf16.mxu0 %v2534_v8  ;;  %v1440_v48 = vld [vmem:[#allocation10 + $0xa] sm:$0x3] }
 0x4d9   : > { %2131 = vmatmul.mubr.msk.bf16.vlgmr.msra.gmra.mxu1 %vm961_vm5, %v1052_v51  ;;  %v1678_v51 = vsel %vm1446_vm6, %v1440_v48, 0 }
 0x4da   : > { %2141 = vmatpush3.bf16.msra.mxu1 %v1247_v52  ;;  %v1033_v53 = vpop.xlane.xlu1 %1032  ;;  %2142 = vmatprep.mubr.msk.bf16.mxu1 %vm2535_vm1, %v2534_v8 }
 0x4db   : > { %2152 = vmatprep.subr.bf16.mxu1 %v2534_v8 }
 0x4dc   : > { %v2351_v54 = vpop.eup %2350 }
 0x4dd   : > { %v1046_v55 = vmul.f32 %v2351_v54, %v2865_v15 }
 0x4de   : > { %v556_v56 = vpop.permute.xlu1 %555 }
 0x4df   : > { %559 = vst.msk [vmem:[#allocation4 + $0x1c] sm:$0xf] %vm448_vm2, %v556_v56  ;;  %v1054_v57 = vpack.c.bf16 %v1046_v55, %v1046_v55  ;;  %v1442_v55 = vld [vmem:[#allocation10 + $0xe] sm:$0x3] }
 0x4e1   : > { %2143 = vmatmul.mubr.msk.bf16.vlgmr.msra.gmra.mxu1 %vm961_vm5, %v1054_v57 }
 0x4e2   : > { %2154 = vmatprep.mubr.msk.bf16.mxu1 %vm2535_vm1, %v2534_v8 }
 0x4e6   : > { %v591_v5 = vld [vmem:[#allocation4 + $0x1c] sm:$0xf] }
 0x4e7   : > { %v1385_v12 = vsel %vm1061_vm4, %v591_v5, 0 }
 0x4f7   : > { %v1021_v58 = vpop.xlane.xlu0 %1020 }
 0x4f8   : > { %2352 = vrcp.f32 %v1021_v58  ;;  %v1770_v58 = vsel %vm1446_vm6, %v1442_v55, 0 }
 0x4f9   : > { %2354 = vrcp.f32 %v1027_v49 }
 0x4fa   : > { %2356 = vrcp.f32 %v1033_v53 }
 0x503   : > { %v1030_v59 = vpop.xlane.xlu0 %1029 }
 0x504   : > { %2358 = vrcp.f32 %v1030_v59 }
 0x505   : > { %v2353_v60 = vpop.eup %2352 }
 0x506   : > { %v1045_v61 = vmul.f32 %v2353_v60, %v2881_v28  ;;  %v2355_v1 = vpop.eup %2354 }
 0x507   : > { %v541_v62 = vpop.permute.xlu0 %540  ;;  %v1047_v3 = vmul.f32 %v2355_v1, %v2869_v17  ;;  %v2357_v6 = vpop.eup %2356  ;;  %v1436_v17 = vld [vmem:[#allocation10 + $0x2] sm:$0x3] }
 0x508   : > { %544 = vst.msk [vmem:[#allocation4 + $0x18] sm:$0xf] %vm448_vm2, %v541_v62  ;;  %v1053_v0 = vpack.c.bf16 %v1045_v61, %v1045_v61  ;;  %v1049_v15 = vmul.f32 %v2357_v6, %v2873_v19  ;;  %v1494_v20 = vsel %vm1446_vm6, %v1436_v17, 0  ;;  %v1437_v19 = vld [vmem:[#allocation10 + $0x4] sm:$0x3] }
 0x509   : > { %v1055_v9 = vpack.c.bf16 %v1047_v3, %v1047_v3  ;;  %v1540_v25 = vsel %vm1446_vm6, %v1437_v19, 0 }
 0x50a   : > { %2137 = vmatmul.mubr.msk.bf16.vlgmr.msra.gmra.mxu0 %vm961_vm5, %v1053_v0  ;;  %v1057_v18 = vpack.c.bf16 %v1049_v15, %v1049_v15 }
 0x50b   : > { %2147 = vmatpush3.bf16.msra.mxu0 %v1293_v2  ;;  %2148 = vmatprep.mubr.msk.bf16.mxu0 %vm2535_vm1, %v2534_v8 }
 0x50c   : > { %2158 = vmatprep.subr.bf16.mxu0 %v2534_v8 }
 0x50f   : > { %v590_v4 = vld [vmem:[#allocation4 + $0x18] sm:$0xf] }
 0x510   : > { %v1339_v7 = vsel %vm1061_vm4, %v590_v4, 0 }
 0x511   : > { %v2359_v10 = vpop.eup %2358  ;;  %2153 = vmatpush3.bf16.msra.mxu1 %v1339_v7 }
 0x512   : > { %2149 = vmatmul.mubr.msk.bf16.vlgmr.msra.gmra.mxu0 %vm961_vm5, %v1055_v9  ;;  %v1048_v13 = vmul.f32 %v2359_v10, %v2887_v22  ;;  %2164 = vmatprep.subr.bf16.mxu1 %v2534_v8  ;;  %v1586_v22 = vsel %vm1446_vm6, %v1438_v29, 0 }
 0x513   : > { %2159 = vmatpush3.bf16.msra.mxu0 %v1385_v12  ;;  %2160 = vmatprep.mubr.msk.bf16.mxu0 %vm2535_vm1, %v2534_v8 }
 0x514   : > { %v1056_v14 = vpack.c.bf16 %v1048_v13, %v1048_v13  ;;  %2170 = vmatprep.subr.bf16.mxu0 %v2534_v8 }
 0x516   : > { %2155 = vmatmul.mubr.msk.bf16.vlgmr.msra.gmra.mxu1 %vm961_vm5, %v1056_v14 }
 0x517   : > { %2165 = vmatpush3.bf16.msra.mxu1 %v1448_v16  ;;  %2166 = vmatprep.mubr.msk.bf16.mxu1 %vm2535_vm1, %v2534_v8 }
 0x518   : > { %2176 = vmatprep.subr.bf16.mxu1 %v2534_v8 }
 0x51a   : > { %2161 = vmatmul.mubr.msk.bf16.vlgmr.msra.gmra.mxu0 %vm961_vm5, %v1057_v18 }
 0x51b   : > { %2171 = vmatpush3.bf16.msra.mxu0 %v1494_v20  ;;  %2172 = vmatprep.mubr.msk.bf16.mxu0 %vm2535_vm1, %v2534_v8 }
 0x51c   : > { %2182 = vmatprep.subr.bf16.mxu0 %v2534_v8 }
 0x589   : > { %v1099_v21 = vpop.f32.mrf.mxu1 }
 0x58a   : > { %v1427_v23 = vpack.c.bf16 %v1099_v21, %v1099_v21 }
 0x58b   : > { %v2120_v26 = vpop.f32.mrf.mxu1 }
 0x58c   : > { %2167 = vmatmul.mubr.msk.bf16.vlgmr.msra.gmra.mxu1 %vm592_vm3, %v1427_v23 }
 0x58d   : > { %v1102_v27 = vpop.f32.mrf.mxu1  ;;  %2177 = vmatpush3.bf16.msra.mxu1 %v1540_v25  ;;  %2178 = vmatprep.mubr.msk.bf16.mxu1 %vm2535_vm1, %v2534_v8 }
 0x58e   : > { %2188 = vmatprep.subr.bf16.mxu1 %v2534_v8 }
 0x58f   : > { %v2121_v28 = vpop.f32.mrf.mxu1 }
 0x595   : > { %v1145_v30 = vpop.f32.mrf.mxu0 }
 0x596   : > { %v1428_v31 = vpack.c.bf16 %v1145_v30, %v1145_v30 }
 0x597   : > { %v2126_v32 = vpop.f32.mrf.mxu0 }
 0x598   : > { %2173 = vmatmul.mubr.msk.bf16.vlgmr.msra.gmra.mxu0 %vm592_vm3, %v1428_v31 }
 0x599   : > { %v1148_v34 = vpop.f32.mrf.mxu0  ;;  %v1191_v35 = vpop.f32.mrf.mxu1  ;;  %2183 = vmatpush3.bf16.msra.mxu0 %v1586_v22  ;;  %2184 = vmatprep.mubr.msk.bf16.mxu0 %vm2535_vm1, %v2534_v8 }
 0x59a   : > { %v1429_v36 = vpack.c.bf16 %v1191_v35, %v1191_v35  ;;  %2194 = vmatprep.subr.bf16.mxu0 %v2534_v8 }
 0x59b   : > { %v2127_v38 = vpop.f32.mrf.mxu0  ;;  %v2132_v39 = vpop.f32.mrf.mxu1 }
 0x59c   : > { %2179 = vmatmul.mubr.msk.bf16.vlgmr.msra.gmra.mxu1 %vm592_vm3, %v1429_v36 }
 0x59d   : > { %v1194_v40 = vpop.f32.mrf.mxu1  ;;  %2189 = vmatpush3.bf16.msra.mxu1 %v1632_v37  ;;  %2190 = vmatprep.mubr.msk.bf16.mxu1 %vm2535_vm1, %v2534_v8 }
 0x59e   : > { %2200 = vmatprep.subr.bf16.mxu1 %v2534_v8 }
 0x59f   : > { %v2133_v41 = vpop.f32.mrf.mxu1 }
 0x5a1   : > { %v1283_v42 = vpop.f32.mrf.mxu1 }
 0x5a2   : > { %v1431_v43 = vpack.c.bf16 %v1283_v42, %v1283_v42 }
 0x5a3   : > { %v2144_v45 = vpop.f32.mrf.mxu1 }
 0x5a4   : > { %2191 = vmatmul.mubr.msk.bf16.vlgmr.msra.gmra.mxu1 %vm592_vm3, %v1431_v43 }
 0x5a5   : > { %v1286_v46 = vpop.f32.mrf.mxu1  ;;  %2201 = vmatpush3.bf16.msra.mxu1 %v1724_v44  ;;  %2202 = vmatprep.mubr.msk.bf16.mxu1 %vm2535_vm1, %v2534_v8 }
 0x5a7   : > { %v2145_v47 = vpop.f32.mrf.mxu1 }
 0x5ca   : > { %v1237_v49 = vpop.f32.mrf.mxu0 }
 0x5cb   : > { %v1430_v50 = vpack.c.bf16 %v1237_v49, %v1237_v49 }
 0x5cc   : > { %v2138_v52 = vpop.f32.mrf.mxu0 }
 0x5cd   : > { %2185 = vmatmul.mubr.msk.bf16.vlgmr.msra.gmra.mxu0 %vm592_vm3, %v1430_v50  ;;  %v2002_v50 = vld [vmem:[%s3034_s6] ss:$0 sm:$0xff] }
 0x5ce   : > { %v1240_v53 = vpop.f32.mrf.mxu0  ;;  %2195 = vmatpush3.bf16.msra.mxu0 %v1678_v51  ;;  %2196 = vmatprep.mubr.msk.bf16.mxu0 %vm2535_vm1, %v2534_v8 }
 0x5cf   : > { %2206 = vmatprep.subr.bf16.mxu0 %v2534_v8 }
 0x5d0   : > { %v2139_v54 = vpop.f32.mrf.mxu0 }
 0x5d2   : > { %v1329_v56 = vpop.f32.mrf.mxu0 }
 0x5d3   : > { %v1432_v57 = vpack.c.bf16 %v1329_v56, %v1329_v56  ;;  %v2360_v56 = vld [vmem:[%s2728_s19] sm:$0xff] }
 0x5d4   : > { %v2150_v59 = vpop.f32.mrf.mxu0 }
 0x5d5   : > { %2197 = vmatmul.mubr.msk.bf16.vlgmr.msra.gmra.mxu0 %vm592_vm3, %v1432_v57 }
 0x5d6   : > { %v1332_v60 = vpop.f32.mrf.mxu0  ;;  %v1375_v61 = vpop.f32.mrf.mxu1  ;;  %2207 = vmatpush3.bf16.msra.mxu0 %v1770_v58  ;;  %2208 = vmatprep.mubr.msk.bf16.mxu0 %vm2535_vm1, %v2534_v8 }
 0x5d7   : > { %v1433_v62 = vpack.c.bf16 %v1375_v61, %v1375_v61 }
 0x5d8   : > { %v2151_v63 = vpop.f32.mrf.mxu0  ;;  %v2156_v0 = vpop.f32.mrf.mxu1 }
 0x5d9   : > { %2203 = vmatmul.mubr.msk.bf16.vlgmr.msra.gmra.mxu1 %vm592_vm3, %v1433_v62 }
 0x5da   : > { %v1378_v1 = vpop.f32.mrf.mxu1  ;;  %v1421_v2 = vpop.f32.mrf.mxu0 }
 0x5db   : > { %v1434_v3 = vpack.c.bf16 %v1421_v2, %v1421_v2 }
 0x5dc   : > { %v2157_v4 = vpop.f32.mrf.mxu1  ;;  %v2162_v5 = vpop.f32.mrf.mxu0 }
 0x5dd   : > { %2209 = vmatmul.mubr.msk.bf16.vlgmr.msra.gmra.mxu0 %vm592_vm3, %v1434_v3 }
 0x5de   : > { %v1424_v6 = vpop.f32.mrf.mxu0 }
 0x5e0   : > { %v2163_v7 = vpop.f32.mrf.mxu0 }
 0x64c   : > { %v1484_v9 = vpop.f32.mrf.mxu1 }
 0x64d   : > { %v1813_v29 = vsel %vm343_vm0, %v1484_v9, 0.0 }
 0x64e   : > { %v2168_v10 = vpop.f32.mrf.mxu1 }
 0x650   : > { %v1487_v11 = vpop.f32.mrf.mxu1 }
 0x652   : > { %v2169_v12 = vpop.f32.mrf.mxu1 }
 0x658   : > { %v1530_v13 = vpop.f32.mrf.mxu0 }
 0x659   : > { %v1814_v27 = vsel %vm343_vm0, %v1530_v13, 0.0 }
 0x65a   : > { %v2174_v8 = vpop.f32.mrf.mxu0  ;;  %v1815_v31 = vadd.f32 %v1814_v27, %v1813_v29 }
 0x65c   : > { %v1533_v14 = vpop.f32.mrf.mxu0  ;;  %v1576_v15 = vpop.f32.mrf.mxu1 }
 0x65d   : > { %v1816_v30 = vsel %vm343_vm0, %v1576_v15, 0.0 }
 0x65e   : > { %v2175_v16 = vpop.f32.mrf.mxu0  ;;  %v2180_v17 = vpop.f32.mrf.mxu1  ;;  %v1817_v33 = vadd.f32 %v1816_v30, %v1815_v31 }
 0x660   : > { %v1579_v18 = vpop.f32.mrf.mxu1 }
 0x662   : > { %v2181_v20 = vpop.f32.mrf.mxu1 }
 0x664   : > { %v1668_v19 = vpop.f32.mrf.mxu1 }
 0x665   : > { %v1820_v38 = vsel %vm343_vm0, %v1668_v19, 0.0 }
 0x666   : > { %v2192_v21 = vpop.f32.mrf.mxu1 }
 0x668   : > { %v1671_v23 = vpop.f32.mrf.mxu1 }
 0x66a   : > { %v2193_v25 = vpop.f32.mrf.mxu1 }
 0x68d   : > { %v1622_v26 = vpop.f32.mrf.mxu0 }
 0x68e   : > { %v1818_v32 = vsel %vm343_vm0, %v1622_v26, 0.0 }
 0x68f   : > { %v2186_v28 = vpop.f32.mrf.mxu0  ;;  %v1819_v35 = vadd.f32 %v1818_v32, %v1817_v33 }
 0x691   : > { %v1625_v22 = vpop.f32.mrf.mxu0  ;;  %v1821_v40 = vadd.f32 %v1820_v38, %v1819_v35 }
 0x693   : > { %v2187_v34 = vpop.f32.mrf.mxu0 }
 0x695   : > { %v1714_v36 = vpop.f32.mrf.mxu0 }
 0x696   : > { %v1822_v39 = vsel %vm343_vm0, %v1714_v36, 0.0 }
 0x697   : > { %v2198_v37 = vpop.f32.mrf.mxu0  ;;  %v1823_v43 = vadd.f32 %v1822_v39, %v1821_v40 }
 0x699   : > { %v1717_v41 = vpop.f32.mrf.mxu0  ;;  %v1760_v24 = vpop.f32.mrf.mxu1 }
 0x69a   : > { %v1824_v42 = vsel %vm343_vm0, %v1760_v24, 0.0 }
 0x69b   : > { %v2199_v44 = vpop.f32.mrf.mxu0  ;;  %v2204_v45 = vpop.f32.mrf.mxu1  ;;  %v1825_v46 = vadd.f32 %v1824_v42, %v1823_v43 }
 0x69d   : > { %v1763_v47 = vpop.f32.mrf.mxu1  ;;  %v1806_v48 = vpop.f32.mrf.mxu0 }
 0x69e   : > { %v1826_v49 = vsel %vm343_vm0, %v1806_v48, 0.0 }
 0x69f   : > { %v1827_v51 = vadd.f32 %v1826_v49, %v1825_v46  ;;  %v2205_v52 = vpop.f32.mrf.mxu1  ;;  %v2210_v53 = vpop.f32.mrf.mxu0 }
 0x6a1   : > { %v1835_v54 = vadd.f32 %v2002_v50, %v1827_v51  ;;  %v1809_v55 = vpop.f32.mrf.mxu0 }
 0x6a3   : > { %v1838_v57 = vadd.f32 %v2360_v56, %v1835_v54  ;;  %v2211_v58 = vpop.f32.mrf.mxu0 }
 0x6a5   : > { %1839 = vst.msk [vmem:[%s336_s15] sm:$0xff] %vm343_vm0, %v1838_v57 }
 0x6a6   : > { %2454 = shalt.err (!%p2451_p5)
}
 0x6a7   : > { %s2455_s19 = scalar_lea.hbm %s1853_s20, 128  ;;  %s2459_s9 = scalar_lea.hbm %s3035_s7, 256 }
 0x6a8   : > { %p2456_p10 = scmp.ne.s32.totalorder %s1853_s20, %s2455_s19  ;;  %p2460_p6 = scmp.lt.s32.totalorder %s1853_s20, %s3035_s7 }
 0x6a9   : > { %p2461_p12 = scmp.lt.s32.totalorder %s2459_s9, %s2455_s19 }
 0x6aa   : > { %p2457_p1 = pnand %p2456_p10, %p2695_p7 }
 0x6ab   : > { %p2462_p3 = por %p2461_p12, %p2460_p6 }
 0x6ac   : > { %p2458_p4 = pneg %p2457_p1 }
 0x6ae   : > { %p2463_p8 = pnand %p2462_p3, %p2458_p4 }
 0x6b0   : > { %2466 = shalt.err (!%p2463_p8)
}
 0x6b1   : > { %2222 = dma.vmem_to_hbm [thread:$0]  (%p2695_p7), %s1856_s17, 128, %s1853_s20, %s1841_s23  }
 0x6b2 PF: > { %s1867_s14 = sand.u32 1, %s2505_s24   ;;  %p3055_p9 = scmp.ne.s32.totalorder %s3045_s12, 0 }
 0x6b3   : > { %p3056_p11 = scmp.ge.s32.totalorder %s2525_s29, 2  ;;  %s1868_s15 = scalar_lea.sflag [#allocation7], %s1867_s14 }
 0x6b5   : > { %p2236_p2 = pnand %p3056_p11, %p3055_p9 }
 0x6b7   : > { %p2237_p13 = pneg %p2236_p2 }
 0x6b9   : > { %2500 = dma.done.wait (%p2237_p13), %s1868_s15, 128  }
 0x6ba   : > { %2502 = vsyncadd (%p2237_p13), %s1868_s15, 4294967168  ;;  %s24_s29 = sadd.s32 1, %s2525_s29   ;;  %s3057_s21 = sld [smem:[#allocation15_spill]] }
 0x6bb   : > { %p21_p0 = scmp.ge.s32.totalorder %s24_s29, 4   ;;  %s3058_s24 = smov %s2509_s25 }
 0x6bc   : > { %s3059_s25 = smov %s2513_s26  ;;  %s3060_s26 = smov %s2704_s30 }
 0x6bd   : > { %s3061_s27 = smov %s2521_s28  ;;  %23 = sbr.rel (!%p21_p0) target bundleno = 10 (0xa), region = 128 }
 0x6c0   : > { %s3062_s28 = smov %s3057_s21 }
 0x6c2   :  { %1873 = vsyncpa [#allocation6], 1 }
 0x6c3   :  { %1875 = vsyncpa [#allocation6 + $0x1], 1 }
 0x6c4   :  { %1876 = vsyncpa [#allocation9], 1 }
 0x6c5   :  { %1877 = vsyncpa [#allocation7], 1 }
 0x6c6   :  { %1879 = vsyncpa [#allocation7 + $0x1], 1 }

// kernel: tpu_custom_call.1
= control target key start
LH: loop header
LB: loop body
LE: loop exit
PB: predicated region body
PF: predicated region fallthrough
CT: control target
= control target key end

     0   :  { %s3028_s0 = inlined_call_operand.hbm [shape: f32[2,8,32], index: 0, kind: input, shape index: {}]   ;;  %s3029_s1 = inlined_call_operand.vmem [shape: f32[1,32], index: 1, kind: input, shape index: {}]   ;;  %s3030_s2 = inlined_call_operand.vmem [shape: f32[1,32], index: 2, kind: input, shape index: {}]   ;;  %s3031_s3 = inlined_call_operand.hbm [shape: bf16[32,96], index: 3, kind: input, shape index: {}]   ;;  %s3032_s4 = inlined_call_operand.vmem [shape: f32[1,96], index: 4, kind: input, shape index: {}]   ;;  %s3033_s5 = inlined_call_operand.hbm [shape: bf16[8,4,32], index: 5, kind: input, shape index: {}]   ;;  %s3034_s6 = inlined_call_operand.vmem [shape: f32[1,32], index: 6, kind: input, shape index: {}]   ;;  %s3035_s7 = inlined_call_operand.hbm [shape: f32[2,8,32], index: 7, kind: output, shape index: {}]  }
   0x1   :  { %3040 = sst [smem:[#allocation16_spill]] %s3031_s3 }
   0x2   :  { %3041 = sst [smem:[#allocation17_spill]] %s3033_s5 }
   0x3   :  { %12 = vsyncpa [#allocation6], 0 }
   0x4   :  { %14 = vsyncpa [#allocation6 + $0x1], 0 }
   0x5   :  { %15 = vsyncpa [#allocation9], 0 }
   0x6   :  { %16 = vsyncpa [#allocation7], 0 }
   0x7   :  { %18 = vsyncpa [#allocation7 + $0x1], 0  ;;  %s2600_s24 = smov 0   ;;  %s2602_s25 = smov 0  }
   0x8   :  { %s2604_s26 = smov 0   ;;  %s2606_s27 = smov 0  }
   0x9   :  { %s2608_s28 = smov 0   ;;  %s2610_s29 = smov 0  }
   0xa LB: > { %s1957_s30 = sadd.s32 4294967295, %s2525_s29   ;;  %s1958_s8 = sadd.s32 4294967294, %s2525_s29   ;;  %s2525_s29 = sphi %s2610_s29, %s24_s29   ;;  %s2521_s28 = sphi %s2608_s28, %s3062_s28   ;;  %s2517_s27 = sphi %s2606_s27, %s3061_s27   ;;  %s2513_s26 = sphi %s2604_s26, %s3060_s26   ;;  %s2509_s25 = sphi %s2602_s25, %s3059_s25   ;;  %s2505_s24 = sphi %s2600_s24, %s3058_s24  }
   0xb   : > { %p56_p0 = scmp.ne.s32.totalorder %s2509_s25, %s2505_s24  ;;  %p2634_p1 = scmp.eq.s32.totalorder %s1957_s30, 0 }
   0xc   : > { %p2638_p2 = scmp.eq.s32.totalorder %s1957_s30, 1  ;;  %p214_p3 = scmp.eq.s32.totalorder %s1958_s8, 1 }
   0xd   : > { %s3042_s9 = scalar_select %p2634_p1, 1, 0 }
   0xe   : > { %p2644_p4 = por %p2634_p1, %p56_p0  ;;  %p1959_p5 = scmp.ge.s32.totalorder %s2525_s29, 1 }
   0xf   : > { %p2649_p6 = por %p214_p3, %p56_p0  ;;  %p221_p7 = scmp.lt.s32.totalorder %s2525_s29, 3 }
  0x10   : > { %s3044_s11 = scalar_select %p2644_p4, 1, 0 }
  0x11   : > { %s3045_s12 = scalar_select %p2649_p6, 1, 0 }
  0x12   : > { %p2654_p8 = pnand %p1959_p5, %p221_p7  ;;  %s2527_s14 = smov [#allocation8]  }
  0x13   : > { %s239_s15 = sshll.u32 %s2527_s14, 4  ;;  %s2528_s17 = smov [#allocation10]   ;;  %s240_s15 = int_to_ptr.vmem [resolvable:$true] %s239_s15 }
  0x14   : > { %p2224_p9 = pneg %p2654_p8  ;;  %s255_s18 = sshll.u32 %s2528_s17, 4  ;;  %s256_s18 = int_to_ptr.vmem [resolvable:$true] %s255_s18 }
  0x15   : > { %s2372_s19 = scalar_lea.vmem %s240_s15, 256  ;;  %p2380_p5 = scmp.lt.s32.totalorder %s240_s15, %s240_s15 }
  0x16   : > { %p2663_p11 = pnand %p2224_p9, %p2634_p1  ;;  %p2373_p13 = scmp.ne.s32.totalorder %s240_s15, %s2372_s19 }
  0x17   : > { %p2381_p7 = scmp.lt.s32.totalorder %s2372_s19, %s2372_s19 }
  0x18   : > { %p2363_p12 = pneg %p2663_p11 }
  0x19   : > { %p2382_p10 = por %p2381_p7, %p2380_p5 }
  0x1a   : > { %p2375_p0 = pnand %p2373_p13, %p2363_p12 }
  0x1c   : > { %p2376_p3 = pneg %p2375_p0 }
  0x1e   : > { %p2383_p9 = pnand %p2382_p10, %p2376_p3 }
  0x20   : > { %2386 = shalt.err (!%p2383_p9)
}
  0x21   : > { %s2529_s20 = smov 64   ;;  %s2530_s21 = smov 4  }
  0x22   : > { %s3048_s3 = sld [smem:[#allocation16_spill]]  ;;  %s2398_s30 = scalar_lea.vmem %s256_s18, 256 }
  0x23   : > { %p2399_p6 = scmp.ne.s32.totalorder %s256_s18, %s2398_s30  ;;  %p2406_p1 = scmp.lt.s32.totalorder %s256_s18, %s256_s18 }
  0x24   : > { %p2407_p4 = scmp.lt.s32.totalorder %s2398_s30, %s2398_s30 }
  0x25   : > { %p2401_p13 = pnand %p2399_p6, %p2363_p12 }
  0x26   : > { %p2408_p5 = por %p2407_p4, %p2406_p1 }
  0x27   : > { %p2402_p0 = pneg %p2401_p13 }
  0x28   : > { %2227 = dma.hbm_to_vmem [thread:$0]  (!%p2663_p11), %s3048_s3, 256, %s240_s15, [#allocation9], %s2529_s20, %s2529_s20, %s2530_s21  }
  0x29   : > { %p2409_p10 = pnand %p2408_p5, %p2402_p0 }
  0x2b   : > { %2412 = shalt.err (!%p2409_p10)
}
  0x2c   : > { %s2531_s8 = smov 32   ;;  %s2532_s14 = smov 2  }
  0x2d   : > { %s3049_s5 = sld [smem:[#allocation17_spill]]  ;;  %s36_s19 = sadd.s32 1, %s2521_s28 }
  0x2e   : > { %s43_s20 = sadd.s32 1, %s2513_s26  ;;  %p38_p1 = scmp.ge.s32.totalorder %s36_s19, 2 }
  0x2f   : > { %p50_p4 = scmp.ne.s32.totalorder %s2513_s26, %s2509_s25  ;;  %p51_p6 = scmp.eq.s32.totalorder %s2525_s29, 0 }
  0x30   : > { %p2241_p12 = scmp.lt.s32.totalorder %s2525_s29, 2  ;;  %s3064_s19 = smov (%p38_p1, %s36_s19), 0 }
  0x31   : > { %3050 = sst [smem:[#allocation15_spill]] %s3064_s19  ;;  %p52_p3 = por %p51_p6, %p50_p4 }
  0x32   : > { %p2695_p7 = por %p2638_p2, %p50_p4  ;;  %s40_s16 = ssub.s32 %s2521_s28, %s3064_s19 }
  0x33   : > { %2230 = dma.hbm_to_vmem [thread:$0]  (!%p2663_p11), %s3049_s5, 256, %s256_s18, [#allocation9], %s2531_s8, %s2531_s8, %s2532_s14  }
  0x34   : > { %s272_s22 = sand.u32 1, %s2513_s26   ;;  %p41_p9 = scmp.eq.s32.totalorder %s40_s16, 0 }
  0x35   : > { %s1963_s18 = sshll.u32 %s272_s22, 3  ;;  %s1964_s23 = sshll.u32 %s2521_s28, 7 }
  0x36   : > { %s2704_s30 = scalar_select %p41_p9, %s2513_s26, %s43_s20  }
  0x37   : > { %s281_s15 = scalar_lea.hbm %s3028_s0, %s1964_s23  ;;  %s276_s17 = scalar_lea.vmem [#allocation5], %s1963_s18 }
  0x38   : > { %s283_s3 = sshll.u32 %s276_s17, 4  ;;  %p2711_p11 = pnand %p2241_p12, %p52_p3  ;;  %s284_s3 = int_to_ptr.vmem [resolvable:$true] %s283_s3 }
  0x39   : > { %s273_s5 = scalar_lea.sflag [#allocation6], %s272_s22  ;;  %s2426_s16 = scalar_lea.vmem %s284_s3, 128 }
  0x3a   : > { %p2415_p2 = pneg %p2711_p11  ;;  %p2427_p13 = scmp.ne.s32.totalorder %s284_s3, %s2426_s16 }
  0x3b   : > { %s2533_s20 = smov [#allocation5]  }
  0x3c   : > { %p2429_p0 = pnand %p2427_p13, %p2415_p2  ;;  %s2431_s19 = sshll.u32 %s2533_s20, 4  ;;  %s2432_s19 = int_to_ptr.vmem [resolvable:$false] %s2431_s19 }
  0x3d   : > { %s2433_s23 = scalar_lea.vmem %s2432_s19, 256  ;;  %p2434_p10 = scmp.lt.s32.totalorder %s284_s3, %s2432_s19 }
  0x3e   : > { %p2430_p5 = pneg %p2429_p0  ;;  %p2435_p1 = scmp.lt.s32.totalorder %s2433_s23, %s2426_s16 }
  0x40   : > { %p2436_p4 = por %p2435_p1, %p2434_p10 }
  0x42   : > { %p2437_p6 = pnand %p2436_p4, %p2430_p5 }
  0x44   : > { %2440 = shalt.err (!%p2437_p6)
}
  0x45   : > { %2234 = dma.hbm_to_vmem [thread:$0]  (!%p2711_p11), %s281_s15, 128, %s284_s3, %s273_s5  }
  0x46   : > { %292 = sbr.rel (%p2654_p8) target bundleno = 1714 (0x6b2), region = 48  ;;  %s2722_s22 = sand.u32 (!%p2654_p8), 1, %s2509_s25  }
  0x47   : > { %s1966_s18 = sshll.u32 (!%p2654_p8), %s2722_s22, 3  ;;  %s295_s8 = scalar_lea.sflag (!%p2654_p8), [#allocation6], %s2722_s22 }
  0x48   : > { %s2728_s19 = scalar_lea.vmem (!%p2654_p8), [#allocation5], %s1966_s18  ;;  %p3053_p12 = scmp.ne.s32.totalorder (!%p2654_p8), %s3044_s11, 0 }
  0x4b   : > { %2492 = dma.done.wait (%p3053_p12), %s295_s8, 128  }
  0x4c   : > { %2494 = vsyncadd (%p3053_p12), %s295_s8, 4294967168  ;;  %p3054_p3 = scmp.ne.s32.totalorder %s3042_s9, 0 }
  0x4e   : > { %2496 = dma.done.wait (%p3054_p3), [#allocation9], 512  }
  0x4f   : > { %2498 = vsyncadd (%p3054_p3), [#allocation9], 4294966784  ;;  %vm343_vm0 = vcmask 261120   ;;  %v342_v0 = vld [vmem:[%s2728_s19] sm:$0xff]  ;;  %v2324_v7 = vld [vmem:[#allocation8 + $0x8] sm:$0xff]   ;;  %v2534_v8 = vmov 0.0  }
  0x50   : > { %v344_v1 = vsel %vm343_vm0, %v342_v0, 0.0  ;;  %2060 = vmatprep.subr.bf16.mxu0 %v2534_v8  ;;  %vm2535_vm1 = vmmov 0   ;;  %v2325_v9 = vld [vmem:[#allocation8] sm:$0xff]   ;;  %2068 = vmatprep.subr.bf16.mxu1 %v2534_v8  ;;  %v1970_v14 = vld [vmem:[%s3029_s1] ss:$0 sm:$0xff]  ;;  %vm448_vm2 = vcmask 27648  }
  0x51   : > { %345 = vadd.xlane.f32.xlu0 %v344_v1  ;;  %2064 = vmatprep.mubr.msk.bf16.mxu0 %vm2535_vm1, %v2534_v8  ;;  %v1971_v16 = vld [vmem:[%s3030_s2] ss:$0 sm:$0xff]  ;;  %s2536_s15 = smov 88   ;;  %s2537_s17 = smov 96   ;;  %vm592_vm3 = vcmask 31744   ;;  %vm1061_vm4 = vcmask 1043456  }
  0x52   : > { %2061 = vmatpush3.bf16.msra.mxu0 %v2324_v7  ;;  %2070 = vmatprep.mubr.msk.bf16.mxu1 %vm2535_vm1, %v2534_v8  ;;  %v1972_v20 = vld [vmem:[%s3032_s4] ss:$0 sm:$0xff]  ;;  %s2538_s10 = smov 112   ;;  %s2539_s16 = smov 92   ;;  %vm961_vm5 = vcmask 64512   ;;  %vm1446_vm6 = vcmask 1041408  }
  0x53   : > { %2062 = vmatprep.subr.bf16.mxu0 %v2534_v8  ;;  %s2540_s20 = smov 108   ;;  %s2541_s23 = smov 84  }
  0x54   : > { %s2542_s8 = smov 104   ;;  %s2543_s3 = smov 80  }
  0x55   : > { %s2544_s5 = smov 64   ;;  %s2545_s9 = smov 76  }
  0x56   : > { %2063 = vmatpush3.bf16.msra.mxu0 %v2325_v9  ;;  %s2546_s11 = smov 124   ;;  %s2547_s13 = smov 120  }
  0x57   : > { %2074 = vmatprep.subr.bf16.mxu0 %v2534_v8  ;;  %s2548_s14 = smov 116  }
  0xda   : > { %v346_v2 = vpop.xlane.xlu0 %345 }
  0xdb   : > { %v348_v3 = vmul.f32 0.03125, %v346_v2 }
  0xdd   : > { %v349_v4 = vsub.f32 %v342_v0, %v348_v3 }
  0xdf   : > { %v350_v5 = vmul.f32 %v349_v4, %v349_v4 }
  0xe1   : > { %v351_v6 = vsel %vm343_vm0, %v350_v5, 0.0 }
  0xe2   : > { %352 = vadd.xlane.f32.xlu0 %v351_v6 }
 0x16b   : > { %v353_v10 = vpop.xlane.xlu0 %352 }
 0x16c   : > { %v354_v11 = vmul.f32 0.03125, %v353_v10 }
 0x16e   : > { %v355_v12 = vadd.f32 1e-05, %v354_v11 }
 0x170   : > { %2326 = vrsqrt.f32 %v355_v12 }
 0x17d   : > { %v2327_v13 = vpop.eup %2326 }
 0x17e   : > { %v357_v15 = vmul.f32 %v2327_v13, %v349_v4 }
 0x180   : > { %v365_v17 = vmul.f32 %v1970_v14, %v357_v15 }
 0x182   : > { %v373_v18 = vadd.f32 %v1971_v16, %v365_v17 }
 0x184   : > { %v374_v19 = vpack.c.bf16 %v373_v18, %v373_v18 }
 0x186   : > { %2065 = vmatmul.mubr.msk.bf16.vlgmr.msra.gmra.mxu0 %vm343_vm0, %v374_v19 }
 0x187   : > { %2076 = vmatprep.mubr.msk.bf16.mxu0 %vm2535_vm1, %v2534_v8 }
 0x246   : > { %v435_v21 = vpop.f32.mrf.mxu0 }
 0x247   : > { %v436_v22 = vadd.f32 %v1972_v20, %v435_v21 }
 0x248   : > { %v2066_v23 = vpop.f32.mrf.mxu0 }
 0x249   : > { %v2761_v24 = vpack.c.bf16 %v436_v22, %v436_v22  ;;  %v454_v25 = vmul.f32 0.5, %v436_v22 }
 0x24a   : > { %v438_v26 = vpop.f32.mrf.mxu0 }
 0x24b   : > { %v455_v27 = vpack.c.bf16 %v454_v25, %v454_v25  ;;  %475 = vrot.lane.b32.xlu0 %v2761_v24, %s2536_s15  ;;  %445 = vrot.lane.b32.xlu1 %v2761_v24, %s2537_s17  ;;  %s2549_s15 = smov 72   ;;  %s2550_s17 = smov 68  }
 0x24c   : > { %v2067_v28 = vpop.f32.mrf.mxu0 }
 0x24d   : > { %456 = vst.msk [vmem:[#allocation2] sm:$0xf] %vm448_vm2, %v455_v27 }
 0x24f   : > { %515 = vrot.lane.b32.xlu0 %v455_v27, %s2538_s10  ;;  %457 = vrot.lane.b32.xlu1 %v2761_v24, %s2539_s16  ;;  %s2551_s10 = smov 100   ;;  %s2552_s16 = smov 60  }
 0x253   : > { %530 = vrot.lane.b32.xlu0 %v455_v27, %s2540_s20  ;;  %490 = vrot.lane.b32.xlu1 %v2761_v24, %s2541_s23  ;;  %s2553_s20 = smov 52   ;;  %s2554_s23 = smov 56  }
 0x254   : > { %v568_v44 = vld [vmem:[#allocation2] sm:$0xf] }
 0x257   : > { %545 = vrot.lane.b32.xlu0 %v455_v27, %s2542_s8  ;;  %505 = vrot.lane.b32.xlu1 %v2761_v24, %s2543_s3  ;;  %s2555_s8 = smov 48   ;;  %s2556_s3 = smov 44  }
 0x25b   : > { %450 = vrot.lane.b32.xlu0 %v2761_v24, %s2544_s5  ;;  %520 = vrot.lane.b32.xlu1 %v2761_v24, %s2545_s9  ;;  %s2557_s5 = smov 36   ;;  %s2558_s9 = smov 40  }
 0x25f   : > { %470 = vrot.lane.b32.xlu1 %v455_v27, %s2546_s11 }
 0x263   : > { %485 = vrot.lane.b32.xlu1 %v455_v27, %s2547_s13 }
 0x267   : > { %500 = vrot.lane.b32.xlu1 %v455_v27, %s2548_s14  ;;  %s2004_s14 = sshll.u32 %s2517_s27, 7  ;;  %s2559_s27 = smov [#allocation11]  }
 0x26b   : > { %535 = vrot.lane.b32.xlu1 %v2761_v24, %s2549_s15  ;;  %s336_s15 = scalar_lea.vmem [#allocation11], %s1966_s18  ;;  %s2445_s18 = sshll.u32 %s2559_s27, 4  ;;  %s2446_s18 = int_to_ptr.vmem [resolvable:$false] %s2445_s18 }
 0x26f   : > { %550 = vrot.lane.b32.xlu1 %v2761_v24, %s2550_s17  ;;  %s1855_s17 = sshll.u32 %s336_s15, 4  ;;  %s1856_s17 = int_to_ptr.vmem [resolvable:$true] %s1855_s17 }
 0x270   : > { %p2448_p2 = scmp.lt.s32.totalorder %s1856_s17, %s2446_s18 }
 0x273   : > { %560 = vrot.lane.b32.xlu1 %v455_v27, %s2551_s10 }
 0x2bd   : > { %v476_v29 = vpop.permute.xlu0 %475  ;;  %v446_v30 = vpop.permute.xlu1 %445 }
 0x2be   : > { %479 = vst.msk [vmem:[#allocation3 + $0x8] sm:$0xf] %vm448_vm2, %v476_v29  ;;  %449 = vst.msk [vmem:[#allocation3] sm:$0xf] %vm448_vm2, %v446_v30 }
 0x2c1   : > { %v516_v31 = vpop.permute.xlu0 %515  ;;  %v458_v32 = vpop.permute.xlu1 %457 }
 0x2c2   : > { %519 = vst.msk [vmem:[#allocation2 + $0x10] sm:$0xf] %vm448_vm2, %v516_v31  ;;  %461 = vst.msk [vmem:[#allocation3 + $0x4] sm:$0xf] %vm448_vm2, %v458_v32 }
 0x2c5   : > { %v531_v33 = vpop.permute.xlu0 %530  ;;  %v491_v34 = vpop.permute.xlu1 %490  ;;  %v576_v35 = vld [vmem:[#allocation3] sm:$0xf]  ;;  %v578_v41 = vld [vmem:[#allocation3 + $0x8] sm:$0xf] }
 0x2c6   : > { %534 = vst.msk [vmem:[#allocation2 + $0x14] sm:$0xf] %vm448_vm2, %v531_v33  ;;  %494 = vst.msk [vmem:[#allocation3 + $0xc] sm:$0xf] %vm448_vm2, %v491_v34  ;;  %v597_v36 = vsel %vm592_vm3, %v576_v35, 0  ;;  %v689_v45 = vsel %vm592_vm3, %v578_v41, 0 }
 0x2c7   : > { %2069 = vmatpush3.bf16.xpose.msra.mxu1 %v597_v36 }
 0x2c8   : > { %2080 = vmatprep.subr.bf16.mxu1 %v2534_v8 }
 0x2c9   : > { %v546_v37 = vpop.permute.xlu0 %545  ;;  %v506_v38 = vpop.permute.xlu1 %505  ;;  %v577_v39 = vld [vmem:[#allocation3 + $0x4] sm:$0xf]  ;;  %v572_v61 = vld [vmem:[#allocation2 + $0x10] sm:$0xf] }
 0x2ca   : > { %549 = vst.msk [vmem:[#allocation2 + $0x18] sm:$0xf] %vm448_vm2, %v546_v37  ;;  %509 = vst.msk [vmem:[#allocation3 + $0x10] sm:$0xf] %vm448_vm2, %v506_v38  ;;  %v643_v40 = vsel %vm592_vm3, %v577_v39, 0 }
 0x2cb   : > { %2075 = vmatpush3.bf16.xpose.msra.mxu0 %v643_v40 }
 0x2cc   : > { %2086 = vmatprep.subr.bf16.mxu0 %v2534_v8 }
 0x2cd   : > { %v451_v42 = vpop.permute.xlu0 %450  ;;  %v521_v43 = vpop.permute.xlu1 %520  ;;  %v579_v48 = vld [vmem:[#allocation3 + $0xc] sm:$0xf]  ;;  %v573_v0 = vld [vmem:[#allocation2 + $0x14] sm:$0xf] }
 0x2ce   : > { %453 = vst.msk [vmem:[#allocation4] sm:$0xf] %vm448_vm2, %v451_v42  ;;  %524 = vst.msk [vmem:[#allocation3 + $0x14] sm:$0xf] %vm448_vm2, %v521_v43  ;;  %2071 = vmatmul.mubr.msk.bf16.vlgmr.msra.gmra.mxu1 %vm592_vm3, %v568_v44  ;;  %v735_v51 = vsel %vm592_vm3, %v579_v48, 0 }
 0x2cf   : > { %2081 = vmatpush3.bf16.xpose.msra.mxu1 %v689_v45  ;;  %2082 = vmatprep.mubr.msk.bf16.mxu1 %vm2535_vm1, %v2534_v8 }
 0x2d0   : > { %2092 = vmatprep.subr.bf16.mxu1 %v2534_v8 }
 0x2d1   : > { %v471_v46 = vpop.permute.xlu1 %470  ;;  %v580_v52 = vld [vmem:[#allocation3 + $0x10] sm:$0xf]  ;;  %v574_v4 = vld [vmem:[#allocation2 + $0x18] sm:$0xf] }
 0x2d2   : > { %474 = vst.msk [vmem:[#allocation2 + $0x4] sm:$0xf] %vm448_vm2, %v471_v46  ;;  %v781_v55 = vsel %vm592_vm3, %v580_v52, 0 }
 0x2d5   : > { %v486_v47 = vpop.permute.xlu1 %485  ;;  %v581_v56 = vld [vmem:[#allocation3 + $0x14] sm:$0xf]  ;;  %v584_v3 = vld [vmem:[#allocation4] sm:$0xf] }
 0x2d6   : > { %489 = vst.msk [vmem:[#allocation2 + $0x8] sm:$0xf] %vm448_vm2, %v486_v47  ;;  %v827_v59 = vsel %vm592_vm3, %v581_v56, 0  ;;  %v1063_v5 = vsel %vm1061_vm4, %v584_v3, 0 }
 0x2d9   : > { %v501_v49 = vpop.permute.xlu1 %500  ;;  %v569_v50 = vld [vmem:[#allocation2 + $0x4] sm:$0xf] }
 0x2da   : > { %504 = vst.msk [vmem:[#allocation2 + $0xc] sm:$0xf] %vm448_vm2, %v501_v49  ;;  %2077 = vmatmul.mubr.msk.bf16.vlgmr.msra.gmra.mxu0 %vm592_vm3, %v569_v50 }
 0x2db   : > { %2087 = vmatpush3.bf16.xpose.msra.mxu0 %v735_v51  ;;  %2088 = vmatprep.mubr.msk.bf16.mxu0 %vm2535_vm1, %v2534_v8 }
 0x2dc   : > { %2098 = vmatprep.subr.bf16.mxu0 %v2534_v8 }
 0x2dd   : > { %v536_v53 = vpop.permute.xlu1 %535  ;;  %v570_v54 = vld [vmem:[#allocation2 + $0x8] sm:$0xf] }
 0x2de   : > { %539 = vst.msk [vmem:[#allocation3 + $0x18] sm:$0xf] %vm448_vm2, %v536_v53  ;;  %2083 = vmatmul.mubr.msk.bf16.vlgmr.msra.gmra.mxu1 %vm592_vm3, %v570_v54 }
 0x2df   : > { %2093 = vmatpush3.bf16.xpose.msra.mxu1 %v781_v55  ;;  %2094 = vmatprep.mubr.msk.bf16.mxu1 %vm2535_vm1, %v2534_v8 }
 0x2e0   : > { %2104 = vmatprep.subr.bf16.mxu1 %v2534_v8 }
 0x2e1   : > { %v551_v57 = vpop.permute.xlu1 %550  ;;  %v571_v58 = vld [vmem:[#allocation2 + $0xc] sm:$0xf] }
 0x2e2   : > { %554 = vst.msk [vmem:[#allocation3 + $0x1c] sm:$0xf] %vm448_vm2, %v551_v57  ;;  %2089 = vmatmul.mubr.msk.bf16.vlgmr.msra.gmra.mxu0 %vm592_vm3, %v571_v58 }
 0x2e3   : > { %2099 = vmatpush3.bf16.xpose.msra.mxu0 %v827_v59  ;;  %2100 = vmatprep.mubr.msk.bf16.mxu0 %vm2535_vm1, %v2534_v8 }
 0x2e4   : > { %2110 = vmatprep.subr.bf16.mxu0 %v2534_v8 }
 0x2e5   : > { %v561_v60 = vpop.permute.xlu1 %560  ;;  %v582_v62 = vld [vmem:[#allocation3 + $0x18] sm:$0xf] }
 0x2e6   : > { %564 = vst.msk [vmem:[#allocation2 + $0x1c] sm:$0xf] %vm448_vm2, %v561_v60  ;;  %2095 = vmatmul.mubr.msk.bf16.vlgmr.msra.gmra.mxu1 %vm592_vm3, %v572_v61  ;;  %v873_v63 = vsel %vm592_vm3, %v582_v62, 0 }
 0x2e7   : > { %2105 = vmatpush3.bf16.xpose.msra.mxu1 %v873_v63  ;;  %2106 = vmatprep.mubr.msk.bf16.mxu1 %vm2535_vm1, %v2534_v8 }
 0x2e8   : > { %2116 = vmatprep.subr.bf16.mxu1 %v2534_v8 }
 0x2e9   : > { %v583_v1 = vld [vmem:[#allocation3 + $0x1c] sm:$0xf] }
 0x2ea   : > { %2101 = vmatmul.mubr.msk.bf16.vlgmr.msra.gmra.mxu0 %vm592_vm3, %v573_v0  ;;  %v919_v2 = vsel %vm592_vm3, %v583_v1, 0 }
 0x2eb   : > { %2111 = vmatpush3.bf16.xpose.msra.mxu0 %v919_v2  ;;  %2112 = vmatprep.mubr.msk.bf16.mxu0 %vm2535_vm1, %v2534_v8 }
 0x2ec   : > { %2122 = vmatprep.subr.bf16.mxu0 %v2534_v8 }
 0x2ed   : > { %v575_v6 = vld [vmem:[#allocation2 + $0x1c] sm:$0xf] }
 0x2ee   : > { %2107 = vmatmul.mubr.msk.bf16.vlgmr.msra.gmra.mxu1 %vm592_vm3, %v574_v4 }
 0x2ef   : > { %2117 = vmatpush3.bf16.msra.mxu1 %v1063_v5  ;;  %2118 = vmatprep.mubr.msk.bf16.mxu1 %vm2535_vm1, %v2534_v8 }
 0x2f0   : > { %2128 = vmatprep.subr.bf16.mxu1 %v2534_v8 }
 0x2f2   : > { %2113 = vmatmul.mubr.msk.bf16.vlgmr.msra.gmra.mxu0 %vm592_vm3, %v575_v6 }
 0x2f3   : > { %2124 = vmatprep.mubr.msk.bf16.mxu0 %vm2535_vm1, %v2534_v8 }
 0x38e   : > { %v633_v7 = vpop.f32.mrf.mxu1 }
 0x38f   : > { %v962_v9 = vsel %vm961_vm5, %v633_v7, -inf }
 0x390   : > { %963 = vmax.xlane.f32.xlu0 %v962_v9  ;;  %v2072_v10 = vpop.f32.mrf.mxu1 }
 0x392   : > { %v636_v11 = vpop.f32.mrf.mxu1 }
 0x394   : > { %v2073_v12 = vpop.f32.mrf.mxu1 }
 0x39a   : > { %v679_v13 = vpop.f32.mrf.mxu0 }
 0x39b   : > { %v965_v14 = vsel %vm961_vm5, %v679_v13, -inf }
 0x39c   : > { %966 = vmax.xlane.f32.xlu1 %v965_v14  ;;  %v2078_v15 = vpop.f32.mrf.mxu0 }
 0x39e   : > { %v682_v16 = vpop.f32.mrf.mxu0  ;;  %v725_v17 = vpop.f32.mrf.mxu1 }
 0x39f   : > { %v968_v18 = vsel %vm961_vm5, %v725_v17, -inf }
 0x3a0   : > { %969 = vmax.xlane.f32.xlu0 %v968_v18  ;;  %v2079_v19 = vpop.f32.mrf.mxu0  ;;  %v2084_v20 = vpop.f32.mrf.mxu1 }
 0x3a2   : > { %v728_v21 = vpop.f32.mrf.mxu1  ;;  %v2834_v22 = vpop.f32.mrf.mxu0 }
 0x3a3   : > { %v971_v23 = vsel %vm961_vm5, %v2834_v22, -inf }
 0x3a4   : > { %v2085_v25 = vpop.f32.mrf.mxu1  ;;  %972 = vmax.xlane.f32.xlu0 %v971_v23  ;;  %v2090_v26 = vpop.f32.mrf.mxu0 }
 0x3a6   : > { %v774_v27 = vpop.f32.mrf.mxu0  ;;  %v817_v28 = vpop.f32.mrf.mxu1 }
 0x3a7   : > { %v974_v29 = vsel %vm961_vm5, %v817_v28, -inf }
 0x3a8   : > { %v2096_v30 = vpop.f32.mrf.mxu1  ;;  %975 = vmax.xlane.f32.xlu1 %v974_v29  ;;  %v2091_v31 = vpop.f32.mrf.mxu0 }
 0x3aa   : > { %v820_v32 = vpop.f32.mrf.mxu1  ;;  %v863_v33 = vpop.f32.mrf.mxu0 }
 0x3ab   : > { %v977_v34 = vsel %vm961_vm5, %v863_v33, -inf }
 0x3ac   : > { %v2097_v35 = vpop.f32.mrf.mxu1  ;;  %978 = vmax.xlane.f32.xlu0 %v977_v34  ;;  %v2102_v36 = vpop.f32.mrf.mxu0 }
 0x3ae   : > { %v866_v37 = vpop.f32.mrf.mxu0  ;;  %v2840_v38 = vpop.f32.mrf.mxu1 }
 0x3af   : > { %v980_v48 = vsel %vm961_vm5, %v2840_v38, -inf }
 0x3b0   : > { %v2103_v39 = vpop.f32.mrf.mxu0  ;;  %v2108_v40 = vpop.f32.mrf.mxu1 }
 0x3b2   : > { %v912_v41 = vpop.f32.mrf.mxu1  ;;  %v955_v42 = vpop.f32.mrf.mxu0 }
 0x3b3   : > { %v983_v43 = vsel %vm961_vm5, %v955_v42, -inf }
 0x3b4   : > { %v2109_v44 = vpop.f32.mrf.mxu1  ;;  %984 = vmax.xlane.f32.xlu0 %v983_v43  ;;  %v2114_v45 = vpop.f32.mrf.mxu0 }
 0x3b6   : > { %v958_v46 = vpop.f32.mrf.mxu0 }
 0x3b8   : > { %v2115_v47 = vpop.f32.mrf.mxu0 }
 0x3b9   : > { %462 = vrot.lane.b32.xlu1 %v2761_v24, %s2552_s16 }
 0x3ca   : > { %495 = vrot.lane.b32.xlu0 %v2761_v24, %s2553_s20  ;;  %s1853_s20 = scalar_lea.hbm %s3035_s7, %s2004_s14 }
 0x3dd   : > { %981 = vmax.xlane.f32.xlu1 %v980_v48 }
 0x3ee   : > { %480 = vrot.lane.b32.xlu1 %v2761_v24, %s2554_s23  ;;  %s1841_s23 = scalar_lea.sflag [#allocation7], %s2722_s22 }
 0x3f2   : > { %510 = vrot.lane.b32.xlu1 %v2761_v24, %s2555_s8  ;;  %s2441_s8 = scalar_lea.vmem %s1856_s17, 128 }
 0x3f3   : > { %p2442_p8 = scmp.ne.s32.totalorder %s1856_s17, %s2441_s8 }
 0x3f5   : > { %p2443_p9 = pnand %p2442_p8, %p2695_p7 }
 0x3f7   : > { %p2444_p11 = pneg %p2443_p9 }
 0x419   : > { %v964_v49 = vpop.xlane.xlu0 %963 }
 0x41a   : > { %v986_v50 = vsub.f32 %v633_v7, %v964_v49 }
 0x41c   : > { %v994_v51 = vmul.f32 1.442695, %v986_v50 }
 0x41e   : > { %2328 = vpow2.f32 %v994_v51 }
 0x425   : > { %v967_v52 = vpop.xlane.xlu1 %966 }
 0x426   : > { %v987_v53 = vsub.f32 %v679_v13, %v967_v52 }
 0x428   : > { %v996_v54 = vmul.f32 1.442695, %v987_v53 }
 0x429   : > { %v970_v55 = vpop.xlane.xlu0 %969 }
 0x42a   : > { %2330 = vpow2.f32 %v996_v54  ;;  %v988_v56 = vsub.f32 %v725_v17, %v970_v55 }
 0x42b   : > { %v2849_v57 = vpop.eup %2328 }
 0x42c   : > { %v998_v58 = vmul.f32 1.442695, %v988_v56  ;;  %v1010_v59 = vsel %vm961_vm5, %v2849_v57, 0.0 }
 0x42d   : > { %1011 = vadd.xlane.f32.xlu1 %v1010_v59  ;;  %v973_v60 = vpop.xlane.xlu0 %972 }
 0x42e   : > { %2332 = vpow2.f32 %v998_v58  ;;  %v989_v21 = vsub.f32 %v2834_v22, %v973_v60 }
 0x430   : > { %v1000_v23 = vmul.f32 1.442695, %v989_v21 }
 0x431   : > { %v976_v61 = vpop.xlane.xlu1 %975 }
 0x432   : > { %v990_v62 = vsub.f32 %v817_v28, %v976_v61 }
 0x434   : > { %v1002_v63 = vmul.f32 1.442695, %v990_v62 }
 0x435   : > { %v463_v0 = vpop.permute.xlu1 %462  ;;  %v979_v1 = vpop.xlane.xlu0 %978 }
 0x436   : > { %2334 = vpow2.f32 %v1002_v63  ;;  %466 = vst.msk [vmem:[#allocation4 + $0x4] sm:$0xf] %vm448_vm2, %v463_v0  ;;  %v991_v2 = vsub.f32 %v863_v33, %v979_v1 }
 0x437   : > { %v2854_v3 = vpop.eup %2330 }
 0x438   : > { %v1004_v4 = vmul.f32 1.442695, %v991_v2  ;;  %v1013_v5 = vsel %vm961_vm5, %v2854_v3, 0.0 }
 0x439   : > { %1014 = vadd.xlane.f32.xlu0 %v1013_v5 }
 0x43a   : > { %2336 = vpow2.f32 %v1004_v4 }
 0x43b   : > { %v2858_v6 = vpop.eup %2332 }
 0x43c   : > { %v1016_v7 = vsel %vm961_vm5, %v2858_v6, 0.0 }
 0x43d   : > { %1017 = vadd.xlane.f32.xlu1 %v1016_v7  ;;  %v985_v9 = vpop.xlane.xlu0 %984  ;;  %v585_v10 = vld [vmem:[#allocation4 + $0x4] sm:$0xf] }
 0x43e   : > { %v993_v11 = vsub.f32 %v955_v42, %v985_v9  ;;  %v1109_v12 = vsel %vm1061_vm4, %v585_v10, 0 }
 0x43f   : > { %2123 = vmatpush3.bf16.msra.mxu0 %v1109_v12 }
 0x440   : > { %v1008_v13 = vmul.f32 1.442695, %v993_v11  ;;  %2134 = vmatprep.subr.bf16.mxu0 %v2534_v8  ;;  %v1435_v11 = vld [vmem:[#allocation10] sm:$0x3] }
 0x441   : > { %v496_v14 = vpop.permute.xlu0 %495 }
 0x442   : > { %2338 = vpow2.f32 %v1008_v13  ;;  %499 = vst.msk [vmem:[#allocation4 + $0xc] sm:$0xf] %vm448_vm2, %v496_v14 }
 0x443   : > { %v2865_v15 = vpop.eup %2334  ;;  %2340 = vpow2.f32 %v1000_v23 }
 0x444   : > { %v1022_v16 = vsel %vm961_vm5, %v2865_v15, 0.0 }
 0x445   : > { %1023 = vadd.xlane.f32.xlu1 %v1022_v16  ;;  %v1448_v16 = vsel %vm1446_vm6, %v1435_v11, 0 }
 0x447   : > { %v2869_v17 = vpop.eup %2336 }
 0x448   : > { %v1025_v18 = vsel %vm961_vm5, %v2869_v17, 0.0 }
 0x449   : > { %1026 = vadd.xlane.f32.xlu1 %v1025_v18  ;;  %v587_v44 = vld [vmem:[#allocation4 + $0xc] sm:$0xf] }
 0x44a   : > { %v1201_v47 = vsel %vm1061_vm4, %v587_v44, 0 }
 0x44f   : > { %v2873_v19 = vpop.eup %2338  ;;  %525 = vrot.lane.b32.xlu0 %v2761_v24, %s2556_s3  ;;  %s2447_s3 = scalar_lea.vmem %s2446_s18, 256 }
 0x450   : > { %v1031_v20 = vsel %vm961_vm5, %v2873_v19, 0.0  ;;  %v2881_v28 = vpop.eup %2340  ;;  %p2449_p13 = scmp.lt.s32.totalorder %s2447_s3, %s2441_s8 }
 0x451   : > { %1032 = vadd.xlane.f32.xlu1 %v1031_v20  ;;  %v1019_v30 = vsel %vm961_vm5, %v2881_v28, 0.0 }
 0x452   : > { %p2450_p0 = por %p2449_p13, %p2448_p2 }
 0x454   : > { %p2451_p5 = pnand %p2450_p0, %p2444_p11 }
 0x462   : > { %555 = vrot.lane.b32.xlu1 %v2761_v24, %s2557_s5 }
 0x466   : > { %v982_v25 = vpop.xlane.xlu1 %981 }
 0x467   : > { %v992_v26 = vsub.f32 %v2840_v38, %v982_v25 }
 0x469   : > { %v1006_v27 = vmul.f32 1.442695, %v992_v26 }
 0x46a   : > { %v481_v29 = vpop.permute.xlu1 %480 }
 0x46b   : > { %2342 = vpow2.f32 %v1006_v27  ;;  %484 = vst.msk [vmem:[#allocation4 + $0x8] sm:$0xf] %vm448_vm2, %v481_v29  ;;  %v1438_v29 = vld [vmem:[#allocation10 + $0x6] sm:$0x3] }
 0x46e   : > { %v511_v31 = vpop.permute.xlu1 %510  ;;  %1020 = vadd.xlane.f32.xlu0 %v1019_v30 }
 0x46f   : > { %514 = vst.msk [vmem:[#allocation4 + $0x10] sm:$0xf] %vm448_vm2, %v511_v31 }
 0x472   : > { %v586_v39 = vld [vmem:[#allocation4 + $0x8] sm:$0xf] }
 0x473   : > { %v1155_v41 = vsel %vm1061_vm4, %v586_v39, 0 }
 0x476   : > { %v588_v50 = vld [vmem:[#allocation4 + $0x10] sm:$0xf] }
 0x477   : > { %v1247_v52 = vsel %vm1061_vm4, %v588_v50, 0 }
 0x478   : > { %v2887_v22 = vpop.eup %2342 }
 0x479   : > { %v1028_v32 = vsel %vm961_vm5, %v2887_v22, 0.0 }
 0x47a   : > { %1029 = vadd.xlane.f32.xlu0 %v1028_v32 }
 0x490   : > { %540 = vrot.lane.b32.xlu0 %v2761_v24, %s2558_s9 }
 0x4b6   : > { %v1012_v33 = vpop.xlane.xlu1 %1011 }
 0x4b7   : > { %2344 = vrcp.f32 %v1012_v33  ;;  %v1439_v33 = vld [vmem:[#allocation10 + $0x8] sm:$0x3] }
 0x4c2   : > { %v1015_v34 = vpop.xlane.xlu0 %1014 }
 0x4c3   : > { %2346 = vrcp.f32 %v1015_v34 }
 0x4c4   : > { %v2345_v35 = vpop.eup %2344 }
 0x4c5   : > { %v1042_v36 = vmul.f32 %v2345_v35, %v2849_v57 }
 0x4c6   : > { %v1018_v37 = vpop.xlane.xlu1 %1017  ;;  %v526_v38 = vpop.permute.xlu0 %525 }
 0x4c7   : > { %2348 = vrcp.f32 %v1018_v37  ;;  %529 = vst.msk [vmem:[#allocation4 + $0x14] sm:$0xf] %vm448_vm2, %v526_v38  ;;  %v1050_v40 = vpack.c.bf16 %v1042_v36, %v1042_v36  ;;  %v1632_v37 = vsel %vm1446_vm6, %v1439_v33, 0 }
 0x4c9   : > { %2119 = vmatmul.mubr.msk.bf16.vlgmr.msra.gmra.mxu1 %vm961_vm5, %v1050_v40 }
 0x4ca   : > { %2129 = vmatpush3.bf16.msra.mxu1 %v1155_v41  ;;  %2130 = vmatprep.mubr.msk.bf16.mxu1 %vm2535_vm1, %v2534_v8 }
 0x4cb   : > { %2140 = vmatprep.subr.bf16.mxu1 %v2534_v8 }
 0x4ce   : > { %v1024_v24 = vpop.xlane.xlu1 %1023  ;;  %v589_v63 = vld [vmem:[#allocation4 + $0x14] sm:$0xf] }
 0x4cf   : > { %2350 = vrcp.f32 %v1024_v24  ;;  %v1293_v2 = vsel %vm1061_vm4, %v589_v63, 0  ;;  %v1441_v24 = vld [vmem:[#allocation10 + $0xc] sm:$0x3] }
 0x4d0   : > { %v2347_v42 = vpop.eup %2346  ;;  %v1724_v44 = vsel %vm1446_vm6, %v1441_v24, 0 }
 0x4d1   : > { %v1043_v43 = vmul.f32 %v2347_v42, %v2854_v3 }
 0x4d2   : > { %v1027_v49 = vpop.xlane.xlu1 %1026 }
 0x4d3   : > { %v1051_v45 = vpack.c.bf16 %v1043_v43, %v1043_v43 }
 0x4d4   : > { %v2349_v46 = vpop.eup %2348 }
 0x4d5   : > { %2125 = vmatmul.mubr.msk.bf16.vlgmr.msra.gmra.mxu0 %vm961_vm5, %v1051_v45  ;;  %v1044_v48 = vmul.f32 %v2349_v46, %v2858_v6 }
 0x4d6   : > { %2135 = vmatpush3.bf16.msra.mxu0 %v1201_v47  ;;  %2136 = vmatprep.mubr.msk.bf16.mxu0 %vm2535_vm1, %v2534_v8 }
 0x4d7   : > { %v1052_v51 = vpack.c.bf16 %v1044_v48, %v1044_v48  ;;  %2146 = vmatprep.subr.bf16.mxu0 %v2534_v8  ;;  %v1440_v48 = vld [vmem:[#allocation10 + $0xa] sm:$0x3] }
 0x4d9   : > { %2131 = vmatmul.mubr.msk.bf16.vlgmr.msra.gmra.mxu1 %vm961_vm5, %v1052_v51  ;;  %v1678_v51 = vsel %vm1446_vm6, %v1440_v48, 0 }
 0x4da   : > { %2141 = vmatpush3.bf16.msra.mxu1 %v1247_v52  ;;  %v1033_v53 = vpop.xlane.xlu1 %1032  ;;  %2142 = vmatprep.mubr.msk.bf16.mxu1 %vm2535_vm1, %v2534_v8 }
 0x4db   : > { %2152 = vmatprep.subr.bf16.mxu1 %v2534_v8 }
 0x4dc   : > { %v2351_v54 = vpop.eup %2350 }
 0x4dd   : > { %v1046_v55 = vmul.f32 %v2351_v54, %v2865_v15 }
 0x4de   : > { %v556_v56 = vpop.permute.xlu1 %555 }
 0x4df   : > { %559 = vst.msk [vmem:[#allocation4 + $0x1c] sm:$0xf] %vm448_vm2, %v556_v56  ;;  %v1054_v57 = vpack.c.bf16 %v1046_v55, %v1046_v55  ;;  %v1442_v55 = vld [vmem:[#allocation10 + $0xe] sm:$0x3] }
 0x4e1   : > { %2143 = vmatmul.mubr.msk.bf16.vlgmr.msra.gmra.mxu1 %vm961_vm5, %v1054_v57 }
 0x4e2   : > { %2154 = vmatprep.mubr.msk.bf16.mxu1 %vm2535_vm1, %v2534_v8 }
 0x4e6   : > { %v591_v5 = vld [vmem:[#allocation4 + $0x1c] sm:$0xf] }
 0x4e7   : > { %v1385_v12 = vsel %vm1061_vm4, %v591_v5, 0 }
 0x4f7   : > { %v1021_v58 = vpop.xlane.xlu0 %1020 }
 0x4f8   : > { %2352 = vrcp.f32 %v1021_v58  ;;  %v1770_v58 = vsel %vm1446_vm6, %v1442_v55, 0 }
 0x4f9   : > { %2354 = vrcp.f32 %v1027_v49 }
 0x4fa   : > { %2356 = vrcp.f32 %v1033_v53 }
 0x503   : > { %v1030_v59 = vpop.xlane.xlu0 %1029 }
 0x504   : > { %2358 = vrcp.f32 %v1030_v59 }
 0x505   : > { %v2353_v60 = vpop.eup %2352 }
 0x506   : > { %v1045_v61 = vmul.f32 %v2353_v60, %v2881_v28  ;;  %v2355_v1 = vpop.eup %2354 }
 0x507   : > { %v541_v62 = vpop.permute.xlu0 %540  ;;  %v1047_v3 = vmul.f32 %v2355_v1, %v2869_v17  ;;  %v2357_v6 = vpop.eup %2356  ;;  %v1436_v17 = vld [vmem:[#allocation10 + $0x2] sm:$0x3] }
 0x508   : > { %544 = vst.msk [vmem:[#allocation4 + $0x18] sm:$0xf] %vm448_vm2, %v541_v62  ;;  %v1053_v0 = vpack.c.bf16 %v1045_v61, %v1045_v61  ;;  %v1049_v15 = vmul.f32 %v2357_v6, %v2873_v19  ;;  %v1494_v20 = vsel %vm1446_vm6, %v1436_v17, 0  ;;  %v1437_v19 = vld [vmem:[#allocation10 + $0x4] sm:$0x3] }
 0x509   : > { %v1055_v9 = vpack.c.bf16 %v1047_v3, %v1047_v3  ;;  %v1540_v25 = vsel %vm1446_vm6, %v1437_v19, 0 }
 0x50a   : > { %2137 = vmatmul.mubr.msk.bf16.vlgmr.msra.gmra.mxu0 %vm961_vm5, %v1053_v0  ;;  %v1057_v18 = vpack.c.bf16 %v1049_v15, %v1049_v15 }
 0x50b   : > { %2147 = vmatpush3.bf16.msra.mxu0 %v1293_v2  ;;  %2148 = vmatprep.mubr.msk.bf16.mxu0 %vm2535_vm1, %v2534_v8 }
 0x50c   : > { %2158 = vmatprep.subr.bf16.mxu0 %v2534_v8 }
 0x50f   : > { %v590_v4 = vld [vmem:[#allocation4 + $0x18] sm:$0xf] }
 0x510   : > { %v1339_v7 = vsel %vm1061_vm4, %v590_v4, 0 }
 0x511   : > { %v2359_v10 = vpop.eup %2358  ;;  %2153 = vmatpush3.bf16.msra.mxu1 %v1339_v7 }
 0x512   : > { %2149 = vmatmul.mubr.msk.bf16.vlgmr.msra.gmra.mxu0 %vm961_vm5, %v1055_v9  ;;  %v1048_v13 = vmul.f32 %v2359_v10, %v2887_v22  ;;  %2164 = vmatprep.subr.bf16.mxu1 %v2534_v8  ;;  %v1586_v22 = vsel %vm1446_vm6, %v1438_v29, 0 }
 0x513   : > { %2159 = vmatpush3.bf16.msra.mxu0 %v1385_v12  ;;  %2160 = vmatprep.mubr.msk.bf16.mxu0 %vm2535_vm1, %v2534_v8 }
 0x514   : > { %v1056_v14 = vpack.c.bf16 %v1048_v13, %v1048_v13  ;;  %2170 = vmatprep.subr.bf16.mxu0 %v2534_v8 }
 0x516   : > { %2155 = vmatmul.mubr.msk.bf16.vlgmr.msra.gmra.mxu1 %vm961_vm5, %v1056_v14 }
 0x517   : > { %2165 = vmatpush3.bf16.msra.mxu1 %v1448_v16  ;;  %2166 = vmatprep.mubr.msk.bf16.mxu1 %vm2535_vm1, %v2534_v8 }
 0x518   : > { %2176 = vmatprep.subr.bf16.mxu1 %v2534_v8 }
 0x51a   : > { %2161 = vmatmul.mubr.msk.bf16.vlgmr.msra.gmra.mxu0 %vm961_vm5, %v1057_v18 }
 0x51b   : > { %2171 = vmatpush3.bf16.msra.mxu0 %v1494_v20  ;;  %2172 = vmatprep.mubr.msk.bf16.mxu0 %vm2535_vm1, %v2534_v8 }
 0x51c   : > { %2182 = vmatprep.subr.bf16.mxu0 %v2534_v8 }
 0x589   : > { %v1099_v21 = vpop.f32.mrf.mxu1 }
 0x58a   : > { %v1427_v23 = vpack.c.bf16 %v1099_v21, %v1099_v21 }
 0x58b   : > { %v2120_v26 = vpop.f32.mrf.mxu1 }
 0x58c   : > { %2167 = vmatmul.mubr.msk.bf16.vlgmr.msra.gmra.mxu1 %vm592_vm3, %v1427_v23 }
 0x58d   : > { %v1102_v27 = vpop.f32.mrf.mxu1  ;;  %2177 = vmatpush3.bf16.msra.mxu1 %v1540_v25  ;;  %2178 = vmatprep.mubr.msk.bf16.mxu1 %vm2535_vm1, %v2534_v8 }
 0x58e   : > { %2188 = vmatprep.subr.bf16.mxu1 %v2534_v8 }
 0x58f   : > { %v2121_v28 = vpop.f32.mrf.mxu1 }
 0x595   : > { %v1145_v30 = vpop.f32.mrf.mxu0 }
 0x596   : > { %v1428_v31 = vpack.c.bf16 %v1145_v30, %v1145_v30 }
 0x597   : > { %v2126_v32 = vpop.f32.mrf.mxu0 }
 0x598   : > { %2173 = vmatmul.mubr.msk.bf16.vlgmr.msra.gmra.mxu0 %vm592_vm3, %v1428_v31 }
 0x599   : > { %v1148_v34 = vpop.f32.mrf.mxu0  ;;  %v1191_v35 = vpop.f32.mrf.mxu1  ;;  %2183 = vmatpush3.bf16.msra.mxu0 %v1586_v22  ;;  %2184 = vmatprep.mubr.msk.bf16.mxu0 %vm2535_vm1, %v2534_v8 }
 0x59a   : > { %v1429_v36 = vpack.c.bf16 %v1191_v35, %v1191_v35  ;;  %2194 = vmatprep.subr.bf16.mxu0 %v2534_v8 }
 0x59b   : > { %v2127_v38 = vpop.f32.mrf.mxu0  ;;  %v2132_v39 = vpop.f32.mrf.mxu1 }
 0x59c   : > { %2179 = vmatmul.mubr.msk.bf16.vlgmr.msra.gmra.mxu1 %vm592_vm3, %v1429_v36 }
 0x59d   : > { %v1194_v40 = vpop.f32.mrf.mxu1  ;;  %2189 = vmatpush3.bf16.msra.mxu1 %v1632_v37  ;;  %2190 = vmatprep.mubr.msk.bf16.mxu1 %vm2535_vm1, %v2534_v8 }
 0x59e   : > { %2200 = vmatprep.subr.bf16.mxu1 %v2534_v8 }
 0x59f   : > { %v2133_v41 = vpop.f32.mrf.mxu1 }
 0x5a1   : > { %v1283_v42 = vpop.f32.mrf.mxu1 }
 0x5a2   : > { %v1431_v43 = vpack.c.bf16 %v1283_v42, %v1283_v42 }
 0x5a3   : > { %v2144_v45 = vpop.f32.mrf.mxu1 }
 0x5a4   : > { %2191 = vmatmul.mubr.msk.bf16.vlgmr.msra.gmra.mxu1 %vm592_vm3, %v1431_v43 }
 0x5a5   : > { %v1286_v46 = vpop.f32.mrf.mxu1  ;;  %2201 = vmatpush3.bf16.msra.mxu1 %v1724_v44  ;;  %2202 = vmatprep.mubr.msk.bf16.mxu1 %vm2535_vm1, %v2534_v8 }
 0x5a7   : > { %v2145_v47 = vpop.f32.mrf.mxu1 }
 0x5ca   : > { %v1237_v49 = vpop.f32.mrf.mxu0 }
 0x5cb   : > { %v1430_v50 = vpack.c.bf16 %v1237_v49, %v1237_v49 }
 0x5cc   : > { %v2138_v52 = vpop.f32.mrf.mxu0 }
 0x5cd   : > { %2185 = vmatmul.mubr.msk.bf16.vlgmr.msra.gmra.mxu0 %vm592_vm3, %v1430_v50  ;;  %v2002_v50 = vld [vmem:[%s3034_s6] ss:$0 sm:$0xff] }
 0x5ce   : > { %v1240_v53 = vpop.f32.mrf.mxu0  ;;  %2195 = vmatpush3.bf16.msra.mxu0 %v1678_v51  ;;  %2196 = vmatprep.mubr.msk.bf16.mxu0 %vm2535_vm1, %v2534_v8 }
 0x5cf   : > { %2206 = vmatprep.subr.bf16.mxu0 %v2534_v8 }
 0x5d0   : > { %v2139_v54 = vpop.f32.mrf.mxu0 }
 0x5d2   : > { %v1329_v56 = vpop.f32.mrf.mxu0 }
 0x5d3   : > { %v1432_v57 = vpack.c.bf16 %v1329_v56, %v1329_v56  ;;  %v2360_v56 = vld [vmem:[%s2728_s19] sm:$0xff] }
 0x5d4   : > { %v2150_v59 = vpop.f32.mrf.mxu0 }
 0x5d5   : > { %2197 = vmatmul.mubr.msk.bf16.vlgmr.msra.gmra.mxu0 %vm592_vm3, %v1432_v57 }
 0x5d6   : > { %v1332_v60 = vpop.f32.mrf.mxu0  ;;  %v1375_v61 = vpop.f32.mrf.mxu1  ;;  %2207 = vmatpush3.bf16.msra.mxu0 %v1770_v58  ;;  %2208 = vmatprep.mubr.msk.bf16.mxu0 %vm2535_vm1, %v2534_v8 }
 0x5d7   : > { %v1433_v62 = vpack.c.bf16 %v1375_v61, %v1375_v61 }
 0x5d8   : > { %v2151_v63 = vpop.f32.mrf.mxu0  ;;  %v2156_v0 = vpop.f32.mrf.mxu1 }
 0x5d9   : > { %2203 = vmatmul.mubr.msk.bf16.vlgmr.msra.gmra.mxu1 %vm592_vm3, %v1433_v62 }
 0x5da   : > { %v1378_v1 = vpop.f32.mrf.mxu1  ;;  %v1421_v2 = vpop.f32.mrf.mxu0 }
 0x5db   : > { %v1434_v3 = vpack.c.bf16 %v1421_v2, %v1421_v2 }
 0x5dc   : > { %v2157_v4 = vpop.f32.mrf.mxu1  ;;  %v2162_v5 = vpop.f32.mrf.mxu0 }
 0x5dd   : > { %2209 = vmatmul.mubr.msk.bf16.vlgmr.msra.gmra.mxu0 %vm592_vm3, %v1434_v3 }
 0x5de   : > { %v1424_v6 = vpop.f32.mrf.mxu0 }
 0x5e0   : > { %v2163_v7 = vpop.f32.mrf.mxu0 }
 0x64c   : > { %v1484_v9 = vpop.f32.mrf.mxu1 }
 0x64d   : > { %v1813_v29 = vsel %vm343_vm0, %v1484_v9, 0.0 }
 0x64e   : > { %v2168_v10 = vpop.f32.mrf.mxu1 }
 0x650   : > { %v1487_v11 = vpop.f32.mrf.mxu1 }
 0x652   : > { %v2169_v12 = vpop.f32.mrf.mxu1 }
 0x658   : > { %v1530_v13 = vpop.f32.mrf.mxu0 }
 0x659   : > { %v1814_v27 = vsel %vm343_vm0, %v1530_v13, 0.0 }
 0x65a   : > { %v2174_v8 = vpop.f32.mrf.mxu0  ;;  %v1815_v31 = vadd.f32 %v1814_v27, %v1813_v29 }
 0x65c   : > { %v1533_v14 = vpop.f32.mrf.mxu0  ;;  %v1576_v15 = vpop.f32.mrf.mxu1 }
 0x65d   : > { %v1816_v30 = vsel %vm343_vm0, %v1576_v15, 0.0 }
 0x65e   : > { %v2175_v16 = vpop.f32.mrf.mxu0  ;;  %v2180_v17 = vpop.f32.mrf.mxu1  ;;  %v1817_v33 = vadd.f32 %v1816_v30, %v1815_v31 }
 0x660   : > { %v1579_v18 = vpop.f32.mrf.mxu1 }
 0x662   : > { %v2181_v20 = vpop.f32.mrf.mxu1 }
 0x664   : > { %v1668_v19 = vpop.f32.mrf.mxu1 }
 0x665   : > { %v1820_v38 = vsel %vm343_vm0, %v1668_v19, 0.0 }
 0x666   : > { %v2192_v21 = vpop.f32.mrf.mxu1 }
 0x668   : > { %v1671_v23 = vpop.f32.mrf.mxu1 }
 0x66a   : > { %v2193_v25 = vpop.f32.mrf.mxu1 }
 0x68d   : > { %v1622_v26 = vpop.f32.mrf.mxu0 }
 0x68e   : > { %v1818_v32 = vsel %vm343_vm0, %v1622_v26, 0.0 }
 0x68f   : > { %v2186_v28 = vpop.f32.mrf.mxu0  ;;  %v1819_v35 = vadd.f32 %v1818_v32, %v1817_v33 }
 0x691   : > { %v1625_v22 = vpop.f32.mrf.mxu0  ;;  %v1821_v40 = vadd.f32 %v1820_v38, %v1819_v35 }
 0x693   : > { %v2187_v34 = vpop.f32.mrf.mxu0 }
 0x695   : > { %v1714_v36 = vpop.f32.mrf.mxu0 }
 0x696   : > { %v1822_v39 = vsel %vm343_vm0, %v1714_v36, 0.0 }
 0x697   : > { %v2198_v37 = vpop.f32.mrf.mxu0  ;;  %v1823_v43 = vadd.f32 %v1822_v39, %v1821_v40 }
 0x699   : > { %v1717_v41 = vpop.f32.mrf.mxu0  ;;  %v1760_v24 = vpop.f32.mrf.mxu1 }
 0x69a   : > { %v1824_v42 = vsel %vm343_vm0, %v1760_v24, 0.0 }
 0x69b   : > { %v2199_v44 = vpop.f32.mrf.mxu0  ;;  %v2204_v45 = vpop.f32.mrf.mxu1  ;;  %v1825_v46 = vadd.f32 %v1824_v42, %v1823_v43 }
 0x69d   : > { %v1763_v47 = vpop.f32.mrf.mxu1  ;;  %v1806_v48 = vpop.f32.mrf.mxu0 }
 0x69e   : > { %v1826_v49 = vsel %vm343_vm0, %v1806_v48, 0.0 }
 0x69f   : > { %v1827_v51 = vadd.f32 %v1826_v49, %v1825_v46  ;;  %v2205_v52 = vpop.f32.mrf.mxu1  ;;  %v2210_v53 = vpop.f32.mrf.mxu0 }
 0x6a1   : > { %v1835_v54 = vadd.f32 %v2002_v50, %v1827_v51  ;;  %v1809_v55 = vpop.f32.mrf.mxu0 }
 0x6a3   : > { %v1838_v57 = vadd.f32 %v2360_v56, %v1835_v54  ;;  %v2211_v58 = vpop.f32.mrf.mxu0 }
 0x6a5   : > { %1839 = vst.msk [vmem:[%s336_s15] sm:$0xff] %vm343_vm0, %v1838_v57 }
 0x6a6   : > { %2454 = shalt.err (!%p2451_p5)
}
 0x6a7   : > { %s2455_s19 = scalar_lea.hbm %s1853_s20, 128  ;;  %s2459_s9 = scalar_lea.hbm %s3035_s7, 256 }
 0x6a8   : > { %p2456_p10 = scmp.ne.s32.totalorder %s1853_s20, %s2455_s19  ;;  %p2460_p6 = scmp.lt.s32.totalorder %s1853_s20, %s3035_s7 }
 0x6a9   : > { %p2461_p12 = scmp.lt.s32.totalorder %s2459_s9, %s2455_s19 }
 0x6aa   : > { %p2457_p1 = pnand %p2456_p10, %p2695_p7 }
 0x6ab   : > { %p2462_p3 = por %p2461_p12, %p2460_p6 }
 0x6ac   : > { %p2458_p4 = pneg %p2457_p1 }
 0x6ae   : > { %p2463_p8 = pnand %p2462_p3, %p2458_p4 }
 0x6b0   : > { %2466 = shalt.err (!%p2463_p8)
}
 0x6b1   : > { %2222 = dma.vmem_to_hbm [thread:$0]  (%p2695_p7), %s1856_s17, 128, %s1853_s20, %s1841_s23  }
 0x6b2 PF: > { %s1867_s14 = sand.u32 1, %s2505_s24   ;;  %p3055_p9 = scmp.ne.s32.totalorder %s3045_s12, 0 }
 0x6b3   : > { %p3056_p11 = scmp.ge.s32.totalorder %s2525_s29, 2  ;;  %s1868_s15 = scalar_lea.sflag [#allocation7], %s1867_s14 }
 0x6b5   : > { %p2236_p2 = pnand %p3056_p11, %p3055_p9 }
 0x6b7   : > { %p2237_p13 = pneg %p2236_p2 }
 0x6b9   : > { %2500 = dma.done.wait (%p2237_p13), %s1868_s15, 128  }
 0x6ba   : > { %2502 = vsyncadd (%p2237_p13), %s1868_s15, 4294967168  ;;  %s24_s29 = sadd.s32 1, %s2525_s29   ;;  %s3057_s21 = sld [smem:[#allocation15_spill]] }
 0x6bb   : > { %p21_p0 = scmp.ge.s32.totalorder %s24_s29, 4   ;;  %s3058_s24 = smov %s2509_s25 }
 0x6bc   : > { %s3059_s25 = smov %s2513_s26  ;;  %s3060_s26 = smov %s2704_s30 }
 0x6bd   : > { %s3061_s27 = smov %s2521_s28  ;;  %23 = sbr.rel (!%p21_p0) target bundleno = 10 (0xa), region = 128 }
 0x6c0   : > { %s3062_s28 = smov %s3057_s21 }
 0x6c2   :  { %1873 = vsyncpa [#allocation6], 1 }
 0x6c3   :  { %1875 = vsyncpa [#allocation6 + $0x1], 1 }
 0x6c4   :  { %1876 = vsyncpa [#allocation9], 1 }
 0x6c5   :  { %1877 = vsyncpa [#allocation7], 1 }
 0x6c6   :  { %1879 = vsyncpa [#allocation7 + $0x1], 1 }

</bundles_post_ra>
